<compile_context>
chip_gen: v6e
topology: v6e:2x2x1
jax: 0.10.0
libtpu: 0.0.40
codegen_flags: <defaults>
</compile_context>

<pallas_src>
import jax
import jax.numpy as jnp
import numpy as np
from jax import lax
from jax.experimental import pallas as pl
from jax.experimental.pallas import tpu as pltpu

# Module defaults (from the PyTorch __init__)
REDUCTION = 16
NUM_LAYERS = 3
DIA_VAL = 2
EPS = 1e-5


def _bn_relu(y, gamma, beta):
    # y: (N, Cr), gamma/beta: (1, Cr). Train-mode BatchNorm (batch stats) + ReLU.
    mean = jnp.mean(y, axis=0, keepdims=True)
    var = jnp.mean((y - mean) ** 2, axis=0, keepdims=True)
    return jnp.maximum((y - mean) * lax.rsqrt(var + EPS) * gamma + beta, 0.0)


def spatial_attention_kernel(x_ref, w1_ref, b1_ref, gam_ref, bet_ref,
                             wck_ref, bc_ref, wl_ref, bl_ref, out_ref, pad_ref):
    # x_ref:   (B*H*W, C)  input rows (flattened NHWC, done in the wrapper)
    # w1_ref:  (C, Cr)     conv_reduce1 (1x1)
    # b1_ref:  (1, Cr)
    # gam_ref: (NUM_LAYERS+1, Cr), bet_ref: (NUM_LAYERS+1, Cr)   BN affine
    # wck_ref: (NUM_LAYERS, 9*Cr, Cr)  dilated 3x3 convs, taps stacked on K
    # bc_ref:  (NUM_LAYERS, Cr)
    # wl_ref:  (1, Cr)     last_conv (Cr -> 1), pre-transposed
    # bl_ref:  (1, 1)
    # out_ref: (B, 1)      per-batch attention scalar (expand_as happens outside)
    # pad_ref: (B, H+2, W+2, Cr) VMEM scratch used for zero padding
    B, Hp, Wp, Cr = pad_ref.shape
    H, W = Hp - 2, Wp - 2

    # ---- conv_reduce1 (1x1 conv == channel matmul) + BN + ReLU ----
    y = jnp.dot(x_ref[...], w1_ref[...], preferred_element_type=jnp.float32)
    y = _bn_relu(y + b1_ref[...], gam_ref[0:1, :], bet_ref[0:1, :])
    feat = y.reshape(B, H, W, Cr)

    # ---- NUM_LAYERS x (3x3 conv, dilation=2, padding=1) + BN + ReLU ----
    Hc, Wc = H, W
    for layer in range(NUM_LAYERS):
        Ho, Wo = Hc - 2, Wc - 2      # k=3, pad=1, dil=2 -> output shrinks by 2
        No = B * Ho * Wo
        # Zero-pad via scratch; re-zero (cheap, ~2.5 KB) because the valid
        # window shrinks each layer and would otherwise leave stale borders.
        pad_ref[...] = jnp.zeros_like(pad_ref)
        pad_ref[:, 1:Hc + 1, 1:Wc + 1, :] = feat
        # Gather the 9 dilated taps and stack them along the contraction axis.
        taps = []
        for kh in range(3):
            for kw in range(3):
                taps.append(
                    pad_ref[:, kh * DIA_VAL:kh * DIA_VAL + Ho,
                            kw * DIA_VAL:kw * DIA_VAL + Wo, :].reshape(No, Cr))
        pmat = jnp.concatenate(taps, axis=1)                 # (No, 9*Cr)
        # Single fused matmul per layer (was 9 tiny K=Cr matmuls).
        acc = jnp.dot(pmat, wck_ref[layer],
                      preferred_element_type=jnp.float32)    # (No, Cr)
        acc = acc + bc_ref[layer:layer + 1, :]
        acc = _bn_relu(acc, gam_ref[layer + 1:layer + 2, :],
                       bet_ref[layer + 1:layer + 2, :])
        feat = acc.reshape(B, Ho, Wo, Cr)
        Hc, Wc = Ho, Wo

    # ---- last_conv (1x1, Cr -> 1); spatial is now 1x1, so feat is (B,1,1,Cr).
    # Done as VPU multiply + lane reduce: no MXU round trip for a 4-wide dot.
    f = feat.reshape(B, Cr)
    att = jnp.sum(f * wl_ref[...], axis=1, keepdims=True) + bl_ref[...]
    out_ref[...] = att


@jax.jit
def spatial_attention(x_nchw, params):
    B, C, H, W = x_nchw.shape
    assert H - 2 * NUM_LAYERS == 1 and W - 2 * NUM_LAYERS == 1, \
        "expand_as requires the shrunk attention map to be 1x1 (use 7x7 input)"
    Cr = params['w1'].shape[1]
    N = B * H * W

    # Layout plumbing stays in XLA (free): flatten NCHW -> (N, C) rows,
    # pre-stack conv taps on the K axis, pre-transpose the last conv.
    x2d = jnp.transpose(x_nchw, (0, 2, 3, 1)).reshape(N, C)
    wck = params['wc'].reshape(NUM_LAYERS, 9 * Cr, Cr)
    wlr = params['wl'].T                                      # (1, Cr)

    vmem = pl.BlockSpec(memory_space=pltpu.MemorySpace.VMEM)
    att = pl.pallas_call(
        spatial_attention_kernel,
        out_shape=jax.ShapeDtypeStruct((B, 1), jnp.float32),
        in_specs=[vmem] * 9,
        out_specs=vmem,
        scratch_shapes=[pltpu.VMEM((B, H + 2, W + 2, Cr), jnp.float32)],
    )(x2d, params['w1'], params['b1'], params['gammas'], params['betas'],
      wck, params['bc'], wlr, params['bl'])

    # res.expand_as(x): broadcast the per-batch scalar over (B, C, H, W) in XLA,
    # keeping all redundant store traffic out of the kernel.
    return jnp.broadcast_to(att.reshape(B, 1, 1, 1), (B, C, H, W))


def init_params(key, channel):
    cr = channel // REDUCTION
    ks = jax.random.split(key, 8)
    return dict(
        w1=0.1 * jax.random.normal(ks[0], (channel, cr), jnp.float32),
        b1=0.1 * jax.random.normal(ks[1], (1, cr), jnp.float32),
        gammas=1.0 + 0.1 * jax.random.normal(ks[2], (NUM_LAYERS + 1, cr), jnp.float32),
        betas=0.1 * jax.random.normal(ks[3], (NUM_LAYERS + 1, cr), jnp.float32),
        wc=0.1 * jax.random.normal(ks[4], (NUM_LAYERS, 9, cr, cr), jnp.float32),
        bc=0.1 * jax.random.normal(ks[5], (NUM_LAYERS, cr), jnp.float32),
        wl=0.1 * jax.random.normal(ks[6], (cr, 1), jnp.float32),
        bl=0.1 * jax.random.normal(ks[7], (1, 1), jnp.float32),
    )


def reference(x_nchw, p):
    # Pure-JAX reference mirroring the PyTorch forward (train-mode BN).
    B, C, H, W = x_nchw.shape
    cr = p['w1'].shape[1]
    x = jnp.transpose(x_nchw, (0, 2, 3, 1))  # NHWC

    def bn_relu(t, g, b):
        m = jnp.mean(t, axis=(0, 1, 2), keepdims=True)
        v = jnp.mean((t - m) ** 2, axis=(0, 1, 2), keepdims=True)
        return jnp.maximum((t - m) / jnp.sqrt(v + EPS) * g + b, 0.0)

    y = jnp.einsum('bhwc,cr->bhwr', x, p['w1']) + p['b1'].reshape(cr)
    y = bn_relu(y, p['gammas'][0], p['betas'][0])
    for l in range(NUM_LAYERS):
        w = p['wc'][l].reshape(3, 3, cr, cr)
        y = lax.conv_general_dilated(
            y, w, window_strides=(1, 1), padding=[(1, 1), (1, 1)],
            rhs_dilation=(DIA_VAL, DIA_VAL),
            dimension_numbers=('NHWC', 'HWIO', 'NHWC')) + p['bc'][l]
        y = bn_relu(y, p['gammas'][l + 1], p['betas'][l + 1])
    att = jnp.einsum('bhwc,co->bhwo', y, p['wl']) + p['bl'].reshape(1)
    att = jnp.transpose(att, (0, 3, 1, 2))  # (B,1,1,1)
    return jnp.broadcast_to(att, (B, C, H, W))


if __name__ == "__main__":
    # TODO(synk): BatchNorm running-stat updates (training-time side effect) are not modeled.
    B, C, H, W = 2, 64, 7, 7   # 7x7 spatial so the module's expand_as is valid
    key = jax.random.PRNGKey(0)
    kx, kp = jax.random.split(key)
    x = jax.random.normal(kx, (B, C, H, W), jnp.float32)
    params = init_params(kp, C)

    out = spatial_attention(x, params)
    out = jax.block_until_ready(out)

    ref = reference(x, params)
    np.testing.assert_allclose(np.asarray(out), np.asarray(ref),
                               atol=1e-4, rtol=1e-4)
    print("KERNEL_OK")
</pallas_src>

<mosaic_0001>
module attributes {stable_mosaic.version = 11 : i64} {
  func.func @spatial_attention_kernel(%arg0: memref<98x64xf32, #tpu.memory_space<vmem>>, %arg1: memref<64x4xf32, #tpu.memory_space<vmem>>, %arg2: memref<1x4xf32, #tpu.memory_space<vmem>>, %arg3: memref<4x4xf32, #tpu.memory_space<vmem>>, %arg4: memref<4x4xf32, #tpu.memory_space<vmem>>, %arg5: memref<3x36x4xf32, #tpu.memory_space<vmem>>, %arg6: memref<3x4xf32, #tpu.memory_space<vmem>>, %arg7: memref<1x4xf32, #tpu.memory_space<vmem>>, %arg8: memref<1x1xf32, #tpu.memory_space<vmem>>, %arg9: memref<2x1xf32, #tpu.memory_space<vmem>>, %arg10: memref<2x9x9x4xf32, #tpu.memory_space<vmem>>) attributes {dimension_semantics = [], scalar_prefetch = 0 : i64, scratch_operands = 1 : i64, tpu.core_type = #tpu.core_type<tc>} {
    %c0 = arith.constant 0 : index
    %c0_0 = arith.constant 0 : index
    %0 = vector.load %arg0[%c0, %c0_0] : memref<98x64xf32, #tpu.memory_space<vmem>>, vector<98x64xf32>
    %c0_1 = arith.constant 0 : index
    %c0_2 = arith.constant 0 : index
    %1 = vector.load %arg1[%c0_1, %c0_2] : memref<64x4xf32, #tpu.memory_space<vmem>>, vector<64x4xf32>
    %cst = arith.constant dense<0.000000e+00> : vector<98x4xf32>
    %2 = tpu.matmul %0, %1, %cst {dimension_numbers = #tpu.dot_dimension_numbers<[1], [0], [0], [1], [0, 0, 1, 1], [], []>} : vector<98x64xf32>, vector<64x4xf32>, vector<98x4xf32> -> vector<98x4xf32>
    %c0_3 = arith.constant 0 : index
    %c0_4 = arith.constant 0 : index
    %3 = vector.load %arg2[%c0_3, %c0_4] : memref<1x4xf32, #tpu.memory_space<vmem>>, vector<1x4xf32>
    %4 = vector.broadcast %3 : vector<1x4xf32> to vector<98x4xf32>
    %5 = arith.addf %2, %4 : vector<98x4xf32>
    %c0_5 = arith.constant 0 : index
    %c0_6 = arith.constant 0 : index
    %6 = vector.load %arg3[%c0_5, %c0_6] : memref<4x4xf32, #tpu.memory_space<vmem>>, vector<1x4xf32>
    %c0_7 = arith.constant 0 : index
    %c0_8 = arith.constant 0 : index
    %7 = vector.load %arg4[%c0_7, %c0_8] : memref<4x4xf32, #tpu.memory_space<vmem>>, vector<1x4xf32>
    %cst_9 = arith.constant dense<0.000000e+00> : vector<4xf32>
    %8 = vector.multi_reduction <add>, %5, %cst_9 [0] : vector<98x4xf32> to vector<4xf32>
    %9 = vector.shape_cast %8 : vector<4xf32> to vector<1x4xf32>
    %cst_10 = arith.constant 9.800000e+01 : f32
    %10 = vector.broadcast %cst_10 : f32 to vector<1x4xf32>
    %11 = arith.divf %9, %10 : vector<1x4xf32>
    %12 = vector.broadcast %11 : vector<1x4xf32> to vector<98x4xf32>
    %13 = arith.subf %5, %12 : vector<98x4xf32>
    %14 = arith.mulf %13, %13 : vector<98x4xf32>
    %cst_11 = arith.constant dense<0.000000e+00> : vector<4xf32>
    %15 = vector.multi_reduction <add>, %14, %cst_11 [0] : vector<98x4xf32> to vector<4xf32>
    %16 = vector.shape_cast %15 : vector<4xf32> to vector<1x4xf32>
    %cst_12 = arith.constant 9.800000e+01 : f32
    %17 = vector.broadcast %cst_12 : f32 to vector<1x4xf32>
    %18 = arith.divf %16, %17 : vector<1x4xf32>
    %19 = vector.broadcast %11 : vector<1x4xf32> to vector<98x4xf32>
    %20 = arith.subf %5, %19 : vector<98x4xf32>
    %cst_13 = arith.constant 9.99999974E-6 : f32
    %21 = vector.broadcast %cst_13 : f32 to vector<1x4xf32>
    %22 = arith.addf %18, %21 : vector<1x4xf32>
    %23 = math.rsqrt %22 : vector<1x4xf32>
    %24 = vector.broadcast %23 : vector<1x4xf32> to vector<98x4xf32>
    %25 = arith.mulf %20, %24 : vector<98x4xf32>
    %26 = vector.broadcast %6 : vector<1x4xf32> to vector<98x4xf32>
    %27 = arith.mulf %25, %26 : vector<98x4xf32>
    %28 = vector.broadcast %7 : vector<1x4xf32> to vector<98x4xf32>
    %29 = arith.addf %27, %28 : vector<98x4xf32>
    %cst_14 = arith.constant 0.000000e+00 : f32
    %30 = vector.broadcast %cst_14 : f32 to vector<98x4xf32>
    %31 = arith.maximumf %29, %30 : vector<98x4xf32>
    %32 = vector.shape_cast %31 : vector<98x4xf32> to vector<2x7x7x4xf32>
    %cst_15 = arith.constant 0.000000e+00 : f32
    %33 = vector.broadcast %cst_15 : f32 to vector<2x9x9x4xf32>
    %c0_16 = arith.constant 0 : index
    %c0_17 = arith.constant 0 : index
    %c0_18 = arith.constant 0 : index
    %c0_19 = arith.constant 0 : index
    %34 = vector.load %arg10[%c0_16, %c0_17, %c0_18, %c0_19] : memref<2x9x9x4xf32, #tpu.memory_space<vmem>>, vector<2x9x9x4xf32>
    tpu.vector_store %arg10[%c0_16, %c0_17, %c0_18, %c0_19], %33 {strides = array<i32>} : memref<2x9x9x4xf32, #tpu.memory_space<vmem>>, vector<2x9x9x4xf32>,
    %c0_20 = arith.constant 0 : index
    %c1 = arith.constant 1 : index
    %c1_21 = arith.constant 1 : index
    %c0_22 = arith.constant 0 : index
    %35 = vector.load %arg10[%c0_20, %c1, %c1_21, %c0_22] : memref<2x9x9x4xf32, #tpu.memory_space<vmem>>, vector<2x7x7x4xf32>
    tpu.vector_store %arg10[%c0_20, %c1, %c1_21, %c0_22], %32 {strides = array<i32>} : memref<2x9x9x4xf32, #tpu.memory_space<vmem>>, vector<2x7x7x4xf32>,
    %c0_23 = arith.constant 0 : index
    %c0_24 = arith.constant 0 : index
    %c0_25 = arith.constant 0 : index
    %c0_26 = arith.constant 0 : index
    %36 = vector.load %arg10[%c0_23, %c0_24, %c0_25, %c0_26] : memref<2x9x9x4xf32, #tpu.memory_space<vmem>>, vector<2x5x5x4xf32>
    %37 = vector.shape_cast %36 : vector<2x5x5x4xf32> to vector<50x4xf32>
    %c0_27 = arith.constant 0 : index
    %c0_28 = arith.constant 0 : index
    %c2 = arith.constant 2 : index
    %c0_29 = arith.constant 0 : index
    %38 = vector.load %arg10[%c0_27, %c0_28, %c2, %c0_29] : memref<2x9x9x4xf32, #tpu.memory_space<vmem>>, vector<2x5x5x4xf32>
    %39 = vector.shape_cast %38 : vector<2x5x5x4xf32> to vector<50x4xf32>
    %c0_30 = arith.constant 0 : index
    %c0_31 = arith.constant 0 : index
    %c4 = arith.constant 4 : index
    %c0_32 = arith.constant 0 : index
    %40 = vector.load %arg10[%c0_30, %c0_31, %c4, %c0_32] : memref<2x9x9x4xf32, #tpu.memory_space<vmem>>, vector<2x5x5x4xf32>
    %41 = vector.shape_cast %40 : vector<2x5x5x4xf32> to vector<50x4xf32>
    %c0_33 = arith.constant 0 : index
    %c2_34 = arith.constant 2 : index
    %c0_35 = arith.constant 0 : index
    %c0_36 = arith.constant 0 : index
    %42 = vector.load %arg10[%c0_33, %c2_34, %c0_35, %c0_36] : memref<2x9x9x4xf32, #tpu.memory_space<vmem>>, vector<2x5x5x4xf32>
    %43 = vector.shape_cast %42 : vector<2x5x5x4xf32> to vector<50x4xf32>
    %c0_37 = arith.constant 0 : index
    %c2_38 = arith.constant 2 : index
    %c2_39 = arith.constant 2 : index
    %c0_40 = arith.constant 0 : index
    %44 = vector.load %arg10[%c0_37, %c2_38, %c2_39, %c0_40] : memref<2x9x9x4xf32, #tpu.memory_space<vmem>>, vector<2x5x5x4xf32>
    %45 = vector.shape_cast %44 : vector<2x5x5x4xf32> to vector<50x4xf32>
    %c0_41 = arith.constant 0 : index
    %c2_42 = arith.constant 2 : index
    %c4_43 = arith.constant 4 : index
    %c0_44 = arith.constant 0 : index
    %46 = vector.load %arg10[%c0_41, %c2_42, %c4_43, %c0_44] : memref<2x9x9x4xf32, #tpu.memory_space<vmem>>, vector<2x5x5x4xf32>
    %47 = vector.shape_cast %46 : vector<2x5x5x4xf32> to vector<50x4xf32>
    %c0_45 = arith.constant 0 : index
    %c4_46 = arith.constant 4 : index
    %c0_47 = arith.constant 0 : index
    %c0_48 = arith.constant 0 : index
    %48 = vector.load %arg10[%c0_45, %c4_46, %c0_47, %c0_48] : memref<2x9x9x4xf32, #tpu.memory_space<vmem>>, vector<2x5x5x4xf32>
    %49 = vector.shape_cast %48 : vector<2x5x5x4xf32> to vector<50x4xf32>
    %c0_49 = arith.constant 0 : index
    %c4_50 = arith.constant 4 : index
    %c2_51 = arith.constant 2 : index
    %c0_52 = arith.constant 0 : index
    %50 = vector.load %arg10[%c0_49, %c4_50, %c2_51, %c0_52] : memref<2x9x9x4xf32, #tpu.memory_space<vmem>>, vector<2x5x5x4xf32>
    %51 = vector.shape_cast %50 : vector<2x5x5x4xf32> to vector<50x4xf32>
    %c0_53 = arith.constant 0 : index
    %c4_54 = arith.constant 4 : index
    %c4_55 = arith.constant 4 : index
    %c0_56 = arith.constant 0 : index
    %52 = vector.load %arg10[%c0_53, %c4_54, %c4_55, %c0_56] : memref<2x9x9x4xf32, #tpu.memory_space<vmem>>, vector<2x5x5x4xf32>
    %53 = vector.shape_cast %52 : vector<2x5x5x4xf32> to vector<50x4xf32>
    %54 = tpu.concatenate %37, %39, %41, %43, %45, %47, %49, %51, %53 in 1 : vector<50x4xf32>, vector<50x4xf32>, vector<50x4xf32>, vector<50x4xf32>, vector<50x4xf32>, vector<50x4xf32>, vector<50x4xf32>, vector<50x4xf32>, vector<50x4xf32> -> vector<50x36xf32>
    %c0_57 = arith.constant 0 : index
    %c0_58 = arith.constant 0 : index
    %c0_59 = arith.constant 0 : index
    %55 = vector.load %arg5[%c0_57, %c0_58, %c0_59] : memref<3x36x4xf32, #tpu.memory_space<vmem>>, vector<1x36x4xf32>
    %56 = vector.shape_cast %55 : vector<1x36x4xf32> to vector<36x4xf32>
    %cst_60 = arith.constant dense<0.000000e+00> : vector<50x4xf32>
    %57 = tpu.matmul %54, %56, %cst_60 {dimension_numbers = #tpu.dot_dimension_numbers<[1], [0], [0], [1], [0, 0, 1, 1], [], []>} : vector<50x36xf32>, vector<36x4xf32>, vector<50x4xf32> -> vector<50x4xf32>
    %c0_61 = arith.constant 0 : index
    %c0_62 = arith.constant 0 : index
    %58 = vector.load %arg6[%c0_61, %c0_62] : memref<3x4xf32, #tpu.memory_space<vmem>>, vector<1x4xf32>
    %59 = vector.broadcast %58 : vector<1x4xf32> to vector<50x4xf32>
    %60 = arith.addf %57, %59 : vector<50x4xf32>
    %c1_63 = arith.constant 1 : index
    %c0_64 = arith.constant 0 : index
    %61 = vector.load %arg3[%c1_63, %c0_64] : memref<4x4xf32, #tpu.memory_space<vmem>>, vector<1x4xf32>
    %c1_65 = arith.constant 1 : index
    %c0_66 = arith.constant 0 : index
    %62 = vector.load %arg4[%c1_65, %c0_66] : memref<4x4xf32, #tpu.memory_space<vmem>>, vector<1x4xf32>
    %cst_67 = arith.constant dense<0.000000e+00> : vector<4xf32>
    %63 = vector.multi_reduction <add>, %60, %cst_67 [0] : vector<50x4xf32> to vector<4xf32>
    %64 = vector.shape_cast %63 : vector<4xf32> to vector<1x4xf32>
    %cst_68 = arith.constant 5.000000e+01 : f32
    %65 = vector.broadcast %cst_68 : f32 to vector<1x4xf32>
    %66 = arith.divf %64, %65 : vector<1x4xf32>
    %67 = vector.broadcast %66 : vector<1x4xf32> to vector<50x4xf32>
    %68 = arith.subf %60, %67 : vector<50x4xf32>
    %69 = arith.mulf %68, %68 : vector<50x4xf32>
    %cst_69 = arith.constant dense<0.000000e+00> : vector<4xf32>
    %70 = vector.multi_reduction <add>, %69, %cst_69 [0] : vector<50x4xf32> to vector<4xf32>
    %71 = vector.shape_cast %70 : vector<4xf32> to vector<1x4xf32>
    %cst_70 = arith.constant 5.000000e+01 : f32
    %72 = vector.broadcast %cst_70 : f32 to vector<1x4xf32>
    %73 = arith.divf %71, %72 : vector<1x4xf32>
    %74 = vector.broadcast %66 : vector<1x4xf32> to vector<50x4xf32>
    %75 = arith.subf %60, %74 : vector<50x4xf32>
    %cst_71 = arith.constant 9.99999974E-6 : f32
    %76 = vector.broadcast %cst_71 : f32 to vector<1x4xf32>
    %77 = arith.addf %73, %76 : vector<1x4xf32>
    %78 = math.rsqrt %77 : vector<1x4xf32>
    %79 = vector.broadcast %78 : vector<1x4xf32> to vector<50x4xf32>
    %80 = arith.mulf %75, %79 : vector<50x4xf32>
    %81 = vector.broadcast %61 : vector<1x4xf32> to vector<50x4xf32>
    %82 = arith.mulf %80, %81 : vector<50x4xf32>
    %83 = vector.broadcast %62 : vector<1x4xf32> to vector<50x4xf32>
    %84 = arith.addf %82, %83 : vector<50x4xf32>
    %cst_72 = arith.constant 0.000000e+00 : f32
    %85 = vector.broadcast %cst_72 : f32 to vector<50x4xf32>
    %86 = arith.maximumf %84, %85 : vector<50x4xf32>
    %87 = vector.shape_cast %86 : vector<50x4xf32> to vector<2x5x5x4xf32>
    %cst_73 = arith.constant 0.000000e+00 : f32
    %88 = vector.broadcast %cst_73 : f32 to vector<2x9x9x4xf32>
    %c0_74 = arith.constant 0 : index
    %c0_75 = arith.constant 0 : index
    %c0_76 = arith.constant 0 : index
    %c0_77 = arith.constant 0 : index
    %89 = vector.load %arg10[%c0_74, %c0_75, %c0_76, %c0_77] : memref<2x9x9x4xf32, #tpu.memory_space<vmem>>, vector<2x9x9x4xf32>
    tpu.vector_store %arg10[%c0_74, %c0_75, %c0_76, %c0_77], %88 {strides = array<i32>} : memref<2x9x9x4xf32, #tpu.memory_space<vmem>>, vector<2x9x9x4xf32>,
    %c0_78 = arith.constant 0 : index
    %c1_79 = arith.constant 1 : index
    %c1_80 = arith.constant 1 : index
    %c0_81 = arith.constant 0 : index
    %90 = vector.load %arg10[%c0_78, %c1_79, %c1_80, %c0_81] : memref<2x9x9x4xf32, #tpu.memory_space<vmem>>, vector<2x5x5x4xf32>
    tpu.vector_store %arg10[%c0_78, %c1_79, %c1_80, %c0_81], %87 {strides = array<i32>} : memref<2x9x9x4xf32, #tpu.memory_space<vmem>>, vector<2x5x5x4xf32>,
    %c0_82 = arith.constant 0 : index
    %c0_83 = arith.constant 0 : index
    %c0_84 = arith.constant 0 : index
    %c0_85 = arith.constant 0 : index
    %91 = vector.load %arg10[%c0_82, %c0_83, %c0_84, %c0_85] : memref<2x9x9x4xf32, #tpu.memory_space<vmem>>, vector<2x3x3x4xf32>
    %92 = vector.shape_cast %91 : vector<2x3x3x4xf32> to vector<18x4xf32>
    %c0_86 = arith.constant 0 : index
    %c0_87 = arith.constant 0 : index
    %c2_88 = arith.constant 2 : index
    %c0_89 = arith.constant 0 : index
    %93 = vector.load %arg10[%c0_86, %c0_87, %c2_88, %c0_89] : memref<2x9x9x4xf32, #tpu.memory_space<vmem>>, vector<2x3x3x4xf32>
    %94 = vector.shape_cast %93 : vector<2x3x3x4xf32> to vector<18x4xf32>
    %c0_90 = arith.constant 0 : index
    %c0_91 = arith.constant 0 : index
    %c4_92 = arith.constant 4 : index
    %c0_93 = arith.constant 0 : index
    %95 = vector.load %arg10[%c0_90, %c0_91, %c4_92, %c0_93] : memref<2x9x9x4xf32, #tpu.memory_space<vmem>>, vector<2x3x3x4xf32>
    %96 = vector.shape_cast %95 : vector<2x3x3x4xf32> to vector<18x4xf32>
    %c0_94 = arith.constant 0 : index
    %c2_95 = arith.constant 2 : index
    %c0_96 = arith.constant 0 : index
    %c0_97 = arith.constant 0 : index
    %97 = vector.load %arg10[%c0_94, %c2_95, %c0_96, %c0_97] : memref<2x9x9x4xf32, #tpu.memory_space<vmem>>, vector<2x3x3x4xf32>
    %98 = vector.shape_cast %97 : vector<2x3x3x4xf32> to vector<18x4xf32>
    %c0_98 = arith.constant 0 : index
    %c2_99 = arith.constant 2 : index
    %c2_100 = arith.constant 2 : index
    %c0_101 = arith.constant 0 : index
    %99 = vector.load %arg10[%c0_98, %c2_99, %c2_100, %c0_101] : memref<2x9x9x4xf32, #tpu.memory_space<vmem>>, vector<2x3x3x4xf32>
    %100 = vector.shape_cast %99 : vector<2x3x3x4xf32> to vector<18x4xf32>
    %c0_102 = arith.constant 0 : index
    %c2_103 = arith.constant 2 : index
    %c4_104 = arith.constant 4 : index
    %c0_105 = arith.constant 0 : index
    %101 = vector.load %arg10[%c0_102, %c2_103, %c4_104, %c0_105] : memref<2x9x9x4xf32, #tpu.memory_space<vmem>>, vector<2x3x3x4xf32>
    %102 = vector.shape_cast %101 : vector<2x3x3x4xf32> to vector<18x4xf32>
    %c0_106 = arith.constant 0 : index
    %c4_107 = arith.constant 4 : index
    %c0_108 = arith.constant 0 : index
    %c0_109 = arith.constant 0 : index
    %103 = vector.load %arg10[%c0_106, %c4_107, %c0_108, %c0_109] : memref<2x9x9x4xf32, #tpu.memory_space<vmem>>, vector<2x3x3x4xf32>
    %104 = vector.shape_cast %103 : vector<2x3x3x4xf32> to vector<18x4xf32>
    %c0_110 = arith.constant 0 : index
    %c4_111 = arith.constant 4 : index
    %c2_112 = arith.constant 2 : index
    %c0_113 = arith.constant 0 : index
    %105 = vector.load %arg10[%c0_110, %c4_111, %c2_112, %c0_113] : memref<2x9x9x4xf32, #tpu.memory_space<vmem>>, vector<2x3x3x4xf32>
    %106 = vector.shape_cast %105 : vector<2x3x3x4xf32> to vector<18x4xf32>
    %c0_114 = arith.constant 0 : index
    %c4_115 = arith.constant 4 : index
    %c4_116 = arith.constant 4 : index
    %c0_117 = arith.constant 0 : index
    %107 = vector.load %arg10[%c0_114, %c4_115, %c4_116, %c0_117] : memref<2x9x9x4xf32, #tpu.memory_space<vmem>>, vector<2x3x3x4xf32>
    %108 = vector.shape_cast %107 : vector<2x3x3x4xf32> to vector<18x4xf32>
    %109 = tpu.concatenate %92, %94, %96, %98, %100, %102, %104, %106, %108 in 1 : vector<18x4xf32>, vector<18x4xf32>, vector<18x4xf32>, vector<18x4xf32>, vector<18x4xf32>, vector<18x4xf32>, vector<18x4xf32>, vector<18x4xf32>, vector<18x4xf32> -> vector<18x36xf32>
    %c1_118 = arith.constant 1 : index
    %c0_119 = arith.constant 0 : index
    %c0_120 = arith.constant 0 : index
    %110 = vector.load %arg5[%c1_118, %c0_119, %c0_120] : memref<3x36x4xf32, #tpu.memory_space<vmem>>, vector<1x36x4xf32>
    %111 = vector.shape_cast %110 : vector<1x36x4xf32> to vector<36x4xf32>
    %cst_121 = arith.constant dense<0.000000e+00> : vector<18x4xf32>
    %112 = tpu.matmul %109, %111, %cst_121 {dimension_numbers = #tpu.dot_dimension_numbers<[1], [0], [0], [1], [0, 0, 1, 1], [], []>} : vector<18x36xf32>, vector<36x4xf32>, vector<18x4xf32> -> vector<18x4xf32>
    %c1_122 = arith.constant 1 : index
    %c0_123 = arith.constant 0 : index
    %113 = vector.load %arg6[%c1_122, %c0_123] : memref<3x4xf32, #tpu.memory_space<vmem>>, vector<1x4xf32>
    %114 = vector.broadcast %113 : vector<1x4xf32> to vector<18x4xf32>
    %115 = arith.addf %112, %114 : vector<18x4xf32>
    %c2_124 = arith.constant 2 : index
    %c0_125 = arith.constant 0 : index
    %116 = vector.load %arg3[%c2_124, %c0_125] : memref<4x4xf32, #tpu.memory_space<vmem>>, vector<1x4xf32>
    %c2_126 = arith.constant 2 : index
    %c0_127 = arith.constant 0 : index
    %117 = vector.load %arg4[%c2_126, %c0_127] : memref<4x4xf32, #tpu.memory_space<vmem>>, vector<1x4xf32>
    %cst_128 = arith.constant dense<0.000000e+00> : vector<4xf32>
    %118 = vector.multi_reduction <add>, %115, %cst_128 [0] : vector<18x4xf32> to vector<4xf32>
    %119 = vector.shape_cast %118 : vector<4xf32> to vector<1x4xf32>
    %cst_129 = arith.constant 1.800000e+01 : f32
    %120 = vector.broadcast %cst_129 : f32 to vector<1x4xf32>
    %121 = arith.divf %119, %120 : vector<1x4xf32>
    %122 = vector.broadcast %121 : vector<1x4xf32> to vector<18x4xf32>
    %123 = arith.subf %115, %122 : vector<18x4xf32>
    %124 = arith.mulf %123, %123 : vector<18x4xf32>
    %cst_130 = arith.constant dense<0.000000e+00> : vector<4xf32>
    %125 = vector.multi_reduction <add>, %124, %cst_130 [0] : vector<18x4xf32> to vector<4xf32>
    %126 = vector.shape_cast %125 : vector<4xf32> to vector<1x4xf32>
    %cst_131 = arith.constant 1.800000e+01 : f32
    %127 = vector.broadcast %cst_131 : f32 to vector<1x4xf32>
    %128 = arith.divf %126, %127 : vector<1x4xf32>
    %129 = vector.broadcast %121 : vector<1x4xf32> to vector<18x4xf32>
    %130 = arith.subf %115, %129 : vector<18x4xf32>
    %cst_132 = arith.constant 9.99999974E-6 : f32
    %131 = vector.broadcast %cst_132 : f32 to vector<1x4xf32>
    %132 = arith.addf %128, %131 : vector<1x4xf32>
    %133 = math.rsqrt %132 : vector<1x4xf32>
    %134 = vector.broadcast %133 : vector<1x4xf32> to vector<18x4xf32>
    %135 = arith.mulf %130, %134 : vector<18x4xf32>
    %136 = vector.broadcast %116 : vector<1x4xf32> to vector<18x4xf32>
    %137 = arith.mulf %135, %136 : vector<18x4xf32>
    %138 = vector.broadcast %117 : vector<1x4xf32> to vector<18x4xf32>
    %139 = arith.addf %137, %138 : vector<18x4xf32>
    %cst_133 = arith.constant 0.000000e+00 : f32
    %140 = vector.broadcast %cst_133 : f32 to vector<18x4xf32>
    %141 = arith.maximumf %139, %140 : vector<18x4xf32>
    %142 = vector.shape_cast %141 : vector<18x4xf32> to vector<2x3x3x4xf32>
    %cst_134 = arith.constant 0.000000e+00 : f32
    %143 = vector.broadcast %cst_134 : f32 to vector<2x9x9x4xf32>
    %c0_135 = arith.constant 0 : index
    %c0_136 = arith.constant 0 : index
    %c0_137 = arith.constant 0 : index
    %c0_138 = arith.constant 0 : index
    %144 = vector.load %arg10[%c0_135, %c0_136, %c0_137, %c0_138] : memref<2x9x9x4xf32, #tpu.memory_space<vmem>>, vector<2x9x9x4xf32>
    tpu.vector_store %arg10[%c0_135, %c0_136, %c0_137, %c0_138], %143 {strides = array<i32>} : memref<2x9x9x4xf32, #tpu.memory_space<vmem>>, vector<2x9x9x4xf32>,
    %c0_139 = arith.constant 0 : index
    %c1_140 = arith.constant 1 : index
    %c1_141 = arith.constant 1 : index
    %c0_142 = arith.constant 0 : index
    %145 = vector.load %arg10[%c0_139, %c1_140, %c1_141, %c0_142] : memref<2x9x9x4xf32, #tpu.memory_space<vmem>>, vector<2x3x3x4xf32>
    tpu.vector_store %arg10[%c0_139, %c1_140, %c1_141, %c0_142], %142 {strides = array<i32>} : memref<2x9x9x4xf32, #tpu.memory_space<vmem>>, vector<2x3x3x4xf32>,
    %c0_143 = arith.constant 0 : index
    %c0_144 = arith.constant 0 : index
    %c0_145 = arith.constant 0 : index
    %c0_146 = arith.constant 0 : index
    %146 = vector.load %arg10[%c0_143, %c0_144, %c0_145, %c0_146] : memref<2x9x9x4xf32, #tpu.memory_space<vmem>>, vector<2x1x1x4xf32>
    %147 = vector.shape_cast %146 : vector<2x1x1x4xf32> to vector<2x4xf32>
    %c0_147 = arith.constant 0 : index
    %c0_148 = arith.constant 0 : index
    %c2_149 = arith.constant 2 : index
    %c0_150 = arith.constant 0 : index
    %148 = vector.load %arg10[%c0_147, %c0_148, %c2_149, %c0_150] : memref<2x9x9x4xf32, #tpu.memory_space<vmem>>, vector<2x1x1x4xf32>
    %149 = vector.shape_cast %148 : vector<2x1x1x4xf32> to vector<2x4xf32>
    %c0_151 = arith.constant 0 : index
    %c0_152 = arith.constant 0 : index
    %c4_153 = arith.constant 4 : index
    %c0_154 = arith.constant 0 : index
    %150 = vector.load %arg10[%c0_151, %c0_152, %c4_153, %c0_154] : memref<2x9x9x4xf32, #tpu.memory_space<vmem>>, vector<2x1x1x4xf32>
    %151 = vector.shape_cast %150 : vector<2x1x1x4xf32> to vector<2x4xf32>
    %c0_155 = arith.constant 0 : index
    %c2_156 = arith.constant 2 : index
    %c0_157 = arith.constant 0 : index
    %c0_158 = arith.constant 0 : index
    %152 = vector.load %arg10[%c0_155, %c2_156, %c0_157, %c0_158] : memref<2x9x9x4xf32, #tpu.memory_space<vmem>>, vector<2x1x1x4xf32>
    %153 = vector.shape_cast %152 : vector<2x1x1x4xf32> to vector<2x4xf32>
    %c0_159 = arith.constant 0 : index
    %c2_160 = arith.constant 2 : index
    %c2_161 = arith.constant 2 : index
    %c0_162 = arith.constant 0 : index
    %154 = vector.load %arg10[%c0_159, %c2_160, %c2_161, %c0_162] : memref<2x9x9x4xf32, #tpu.memory_space<vmem>>, vector<2x1x1x4xf32>
    %155 = vector.shape_cast %154 : vector<2x1x1x4xf32> to vector<2x4xf32>
    %c0_163 = arith.constant 0 : index
    %c2_164 = arith.constant 2 : index
    %c4_165 = arith.constant 4 : index
    %c0_166 = arith.constant 0 : index
    %156 = vector.load %arg10[%c0_163, %c2_164, %c4_165, %c0_166] : memref<2x9x9x4xf32, #tpu.memory_space<vmem>>, vector<2x1x1x4xf32>
    %157 = vector.shape_cast %156 : vector<2x1x1x4xf32> to vector<2x4xf32>
    %c0_167 = arith.constant 0 : index
    %c4_168 = arith.constant 4 : index
    %c0_169 = arith.constant 0 : index
    %c0_170 = arith.constant 0 : index
    %158 = vector.load %arg10[%c0_167, %c4_168, %c0_169, %c0_170] : memref<2x9x9x4xf32, #tpu.memory_space<vmem>>, vector<2x1x1x4xf32>
    %159 = vector.shape_cast %158 : vector<2x1x1x4xf32> to vector<2x4xf32>
    %c0_171 = arith.constant 0 : index
    %c4_172 = arith.constant 4 : index
    %c2_173 = arith.constant 2 : index
    %c0_174 = arith.constant 0 : index
    %160 = vector.load %arg10[%c0_171, %c4_172, %c2_173, %c0_174] : memref<2x9x9x4xf32, #tpu.memory_space<vmem>>, vector<2x1x1x4xf32>
    %161 = vector.shape_cast %160 : vector<2x1x1x4xf32> to vector<2x4xf32>
    %c0_175 = arith.constant 0 : index
    %c4_176 = arith.constant 4 : index
    %c4_177 = arith.constant 4 : index
    %c0_178 = arith.constant 0 : index
    %162 = vector.load %arg10[%c0_175, %c4_176, %c4_177, %c0_178] : memref<2x9x9x4xf32, #tpu.memory_space<vmem>>, vector<2x1x1x4xf32>
    %163 = vector.shape_cast %162 : vector<2x1x1x4xf32> to vector<2x4xf32>
    %164 = tpu.concatenate %147, %149, %151, %153, %155, %157, %159, %161, %163 in 1 : vector<2x4xf32>, vector<2x4xf32>, vector<2x4xf32>, vector<2x4xf32>, vector<2x4xf32>, vector<2x4xf32>, vector<2x4xf32>, vector<2x4xf32>, vector<2x4xf32> -> vector<2x36xf32>
    %c2_179 = arith.constant 2 : index
    %c0_180 = arith.constant 0 : index
    %c0_181 = arith.constant 0 : index
    %165 = vector.load %arg5[%c2_179, %c0_180, %c0_181] : memref<3x36x4xf32, #tpu.memory_space<vmem>>, vector<1x36x4xf32>
    %166 = vector.shape_cast %165 : vector<1x36x4xf32> to vector<36x4xf32>
    %cst_182 = arith.constant dense<0.000000e+00> : vector<2x4xf32>
    %167 = tpu.matmul %164, %166, %cst_182 {dimension_numbers = #tpu.dot_dimension_numbers<[1], [0], [0], [1], [0, 0, 1, 1], [], []>} : vector<2x36xf32>, vector<36x4xf32>, vector<2x4xf32> -> vector<2x4xf32>
    %c2_183 = arith.constant 2 : index
    %c0_184 = arith.constant 0 : index
    %168 = vector.load %arg6[%c2_183, %c0_184] : memref<3x4xf32, #tpu.memory_space<vmem>>, vector<1x4xf32>
    %169 = vector.broadcast %168 : vector<1x4xf32> to vector<2x4xf32>
    %170 = arith.addf %167, %169 : vector<2x4xf32>
    %c3 = arith.constant 3 : index
    %c0_185 = arith.constant 0 : index
    %171 = vector.load %arg3[%c3, %c0_185] : memref<4x4xf32, #tpu.memory_space<vmem>>, vector<1x4xf32>
    %c3_186 = arith.constant 3 : index
    %c0_187 = arith.constant 0 : index
    %172 = vector.load %arg4[%c3_186, %c0_187] : memref<4x4xf32, #tpu.memory_space<vmem>>, vector<1x4xf32>
    %cst_188 = arith.constant dense<0.000000e+00> : vector<4xf32>
    %173 = vector.multi_reduction <add>, %170, %cst_188 [0] : vector<2x4xf32> to vector<4xf32>
    %174 = vector.shape_cast %173 : vector<4xf32> to vector<1x4xf32>
    %cst_189 = arith.constant 2.000000e+00 : f32
    %175 = vector.broadcast %cst_189 : f32 to vector<1x4xf32>
    %176 = arith.divf %174, %175 : vector<1x4xf32>
    %177 = vector.broadcast %176 : vector<1x4xf32> to vector<2x4xf32>
    %178 = arith.subf %170, %177 : vector<2x4xf32>
    %179 = arith.mulf %178, %178 : vector<2x4xf32>
    %cst_190 = arith.constant dense<0.000000e+00> : vector<4xf32>
    %180 = vector.multi_reduction <add>, %179, %cst_190 [0] : vector<2x4xf32> to vector<4xf32>
    %181 = vector.shape_cast %180 : vector<4xf32> to vector<1x4xf32>
    %cst_191 = arith.constant 2.000000e+00 : f32
    %182 = vector.broadcast %cst_191 : f32 to vector<1x4xf32>
    %183 = arith.divf %181, %182 : vector<1x4xf32>
    %184 = vector.broadcast %176 : vector<1x4xf32> to vector<2x4xf32>
    %185 = arith.subf %170, %184 : vector<2x4xf32>
    %cst_192 = arith.constant 9.99999974E-6 : f32
    %186 = vector.broadcast %cst_192 : f32 to vector<1x4xf32>
    %187 = arith.addf %183, %186 : vector<1x4xf32>
    %188 = math.rsqrt %187 : vector<1x4xf32>
    %189 = vector.broadcast %188 : vector<1x4xf32> to vector<2x4xf32>
    %190 = arith.mulf %185, %189 : vector<2x4xf32>
    %191 = vector.broadcast %171 : vector<1x4xf32> to vector<2x4xf32>
    %192 = arith.mulf %190, %191 : vector<2x4xf32>
    %193 = vector.broadcast %172 : vector<1x4xf32> to vector<2x4xf32>
    %194 = arith.addf %192, %193 : vector<2x4xf32>
    %cst_193 = arith.constant 0.000000e+00 : f32
    %195 = vector.broadcast %cst_193 : f32 to vector<2x4xf32>
    %196 = arith.maximumf %194, %195 : vector<2x4xf32>
    %197 = vector.shape_cast %196 : vector<2x4xf32> to vector<2x1x1x4xf32>
    %198 = vector.shape_cast %197 : vector<2x1x1x4xf32> to vector<2x4xf32>
    %c0_194 = arith.constant 0 : index
    %c0_195 = arith.constant 0 : index
    %199 = vector.load %arg7[%c0_194, %c0_195] : memref<1x4xf32, #tpu.memory_space<vmem>>, vector<1x4xf32>
    %200 = vector.broadcast %199 : vector<1x4xf32> to vector<2x4xf32>
    %201 = arith.mulf %198, %200 : vector<2x4xf32>
    %cst_196 = arith.constant dense<0.000000e+00> : vector<2xf32>
    %202 = vector.multi_reduction <add>, %201, %cst_196 [1] : vector<2x4xf32> to vector<2xf32>
    %203 = vector.shape_cast %202 : vector<2xf32> to vector<2x1xf32>
    %c0_197 = arith.constant 0 : index
    %c0_198 = arith.constant 0 : index
    %204 = vector.load %arg8[%c0_197, %c0_198] : memref<1x1xf32, #tpu.memory_space<vmem>>, vector<1x1xf32>
    %205 = vector.broadcast %204 : vector<1x1xf32> to vector<2x1xf32>
    %206 = arith.addf %203, %205 : vector<2x1xf32>
    %c0_199 = arith.constant 0 : index
    %c0_200 = arith.constant 0 : index
    %207 = vector.load %arg9[%c0_199, %c0_200] : memref<2x1xf32, #tpu.memory_space<vmem>>, vector<2x1xf32>
    tpu.vector_store %arg9[%c0_199, %c0_200], %206 {strides = array<i32>} : memref<2x1xf32, #tpu.memory_space<vmem>>, vector<2x1xf32>,
    return
  }
}

</mosaic_0001>

<bundles_post_ra>
// kernel: spatial_attention.1
= control target key start
LH: loop header
LB: loop body
LE: loop exit
PB: predicated region body
PF: predicated region fallthrough
CT: control target
= control target key end

     0   :  { %v16818_v0 = vmov 0.0   ;;  %vm13034_vm0 = vmmov 0   ;;  %vm62_vm1 = vcmask 523264   ;;  %vm234_vm2 = vcmask 31744   ;;  %s13036_s11 = smov 4   ;;  %s13037_s12 = smov 8   ;;  %s16808_s1 = inlined_call_operand.vmem [shape: f32[64,4], index: 1, kind: input, shape index: {}]   ;;  %s16809_s0 = inlined_call_operand.vmem [shape: f32[98,64], index: 0, kind: input, shape index: {}]   ;;  %s16810_s2 = inlined_call_operand.vmem [shape: f32[1,4], index: 2, kind: input, shape index: {}]   ;;  %s16811_s3 = inlined_call_operand.vmem [shape: f32[4,4], index: 3, kind: input, shape index: {}]   ;;  %s16812_s4 = inlined_call_operand.vmem [shape: f32[4,4], index: 4, kind: input, shape index: {}]   ;;  %s16813_s5 = inlined_call_operand.vmem [shape: f32[3,36,4], index: 5, kind: input, shape index: {}]   ;;  %s16814_s6 = inlined_call_operand.vmem [shape: f32[3,4], index: 6, kind: input, shape index: {}]   ;;  %s16815_s8 = inlined_call_operand.<no memory space> [shape: f32[1,1], index: 8, kind: input, shape index: {}]   ;;  %s16816_s7 = inlined_call_operand.vmem [shape: f32[1,4], index: 7, kind: input, shape index: {}]   ;;  %s16817_s9 = inlined_call_operand.vmem [shape: f32[2,1], index: 9, kind: output, shape index: {}]  }
   0x1   :  { %12845 = vmatprep.subr.mxu0 %v16818_v0  ;;  %v54_v1 = vld [vmem:[%s16808_s1 + $0x38] sm:$0xff]  ;;  %v53_v2 = vld [vmem:[%s16808_s1 + $0x30] sm:$0xff]  ;;  %12861 = vmatprep.mubr.msk.f32.mxu0 %vm13034_vm0, %v16818_v0  ;;  %v52_v3 = vld [vmem:[%s16808_s1 + $0x28] sm:$0xff]  ;;  %1012 = vst.msk [vmem:[#allocation2] sm:$0xff] %vm234_vm2, %v16818_v0  ;;  %vm258_vm3 = vcmask 25600   ;;  %vm1013_vm4 = vcmask 24576  }
   0x2   :  { %12846 = vmatpush3.msra.mxu0 %v54_v1  ;;  %12900 = vmatprep.subr.mxu1 %v16818_v0  ;;  %v51_v4 = vld [vmem:[%s16808_s1 + $0x20] sm:$0xff]  ;;  %v50_v5 = vld [vmem:[%s16808_s1 + $0x18] sm:$0xff]  ;;  %v49_v6 = vld [vmem:[%s16808_s1 + $0x10] sm:$0xff]  ;;  %1015 = vst.msk [vmem:[#allocation2 + $0x10] sm:$0xff] %vm234_vm2, %v16818_v0  ;;  %vm1736_vm5 = vcmask 30720   ;;  %s13038_s13 = smov 12  }
   0x3   :  { %12847 = vmatprep.subr.mxu0 %v16818_v0  ;;  %12910 = vmatprep.mubr.msk.f32.mxu1 %vm13034_vm0, %v16818_v0  ;;  %v48_v7 = vld [vmem:[%s16808_s1 + $0x8] sm:$0xff]  ;;  %v47_v8 = vld [vmem:[%s16808_s1] sm:$0xff]  ;;  %v36_v11 = vld [vmem:[%s16809_s0 + $0x10] sm:$0xff]  ;;  %1017 = vst.msk [vmem:[#allocation2 + $0x20] sm:$0xff] %vm234_vm2, %v16818_v0  ;;  %s13039_s14 = smov 16   ;;  %s13040_s15 = smov 20  }
   0x4   :  { %12848 = vmatpush3.msra.mxu0 %v53_v2  ;;  %v34_v9 = vld [vmem:[%s16809_s0] sm:$0xff]  ;;  %v35_v10 = vld [vmem:[%s16809_s0 + $0x8] sm:$0xff]  ;;  %v37_v12 = vld [vmem:[%s16809_s0 + $0x18] sm:$0xff]  ;;  %1019 = vst.msk [vmem:[#allocation2 + $0x30] sm:$0xff] %vm234_vm2, %v16818_v0  ;;  %s13041_s16 = smov 24   ;;  %s13042_s17 = smov 28  }
   0x5   :  { %12849 = vmatprep.subr.mxu0 %v16818_v0  ;;  %v38_v13 = vld [vmem:[%s16809_s0 + $0x20] sm:$0xff]  ;;  %v39_v14 = vld [vmem:[%s16809_s0 + $0x28] sm:$0xff]  ;;  %v40_v15 = vld [vmem:[%s16809_s0 + $0x30] sm:$0xff]  ;;  %1021 = vst.msk [vmem:[#allocation2 + $0x40] sm:$0xff] %vm234_vm2, %v16818_v0  ;;  %s13043_s18 = smov 32   ;;  %vm8494_vm6 = vcmask 1043456  }
   0x6   :  { %12850 = vmatpush3.msra.mxu0 %v52_v3  ;;  %v41_v16 = vld [vmem:[%s16809_s0 + $0x38] sm:$0xff]  ;;  %v42_v17 = vld [vmem:[%s16809_s0 + $0x40] sm:$0xff]  ;;  %v43_v18 = vld [vmem:[%s16809_s0 + $0x48] sm:$0xff]  ;;  %1023 = vst.msk [vmem:[#allocation2 + $0x50] sm:$0xff] %vm234_vm2, %v16818_v0  ;;  %vm8406_vm7 = vcmask 64512   ;;  %vm8414_vm8 = vcmask 97280  }
   0x7   :  { %12851 = vmatprep.subr.mxu0 %v16818_v0  ;;  %v44_v19 = vld [vmem:[%s16809_s0 + $0x50] sm:$0xff]  ;;  %v45_v20 = vld [vmem:[%s16809_s0 + $0x58] sm:$0xff]  ;;  %v46_v21 = vld [vmem:[%s16809_s0 + $0x60] sm:$0x3]  ;;  %1025 = vst.msk [vmem:[#allocation2 + $0x60] sm:$0xff] %vm234_vm2, %v16818_v0  ;;  %vm8430_vm9 = vcmask 162816  }
   0x8   :  { %12852 = vmatpush3.msra.mxu0 %v51_v4  ;;  %1027 = vst.msk [vmem:[#allocation2 + $0x70] sm:$0xff] %vm234_vm2, %v16818_v0  ;;  %1029 = vst.msk [vmem:[#allocation2 + $0x80] sm:$0xff] %vm234_vm2, %v16818_v0  ;;  %v12632_v33 = vld [vmem:[%s16810_s2] ss:$0 sm:$0xff]  ;;  %vm8422_vm10 = vcmask 130048   ;;  %vm8438_vm11 = vcmask 195584  }
   0x9   :  { %12853 = vmatprep.subr.mxu0 %v16818_v0  ;;  %1031 = vst.msk [vmem:[#allocation2 + $0x90] sm:$0xff] %vm234_vm2, %v16818_v0  ;;  %1033 = vst.msk [vmem:[#allocation2 + $0xa0] sm:$0xff] %vm234_vm2, %v16818_v0  ;;  %vm8446_vm12 = vcmask 228352   ;;  %vm8454_vm13 = vcmask 261120   ;;  %vm8472_vm14 = vcmask 293888   ;;  %vm9452_vm15 = vcmask 28672  }
   0xa   :  { %12854 = vmatpush3.msra.mxu0 %v50_v5  ;;  %1035 = vst.msk [vmem:[#allocation2 + $0xb0] sm:$0xff] %vm234_vm2, %v16818_v0  ;;  %1037 = vst.msk [vmem:[#allocation2 + $0xc0] sm:$0xff] %vm234_vm2, %v16818_v0 }
   0xb   :  { %12855 = vmatprep.subr.mxu0 %v16818_v0  ;;  %1039 = vst.msk [vmem:[#allocation2 + $0xd0] sm:$0xff] %vm234_vm2, %v16818_v0  ;;  %1041 = vst.msk [vmem:[#allocation2 + $0xe0] sm:$0xff] %vm234_vm2, %v16818_v0 }
   0xc   :  { %12856 = vmatpush3.msra.mxu0 %v49_v6  ;;  %1043 = vst.msk [vmem:[#allocation2 + $0xf0] sm:$0xff] %vm234_vm2, %v16818_v0  ;;  %1045 = vst.msk [vmem:[#allocation2 + $0x100] sm:$0xff] %vm234_vm2, %v16818_v0 }
   0xd   :  { %12857 = vmatprep.subr.mxu0 %v16818_v0  ;;  %1047 = vst.msk [vmem:[#allocation2 + $0x110] sm:$0xff] %vm234_vm2, %v16818_v0 }
   0xe   :  { %12858 = vmatpush3.msra.mxu0 %v48_v7  ;;  %1040 = vst.msk [vmem:[#allocation2 + $0xd8] sm:$0x1] %vm1013_vm4, %v16818_v0  ;;  %1014 = vst.msk [vmem:[#allocation2 + $0x8] sm:$0x1] %vm1013_vm4, %v16818_v0 }
   0xf   :  { %12859 = vmatprep.subr.mxu0 %v16818_v0  ;;  %1016 = vst.msk [vmem:[#allocation2 + $0x18] sm:$0x1] %vm1013_vm4, %v16818_v0  ;;  %1018 = vst.msk [vmem:[#allocation2 + $0x28] sm:$0x1] %vm1013_vm4, %v16818_v0 }
  0x10   :  { %12860 = vmatpush3.msra.mxu0 %v47_v8  ;;  %1020 = vst.msk [vmem:[#allocation2 + $0x38] sm:$0x1] %vm1013_vm4, %v16818_v0  ;;  %1022 = vst.msk [vmem:[#allocation2 + $0x48] sm:$0x1] %vm1013_vm4, %v16818_v0 }
  0x11   :  { %12862 = vmatmul.mubr.msk.f32.vlgmr.msra.gmra.mxu0 %vm62_vm1, %v34_v9  ;;  %1024 = vst.msk [vmem:[#allocation2 + $0x58] sm:$0x1] %vm1013_vm4, %v16818_v0  ;;  %1026 = vst.msk [vmem:[#allocation2 + $0x68] sm:$0x1] %vm1013_vm4, %v16818_v0 }
  0x12   :  { %12864 = vmatprep.mubr.msk.f32.mxu0 %vm13034_vm0, %v16818_v0  ;;  %1028 = vst.msk [vmem:[#allocation2 + $0x78] sm:$0x1] %vm1013_vm4, %v16818_v0  ;;  %1030 = vst.msk [vmem:[#allocation2 + $0x88] sm:$0x1] %vm1013_vm4, %v16818_v0 }
  0x13   :  { %1032 = vst.msk [vmem:[#allocation2 + $0x98] sm:$0x1] %vm1013_vm4, %v16818_v0  ;;  %1034 = vst.msk [vmem:[#allocation2 + $0xa8] sm:$0x1] %vm1013_vm4, %v16818_v0 }
  0x14   :  { %1036 = vst.msk [vmem:[#allocation2 + $0xb8] sm:$0x1] %vm1013_vm4, %v16818_v0  ;;  %1038 = vst.msk [vmem:[#allocation2 + $0xc8] sm:$0x1] %vm1013_vm4, %v16818_v0 }
  0x15   :  { %12865 = vmatmul.mubr.msk.f32.gmra.mxu0 %vm62_vm1, %v35_v10  ;;  %1042 = vst.msk [vmem:[#allocation2 + $0xe8] sm:$0x1] %vm1013_vm4, %v16818_v0  ;;  %1044 = vst.msk [vmem:[#allocation2 + $0xf8] sm:$0x1] %vm1013_vm4, %v16818_v0 }
  0x16   :  { %12867 = vmatprep.mubr.msk.f32.mxu0 %vm13034_vm0, %v16818_v0  ;;  %1046 = vst.msk [vmem:[#allocation2 + $0x108] sm:$0x1] %vm1013_vm4, %v16818_v0  ;;  %1048 = vst.msk [vmem:[#allocation2 + $0x118] sm:$0x1] %vm1013_vm4, %v16818_v0 }
  0x19   :  { %12868 = vmatmul.mubr.msk.f32.gmra.mxu0 %vm62_vm1, %v36_v11 }
  0x1a   :  { %12870 = vmatprep.mubr.msk.f32.mxu0 %vm13034_vm0, %v16818_v0 }
  0x1d   :  { %12871 = vmatmul.mubr.msk.f32.gmra.mxu0 %vm62_vm1, %v37_v12 }
  0x1e   :  { %12873 = vmatprep.mubr.msk.f32.mxu0 %vm13034_vm0, %v16818_v0 }
  0x21   :  { %12874 = vmatmul.mubr.msk.f32.gmra.mxu0 %vm62_vm1, %v38_v13 }
  0x22   :  { %12876 = vmatprep.mubr.msk.f32.mxu0 %vm13034_vm0, %v16818_v0 }
  0x25   :  { %12877 = vmatmul.mubr.msk.f32.gmra.mxu0 %vm62_vm1, %v39_v14 }
  0x26   :  { %12879 = vmatprep.mubr.msk.f32.mxu0 %vm13034_vm0, %v16818_v0 }
  0x29   :  { %12880 = vmatmul.mubr.msk.f32.gmra.mxu0 %vm62_vm1, %v40_v15 }
  0x2a   :  { %12882 = vmatprep.mubr.msk.f32.mxu0 %vm13034_vm0, %v16818_v0 }
  0x2d   :  { %12883 = vmatmul.mubr.msk.f32.gmra.mxu0 %vm62_vm1, %v41_v16 }
  0x2e   :  { %12885 = vmatprep.mubr.msk.f32.mxu0 %vm13034_vm0, %v16818_v0 }
  0x31   :  { %12886 = vmatmul.mubr.msk.f32.gmra.mxu0 %vm62_vm1, %v42_v17 }
  0x32   :  { %12888 = vmatprep.mubr.msk.f32.mxu0 %vm13034_vm0, %v16818_v0 }
  0x35   :  { %12889 = vmatmul.mubr.msk.f32.gmra.mxu0 %vm62_vm1, %v43_v18 }
  0x36   :  { %12891 = vmatprep.mubr.msk.f32.mxu0 %vm13034_vm0, %v16818_v0 }
  0x39   :  { %12892 = vmatmul.mubr.msk.f32.gmra.mxu0 %vm62_vm1, %v44_v19 }
  0x3a   :  { %12894 = vmatprep.mubr.msk.f32.mxu0 %vm13034_vm0, %v16818_v0 }
  0x3d   :  { %12895 = vmatmul.mubr.msk.f32.gmra.mxu0 %vm62_vm1, %v45_v20 }
  0x3e   :  { %12897 = vmatprep.mubr.msk.f32.mxu0 %vm13034_vm0, %v16818_v0 }
  0x41   :  { %12898 = vmatmul.mubr.msk.f32.gmra.mxu0 %vm62_vm1, %v46_v21  ;;  %vm12418_vm1 = vcmask 1041409  }
  0xd1   :  { %v168_v22 = vpop.f32.mrf.mxu0 }
  0xd2   :  { %v169_v37 = vadd.f32 %v12632_v33, %v168_v22 }
  0xd3   :  { %v12863_v23 = vpop.f32.mrf.mxu0 }
  0xd4   :  { %v235_v43 = vsel %vm234_vm2, %v169_v37, 0.0 }
  0xd5   :  { %v173_v24 = vpop.f32.mrf.mxu0 }
  0xd6   :  { %v174_v35 = vadd.f32 %v12632_v33, %v173_v24 }
  0xd7   :  { %v12866_v25 = vpop.f32.mrf.mxu0 }
  0xd8   :  { %v236_v40 = vsel %vm234_vm2, %v174_v35, 0.0 }
  0xd9   :  { %v178_v26 = vpop.f32.mrf.mxu0  ;;  %v237_v46 = vadd.f32 %v236_v40, %v235_v43 }
  0xda   :  { %v179_v38 = vadd.f32 %v12632_v33, %v178_v26 }
  0xdb   :  { %v12869_v27 = vpop.f32.mrf.mxu0 }
  0xdc   :  { %v238_v44 = vsel %vm234_vm2, %v179_v38, 0.0 }
  0xdd   :  { %v183_v28 = vpop.f32.mrf.mxu0  ;;  %v239_v50 = vadd.f32 %v238_v44, %v237_v46 }
  0xde   :  { %v184_v41 = vadd.f32 %v12632_v33, %v183_v28 }
  0xdf   :  { %v12872_v29 = vpop.f32.mrf.mxu0 }
  0xe0   :  { %v240_v48 = vsel %vm234_vm2, %v184_v41, 0.0 }
  0xe1   :  { %v188_v30 = vpop.f32.mrf.mxu0  ;;  %v241_v54 = vadd.f32 %v240_v48, %v239_v50 }
  0xe2   :  { %v189_v45 = vadd.f32 %v12632_v33, %v188_v30 }
  0xe3   :  { %v12875_v31 = vpop.f32.mrf.mxu0 }
  0xe4   :  { %v242_v52 = vsel %vm234_vm2, %v189_v45, 0.0 }
  0xe5   :  { %v193_v32 = vpop.f32.mrf.mxu0  ;;  %v243_v58 = vadd.f32 %v242_v52, %v241_v54 }
  0xe6   :  { %v194_v49 = vadd.f32 %v12632_v33, %v193_v32 }
  0xe7   :  { %v12878_v34 = vpop.f32.mrf.mxu0 }
  0xe8   :  { %v244_v56 = vsel %vm234_vm2, %v194_v49, 0.0 }
  0xe9   :  { %v198_v36 = vpop.f32.mrf.mxu0  ;;  %v245_v62 = vadd.f32 %v244_v56, %v243_v58 }
  0xea   :  { %v199_v53 = vadd.f32 %v12632_v33, %v198_v36 }
  0xeb   :  { %v12881_v39 = vpop.f32.mrf.mxu0 }
  0xec   :  { %v246_v60 = vsel %vm234_vm2, %v199_v53, 0.0 }
  0xed   :  { %v203_v42 = vpop.f32.mrf.mxu0  ;;  %v247_v3 = vadd.f32 %v246_v60, %v245_v62 }
  0xee   :  { %v204_v57 = vadd.f32 %v12632_v33, %v203_v42 }
  0xef   :  { %v12884_v47 = vpop.f32.mrf.mxu0 }
  0xf0   :  { %v248_v1 = vsel %vm234_vm2, %v204_v57, 0.0 }
  0xf1   :  { %v208_v51 = vpop.f32.mrf.mxu0  ;;  %v249_v7 = vadd.f32 %v248_v1, %v247_v3 }
  0xf2   :  { %v209_v61 = vadd.f32 %v12632_v33, %v208_v51 }
  0xf3   :  { %v12887_v55 = vpop.f32.mrf.mxu0 }
  0xf4   :  { %v250_v5 = vsel %vm234_vm2, %v209_v61, 0.0 }
  0xf5   :  { %v213_v59 = vpop.f32.mrf.mxu0  ;;  %v251_v10 = vadd.f32 %v250_v5, %v249_v7 }
  0xf6   :  { %v214_v2 = vadd.f32 %v12632_v33, %v213_v59 }
  0xf7   :  { %v12890_v63 = vpop.f32.mrf.mxu0 }
  0xf8   :  { %v252_v9 = vsel %vm234_vm2, %v214_v2, 0.0 }
  0xf9   :  { %v218_v4 = vpop.f32.mrf.mxu0  ;;  %v253_v14 = vadd.f32 %v252_v9, %v251_v10 }
  0xfa   :  { %v219_v6 = vadd.f32 %v12632_v33, %v218_v4 }
  0xfb   :  { %v12893_v8 = vpop.f32.mrf.mxu0 }
  0xfc   :  { %v254_v12 = vsel %vm234_vm2, %v219_v6, 0.0 }
  0xfd   :  { %v223_v11 = vpop.f32.mrf.mxu0  ;;  %v255_v17 = vadd.f32 %v254_v12, %v253_v14 }
  0xfe   :  { %v224_v13 = vadd.f32 %v12632_v33, %v223_v11 }
  0xff   :  { %v12896_v15 = vpop.f32.mrf.mxu0 }
 0x100   :  { %v256_v16 = vsel %vm234_vm2, %v224_v13, 0.0 }
 0x101   :  { %v228_v18 = vpop.f32.mrf.mxu0  ;;  %v257_v20 = vadd.f32 %v256_v16, %v255_v17 }
 0x102   :  { %v229_v19 = vadd.f32 %v12632_v33, %v228_v18 }
 0x103   :  { %v12899_v21 = vpop.f32.mrf.mxu0 }
 0x104   :  { %v259_v22 = vsel %vm258_vm3, %v229_v19, 0.0 }
 0x105   :  { %v260_v23 = vadd.f32 %v259_v22, %v257_v20 }
 0x107   :  { %v261_v24 = vrot.slane %v260_v23, 4 }
 0x109   :  { %v262_v25 = vadd.f32 %v261_v24, %v260_v23  ;;  %v13035_v24 = vmov 1966171168  }
 0x10b   :  { %v263_v26 = vrot.slane %v262_v25, 2 }
 0x10d   :  { %v264_v27 = vadd.f32 %v263_v26, %v262_v25  ;;  %v404_v25 = vunpack.c.l.s4 %v13035_v24  ;;  %v406_v26 = vlaneseq }
 0x10f   :  { %v265_v28 = vrot.slane %v264_v27, 1 }
 0x111   :  { %v266_v29 = vadd.f32 %v265_v28, %v264_v27 }
 0x113   :  { %v268_v30 = vmul.f32 0.010204081, %v266_v29  ;;  %v405_v29 = vunpack.c.0.s8 %v404_v25 }
 0x115   :  { %v13259_v31 = vsub.f32 %v169_v37, %v268_v30  ;;  %v13261_v32 = vsub.f32 %v174_v35, %v268_v30  ;;  %v13263_v34 = vsub.f32 %v179_v38, %v268_v30  ;;  %v13265_v36 = vsub.f32 %v184_v41, %v268_v30 }
 0x116   :  { %v13271_v40 = vsub.f32 %v189_v45, %v268_v30  ;;  %v13275_v43 = vsub.f32 %v194_v49, %v268_v30  ;;  %v13281_v44 = vsub.f32 %v199_v53, %v268_v30  ;;  %v13286_v48 = vsub.f32 %v204_v57, %v268_v30 }
 0x117   :  { %v282_v33 = vmul.f32 %v13259_v31, %v13259_v31  ;;  %v283_v39 = vmul.f32 %v13261_v32, %v13261_v32  ;;  %v284_v42 = vmul.f32 %v13263_v34, %v13263_v34  ;;  %v285_v35 = vmul.f32 %v13265_v36, %v13265_v36 }
 0x118   :  { %v286_v46 = vmul.f32 %v13271_v40, %v13271_v40  ;;  %v287_v49 = vmul.f32 %v13275_v43, %v13275_v43  ;;  %v13291_v52 = vsub.f32 %v209_v61, %v268_v30  ;;  %v288_v53 = vmul.f32 %v13281_v44, %v13281_v44 }
 0x119   :  { %v295_v37 = vsel %vm234_vm2, %v282_v33, 0.0  ;;  %v296_v38 = vsel %vm234_vm2, %v283_v39, 0.0  ;;  %v298_v45 = vsel %vm234_vm2, %v284_v42, 0.0  ;;  %v300_v50 = vsel %vm234_vm2, %v285_v35, 0.0  ;;  %v2161_v42 = vld [vmem:[#allocation2 + $0x2] sm:$0x1f] }
 0x11a   :  { %v297_v41 = vadd.f32 %v296_v38, %v295_v37  ;;  %v302_v54 = vsel %vm234_vm2, %v286_v46, 0.0  ;;  %v13296_v56 = vsub.f32 %v214_v2, %v268_v30  ;;  %v289_v57 = vmul.f32 %v13286_v48, %v13286_v48 }
 0x11b   :  { %v304_v58 = vsel %vm234_vm2, %v287_v49, 0.0  ;;  %v13301_v60 = vsub.f32 %v219_v6, %v268_v30  ;;  %v290_v61 = vmul.f32 %v13291_v52, %v13291_v52  ;;  %v306_v62 = vsel %vm234_vm2, %v288_v53, 0.0 }
 0x11c   :  { %v299_v47 = vadd.f32 %v298_v45, %v297_v41  ;;  %v13306_v1 = vsub.f32 %v224_v13, %v268_v30  ;;  %v291_v2 = vmul.f32 %v13296_v56, %v13296_v56  ;;  %v308_v3 = vsel %vm234_vm2, %v289_v57, 0.0  ;;  %v2571_v41 = vld [vmem:[#allocation2 + $0x4] sm:$0x1f] }
 0x11d   :  { %v13311_v5 = vsub.f32 %v229_v19, %v268_v30  ;;  %v292_v6 = vmul.f32 %v13301_v60, %v13301_v60  ;;  %v310_v7 = vsel %vm234_vm2, %v290_v61, 0.0  ;;  %v407_v30 = vshrl.u32 %v406_v26, 7  ;;  %9017 = vst.msk [vmem:[#allocation2 + $0x8] sm:$0x1] %vm1013_vm4, %v16818_v0 }
 0x11e   :  { %v301_v51 = vadd.f32 %v300_v50, %v299_v47  ;;  %v293_v9 = vmul.f32 %v13306_v1, %v13306_v1  ;;  %v312_v10 = vsel %vm234_vm2, %v291_v2, 0.0  ;;  %v2181_v37 = vcombine.high %v2161_v42, %v2161_v42  ;;  %12211 = vst.msk [vmem:[#allocation2 + $0x8] sm:$0x1] %vm1013_vm4, %v16818_v0 }
 0x11f   :  { %v294_v12 = vmul.f32 %v13311_v5, %v13311_v5  ;;  %v314_v13 = vsel %vm234_vm2, %v292_v6, 0.0  ;;  %v13360_v39 = vsub.s32 %v405_v29, %v407_v30  ;;  %v2591_v46 = vcombine.high %v2571_v41, %v2571_v41 }
 0x120   :  { %v303_v55 = vadd.f32 %v302_v54, %v301_v51  ;;  %v316_v15 = vsel %vm234_vm2, %v293_v9, 0.0 }
 0x121   :  { %v318_v17 = vsel %vm258_vm3, %v294_v12, 0.0  ;;  %v2188_v35 = vrot.slane %v2161_v42, %v13360_v39  ;;  %v2598_v49 = vrot.slane %v2571_v41, %v13360_v39  ;;  %v13371_v50 = vrot.slane %v2181_v37, %v13360_v39 }
 0x122   :  { %v305_v59 = vadd.f32 %v304_v58, %v303_v55  ;;  %v13374_v54 = vrot.slane %v2591_v46, %v13360_v39 }
 0x123   :  { %v2196_v38 = vcombine.high %v2188_v35, %v2188_v35  ;;  %v2203_v45 = vrot.slane %v2188_v35, %v13360_v39  ;;  %16847 = vst [vmem:[#allocation4_spill] sm:$0xff] %v13371_v50  ;;  %v2606_v55 = vcombine.high %v2598_v49, %v2598_v49 }
 0x124   :  { %v307_v63 = vadd.f32 %v306_v62, %v305_v59  ;;  %16848 = vst [vmem:[#allocation5_spill] sm:$0xff] %v13374_v54 }
 0x125   :  { %v2217_v47 = vrot.slane %v2196_v38, %v13360_v39 }
 0x126   :  { %v309_v4 = vadd.f32 %v308_v3, %v307_v63  ;;  %v13387_v63 = vrot.slane %v2598_v49, %v13360_v39  ;;  %v13392_v3 = vrot.slane %v2606_v55, %v13360_v39 }
 0x127   :  { %v5759_v51 = vcombine.low %v2203_v45, %v2217_v47  ;;  %v12663_v53 = vcombine.high %v2203_v45, %v2217_v47 }
 0x128   :  { %v311_v8 = vadd.f32 %v310_v7, %v309_v4  ;;  %16850 = vst [vmem:[#allocation7_spill] sm:$0xff] %v13387_v63  ;;  %16851 = vst [vmem:[#allocation8_spill] sm:$0xff] %v13392_v3  ;;  %v12646_v4 = vld [vmem:[%s16811_s3] ss:$0 sm:$0xff] }
 0x129   :  { %v13377_v57 = vrot.slane %v5759_v51, %v13360_v39  ;;  %v13380_v58 = vrot.slane %v12663_v53, %v13360_v39 }
 0x12a   :  { %v313_v11 = vadd.f32 %v312_v10, %v311_v8 }
 0x12b   :  { %16849 = vst [vmem:[#allocation6_spill] sm:$0xff] %v13380_v58 }
 0x12c   :  { %v315_v14 = vadd.f32 %v314_v13, %v313_v11 }
 0x12e   :  { %v317_v16 = vadd.f32 %v316_v15, %v315_v14 }
 0x130   :  { %v319_v18 = vadd.f32 %v318_v17, %v317_v16 }
 0x132   :  { %v320_v19 = vrot.slane %v319_v18, 4 }
 0x134   :  { %v321_v20 = vadd.f32 %v320_v19, %v319_v18 }
 0x136   :  { %v322_v21 = vrot.slane %v321_v20, 2 }
 0x138   :  { %v323_v22 = vadd.f32 %v322_v21, %v321_v20 }
 0x13a   :  { %v324_v23 = vrot.slane %v323_v22, 1 }
 0x13c   :  { %v325_v27 = vadd.f32 %v324_v23, %v323_v22 }
 0x13e   :  { %v326_v28 = vmul.f32 0.010204081, %v325_v27 }
 0x140   :  { %v327_v33 = vadd.f32 1e-05, %v326_v28 }
 0x142   :  { %13025 = vrsqrt.f32 %v327_v33 }
 0x14f   :  { %v13026_v61 = vpop.eup %13025 }
 0x150   :  { %v329_v6 = vmul.f32 %v13026_v61, %v13259_v31  ;;  %v330_v7 = vmul.f32 %v13026_v61, %v13261_v32  ;;  %v331_v8 = vmul.f32 %v13026_v61, %v13263_v34  ;;  %v332_v9 = vmul.f32 %v13026_v61, %v13265_v36  ;;  %v12647_v34 = vld [vmem:[%s16812_s4] ss:$0 sm:$0xff] }
 0x151   :  { %v333_v10 = vmul.f32 %v13026_v61, %v13271_v40  ;;  %v334_v11 = vmul.f32 %v13026_v61, %v13275_v43  ;;  %v335_v12 = vmul.f32 %v13026_v61, %v13281_v44  ;;  %v336_v13 = vmul.f32 %v13026_v61, %v13286_v48 }
 0x152   :  { %v337_v14 = vmul.f32 %v13026_v61, %v13291_v52  ;;  %v338_v15 = vmul.f32 %v13026_v61, %v13296_v56  ;;  %v339_v31 = vmul.f32 %v13026_v61, %v13301_v60  ;;  %v340_v32 = vmul.f32 %v13026_v61, %v13306_v1 }
 0x153   :  { %v341_v36 = vmul.f32 %v13026_v61, %v13311_v5  ;;  %v346_v40 = vmul.f32 %v12646_v4, %v329_v6  ;;  %v347_v43 = vmul.f32 %v12646_v4, %v330_v7  ;;  %v348_v16 = vmul.f32 %v12646_v4, %v331_v8 }
 0x154   :  { %v349_v44 = vmul.f32 %v12646_v4, %v332_v9  ;;  %v350_v17 = vmul.f32 %v12646_v4, %v333_v10  ;;  %v351_v48 = vmul.f32 %v12646_v4, %v334_v11  ;;  %v352_v18 = vmul.f32 %v12646_v4, %v335_v12 }
 0x155   :  { %v353_v52 = vmul.f32 %v12646_v4, %v336_v13  ;;  %v354_v19 = vmul.f32 %v12646_v4, %v337_v14  ;;  %v355_v56 = vmul.f32 %v12646_v4, %v338_v15  ;;  %v356_v20 = vmul.f32 %v12646_v4, %v339_v31 }
 0x156   :  { %v357_v60 = vmul.f32 %v12646_v4, %v340_v32  ;;  %v358_v21 = vmul.f32 %v12646_v4, %v341_v36  ;;  %v363_v1 = vadd.f32 %v12647_v34, %v346_v40  ;;  %v364_v22 = vadd.f32 %v12647_v34, %v347_v43 }
 0x157   :  { %v365_v23 = vadd.f32 %v12647_v34, %v348_v16  ;;  %v366_v24 = vadd.f32 %v12647_v34, %v349_v44  ;;  %v367_v25 = vadd.f32 %v12647_v34, %v350_v17  ;;  %v368_v26 = vadd.f32 %v12647_v34, %v351_v48 }
 0x158   :  { %v369_v5 = vadd.f32 %v12647_v34, %v352_v18  ;;  %v370_v27 = vadd.f32 %v12647_v34, %v353_v52  ;;  %v371_v28 = vadd.f32 %v12647_v34, %v354_v19  ;;  %v372_v29 = vadd.f32 %v12647_v34, %v355_v56 }
 0x159   :  { %v373_v30 = vadd.f32 %v12647_v34, %v356_v20  ;;  %v374_v33 = vadd.f32 %v12647_v34, %v357_v60  ;;  %v13413_v42 = vadd.f32 %v12647_v34, %v358_v21  ;;  %v376_v35 = vmax.f32 %v363_v1, 0.0 }
 0x15a   :  { %v377_v37 = vmax.f32 %v364_v22, 0.0  ;;  %v378_v38 = vmax.f32 %v365_v23, 0.0  ;;  %v379_v41 = vmax.f32 %v366_v24, 0.0  ;;  %v380_v46 = vmax.f32 %v367_v25, 0.0 }
 0x15b   :  { %v13415_v45 = vmax.f32 %v368_v26, 0.0  ;;  %v13417_v47 = vmax.f32 %v369_v5, 0.0  ;;  %v13419_v49 = vmax.f32 %v370_v27, 0.0  ;;  %v13421_v51 = vmax.f32 %v371_v28, 0.0 }
 0x15c   :  { %v13423_v53 = vmax.f32 %v372_v29, 0.0  ;;  %v13425_v55 = vmax.f32 %v373_v30, 0.0  ;;  %v13427_v61 = vmax.f32 %v374_v33, 0.0  ;;  %v388_v4 = vmax.f32 %v13413_v42, 0.0 }
 0x15d   :  { %v402_v6 = vcombine.high %v376_v35, %v376_v35  ;;  %v409_v7 = vrot.slane %v376_v35, %v13360_v39  ;;  %v451_v8 = vcombine.high %v377_v37, %v377_v37  ;;  %v458_v9 = vrot.slane %v377_v37, %v13360_v39 }
 0x15e   :  { %v500_v10 = vcombine.high %v378_v38, %v378_v38  ;;  %v507_v11 = vrot.slane %v378_v38, %v13360_v39  ;;  %v549_v12 = vcombine.high %v379_v41, %v379_v41  ;;  %v556_v13 = vrot.slane %v379_v41, %v13360_v39 }
 0x15f   :  { %v416_v14 = vrot.slane %v402_v6, %v13360_v39  ;;  %v417_v15 = vcombine.high %v409_v7, %v409_v7  ;;  %v13436_v31 = vrot.slane %v409_v7, %v13360_v39  ;;  %v465_v32 = vrot.slane %v451_v8, %v13360_v39 }
 0x160   :  { %v466_v34 = vcombine.high %v458_v9, %v458_v9  ;;  %v13440_v36 = vrot.slane %v458_v9, %v13360_v39  ;;  %v514_v40 = vrot.slane %v500_v10, %v13360_v39  ;;  %v515_v43 = vcombine.high %v507_v11, %v507_v11 }
 0x161   :  { %v418_v16 = vcombine.high %v416_v14, %v416_v14  ;;  %v13444_v44 = vrot.slane %v416_v14, %v13360_v39  ;;  %v13447_v17 = vrot.slane %v417_v15, %v13360_v39  ;;  %v467_v48 = vcombine.high %v465_v32, %v465_v32 }
 0x162   :  { %v13450_v18 = vrot.slane %v465_v32, %v13360_v39  ;;  %v13453_v52 = vrot.slane %v466_v34, %v13360_v39  ;;  %v516_v56 = vcombine.high %v514_v40, %v514_v40  ;;  %v13466_v1 = vrot.slane %v507_v11, %v13360_v39 }
 0x163   :  { %v13458_v20 = vrot.slane %v418_v16, %v13360_v39  ;;  %v13463_v21 = vrot.slane %v467_v48, %v13360_v39  ;;  %v13471_v23 = vrot.slane %v514_v40, %v13360_v39  ;;  %v13474_v24 = vrot.slane %v515_v43, %v13360_v39 }
 0x164   :  { %v13477_v25 = vrot.slane %v516_v56, %v13360_v39  ;;  %v563_v5 = vrot.slane %v549_v12, %v13360_v39  ;;  %v564_v27 = vcombine.high %v556_v13, %v556_v13  ;;  %v13483_v28 = vrot.slane %v556_v13, %v13360_v39 }
 0x165   :  { %v598_v33 = vcombine.high %v380_v46, %v380_v46  ;;  %v605_v35 = vrot.slane %v380_v46, %v13360_v39  ;;  %v647_v10 = vcombine.high %v13415_v45, %v13415_v45  ;;  %v654_v12 = vrot.slane %v13415_v45, %v13360_v39 }
 0x166   :  { %v565_v37 = vcombine.high %v563_v5, %v563_v5  ;;  %v13491_v38 = vrot.slane %v563_v5, %v13360_v39  ;;  %v13494_v41 = vrot.slane %v564_v27, %v13360_v39  ;;  %v696_v13 = vcombine.high %v13417_v47, %v13417_v47 }
 0x167   :  { %v612_v7 = vrot.slane %v598_v33, %v13360_v39  ;;  %v613_v8 = vcombine.high %v605_v35, %v605_v35  ;;  %v13500_v9 = vrot.slane %v605_v35, %v13360_v39  ;;  %v661_v40 = vrot.slane %v647_v10, %v13360_v39 }
 0x168   :  { %v13505_v46 = vrot.slane %v565_v37, %v13360_v39  ;;  %v662_v43 = vcombine.high %v654_v12, %v654_v12  ;;  %v13523_v16 = vrot.slane %v654_v12, %v13360_v39  ;;  %v703_v45 = vrot.slane %v13417_v47, %v13360_v39 }
 0x169   :  { %v614_v14 = vcombine.high %v612_v7, %v612_v7  ;;  %v13514_v15 = vrot.slane %v612_v7, %v13360_v39  ;;  %v13517_v32 = vrot.slane %v613_v8, %v13360_v39  ;;  %v710_v27 = vrot.slane %v696_v13, %v13360_v39 }
 0x16a   :  { %v663_v33 = vcombine.high %v661_v40, %v661_v40  ;;  %v13536_v35 = vrot.slane %v661_v40, %v13360_v39  ;;  %v13539_v37 = vrot.slane %v662_v43, %v13360_v39  ;;  %v711_v7 = vcombine.high %v703_v45, %v703_v45 }
 0x16b   :  { %v13528_v48 = vrot.slane %v614_v14, %v13360_v39  ;;  %v712_v8 = vcombine.high %v710_v27, %v710_v27  ;;  %v13544_v10 = vrot.slane %v703_v45, %v13360_v39  ;;  %v13547_v12 = vrot.slane %v710_v27, %v13360_v39 }
 0x16c   :  { %v13550_v13 = vrot.slane %v663_v33, %v13360_v39  ;;  %v13553_v14 = vrot.slane %v711_v7, %v13360_v39  ;;  %v745_v40 = vcombine.high %v13419_v49, %v13419_v49  ;;  %v752_v43 = vrot.slane %v13419_v49, %v13360_v39 }
 0x16d   :  { %v13560_v2 = vrot.slane %v712_v8, %v13360_v39  ;;  %v794_v33 = vcombine.high %v13421_v51, %v13421_v51  ;;  %v801_v0 = vrot.slane %v13421_v51, %v13360_v39  ;;  %v843_v45 = vcombine.high %v13423_v53, %v13423_v53 }
 0x16e   :  { %v759_v59 = vrot.slane %v745_v40, %v13360_v39  ;;  %v760_v62 = vcombine.high %v752_v43, %v752_v43  ;;  %v13572_v49 = vrot.slane %v752_v43, %v13360_v39  ;;  %v850_v43 = vrot.slane %v13423_v53, %v13360_v39 }
 0x16f   :  { %v808_v27 = vrot.slane %v794_v33, %v13360_v39  ;;  %v809_v56 = vcombine.high %v801_v0, %v801_v0  ;;  %v13590_v5 = vrot.slane %v801_v0, %v13360_v39  ;;  %v941_v0 = vcombine.high %v13427_v61, %v13427_v61 }
 0x170   :  { %v761_v47 = vcombine.high %v759_v59, %v759_v59  ;;  %v13582_v7 = vrot.slane %v759_v59, %v13360_v39  ;;  %v13585_v40 = vrot.slane %v760_v62, %v13360_v39  ;;  %v857_v62 = vrot.slane %v843_v45, %v13360_v39 }
 0x171   :  { %v810_v8 = vcombine.high %v808_v27, %v808_v27  ;;  %v13593_v51 = vrot.slane %v808_v27, %v13360_v39  ;;  %v858_v34 = vcombine.high %v850_v43, %v850_v43  ;;  %v13602_v11 = vrot.slane %v809_v56, %v13360_v39 }
 0x172   :  { %v13596_v33 = vrot.slane %v761_v47, %v13360_v39  ;;  %v13610_v27 = vrot.slane %v850_v43, %v13360_v39  ;;  %v859_v6 = vcombine.high %v857_v62, %v857_v62  ;;  %v13615_v59 = vrot.slane %v857_v62, %v13360_v39 }
 0x173   :  { %v13605_v53 = vrot.slane %v810_v8, %v13360_v39  ;;  %v13618_v45 = vrot.slane %v858_v34, %v13360_v39  ;;  %v892_v8 = vcombine.high %v13425_v55, %v13425_v55  ;;  %v899_v43 = vrot.slane %v13425_v55, %v13360_v39 }
 0x174   :  { %v13629_v47 = vrot.slane %v859_v6, %v13360_v39  ;;  %v948_v34 = vrot.slane %v13427_v61, %v13360_v39  ;;  %v13638_v56 = vrot.slane %v388_v4, %v13360_v39  ;;  %v955_v6 = vrot.slane %v941_v0, %v13360_v39 }
 0x175   :  { %v906_v30 = vrot.slane %v892_v8, %v13360_v39  ;;  %v907_v55 = vcombine.high %v899_v43, %v899_v43  ;;  %v13642_v29 = vrot.slane %v899_v43, %v13360_v39  ;;  %v1127_v54 = vrot.slane %v13463_v21, %v13360_v39 }
 0x176   :  { %v956_v62 = vcombine.high %v948_v34, %v948_v34  ;;  %v13648_v19 = vrot.slane %v948_v34, %v13360_v39  ;;  %v997_v42 = vcombine.high %v13638_v56, %v13638_v56  ;;  %v957_v43 = vcombine.high %v955_v6, %v955_v6 }
 0x177   :  { %v908_v61 = vcombine.high %v906_v30, %v906_v30  ;;  %v13653_v4 = vrot.slane %v906_v30, %v13360_v39  ;;  %v13656_v8 = vrot.slane %v907_v55, %v13360_v39  ;;  %v13661_v22 = vrot.slane %v955_v6, %v13360_v39 }
 0x178   :  { %v13664_v34 = vrot.slane %v956_v62, %v13360_v39  ;;  %v13676_v0 = vrot.slane %v997_v42, %v13360_v39  ;;  %v13679_v6 = vrot.slane %v957_v43, %v13360_v39  ;;  %v12648_v30 = vcombine.high %v13436_v31, %v13447_v17 }
 0x179   :  { %v13669_v60 = vrot.slane %v908_v61, %v13360_v39  ;;  %v1049_v61 = vcombine.low %v13436_v31, %v13447_v17  ;;  %v1051_v42 = vcombine.low %v13444_v44, %v13458_v20  ;;  %v16852_v43 = vcombine.high %v13444_v44, %v13444_v44 }
 0x17a   :  { %v16853_v62 = vcombine.high %v13458_v20, %v13458_v20  ;;  %v16854_v31 = vcombine.high %v13440_v36, %v13440_v36  ;;  %v16855_v44 = vcombine.high %v13453_v52, %v13453_v52  ;;  %v1065_v3 = vrot.slane %v12648_v30, %v13360_v39 }
 0x17b   :  { %v1079_v55 = vrot.slane %v16852_v43, %v13360_v39  ;;  %v1058_v63 = vrot.slane %v1049_v61, %v13360_v39  ;;  %v1072_v20 = vrot.slane %v1051_v42, %v13360_v39  ;;  %v12650_v30 = vcombine.high %v13466_v1, %v13474_v24 }
 0x17c   :  { %v1097_v26 = vcombine.low %v16853_v62, %v13440_v36  ;;  %v1098_v17 = vcombine.low %v13453_v52, %v16854_v31  ;;  %v1099_v43 = vcombine.low %v16855_v44, %v13450_v18  ;;  %v12649_v31 = vcombine.high %v13450_v18, %v13463_v21 }
 0x17d   :  { %v1146_v52 = vcombine.low %v13466_v1, %v13474_v24  ;;  %v1080_v44 = vcombine.low %v1058_v63, %v1065_v3  ;;  %v1081_v50 = vcombine.low %v1072_v20, %v1079_v55  ;;  %v1168_v63 = vrot.slane %v12650_v30, %v13360_v39 }
 0x17e   :  { %v1106_v62 = vrot.slane %v1097_v26, %v13360_v39  ;;  %v1113_v61 = vrot.slane %v1098_v17, %v13360_v39  ;;  %v1120_v36 = vrot.slane %v1099_v43, %v13360_v39  ;;  %v1175_v26 = vrot.slane %v13471_v23, %v13360_v39 }
 0x17f   :  { %v1154_v17 = vrot.slane %v12649_v31, %v13360_v39  ;;  %v1161_v43 = vrot.slane %v1146_v52, %v13360_v39  ;;  %v1088_v18 = vrot.slane %v1080_v44, %v13360_v39  ;;  %v1095_v21 = vrot.slane %v1081_v50, %v13360_v39 }
 0x180   :  { %v13725_v42 = vcombine.low %v1106_v62, %v1113_v61  ;;  %v13727_v58 = vcombine.low %v1120_v36, %v1127_v54  ;;  %v16856_v3 = vcombine.high %v13471_v23, %v13471_v23  ;;  %v16857_v55 = vcombine.high %v13477_v25, %v13477_v25 }
 0x181   :  { %v1176_v54 = vcombine.low %v1154_v17, %v1161_v43  ;;  %v16858_v62 = vcombine.high %v13483_v28, %v13483_v28  ;;  %v1096_v61 = vcombine.low %v1088_v18, %v1095_v21  ;;  %v13748_v36 = vcombine.low %v1168_v63, %v1175_v26 }
 0x182   :  { %v1193_v1 = vcombine.low %v13477_v25, %v16856_v3  ;;  %v1136_v24 = vrot.slane %v13725_v42, %v13360_v39  ;;  %v1194_v20 = vcombine.low %v16857_v55, %v13483_v28  ;;  %v16859_v31 = vcombine.high %v13494_v41, %v13494_v41 }
 0x183   :  { %v1195_v50 = vcombine.low %v13494_v41, %v16858_v62  ;;  %v13756_v44 = vrot.slane %v1176_v54, %v13360_v39  ;;  %v1241_v28 = vcombine.low %v13491_v38, %v13505_v46  ;;  %v1191_v26 = vrot.slane %v13748_v36, %v13360_v39  ;;  %1737 = vst.msk [vmem:[#allocation2 + $0x11] sm:$0x7f] %vm1736_vm5, %v1096_v61 }
 0x184   :  { %v1202_v23 = vrot.slane %v1193_v1, %v13360_v39  ;;  %v1223_v52 = vrot.slane %v16859_v31, %v13360_v39  ;;  %v1209_v25 = vrot.slane %v1194_v20, %v13360_v39  ;;  %v12651_v17 = vcombine.high %v13491_v38, %v13505_v46 }
 0x185   :  { %v1216_v30 = vrot.slane %v1195_v50, %v13360_v39  ;;  %v1243_v41 = vcombine.low %v13500_v9, %v13517_v32  ;;  %v16860_v43 = vcombine.high %v13500_v9, %v13500_v9  ;;  %v1250_v3 = vrot.slane %v1241_v28, %v13360_v39 }
 0x186   :  { %v1224_v21 = vcombine.low %v1202_v23, %v1209_v25  ;;  %v16861_v1 = vcombine.high %v13517_v32, %v13517_v32  ;;  %v1257_v38 = vrot.slane %v12651_v17, %v13360_v39  ;;  %v16862_v55 = vcombine.high %v13514_v15, %v13514_v15 }
 0x187   :  { %v1271_v18 = vrot.slane %v16860_v43, %v13360_v39  ;;  %v1225_v63 = vcombine.low %v1216_v30, %v1223_v52  ;;  %v1264_v46 = vrot.slane %v1243_v41, %v13360_v39  ;;  %v16863_v20 = vcombine.high %v13528_v48, %v13528_v48 }
 0x188   :  { %v1289_v54 = vcombine.low %v16861_v1, %v13514_v15  ;;  %v1290_v9 = vcombine.low %v13528_v48, %v16862_v55  ;;  %v1232_v50 = vrot.slane %v1224_v21, %v13360_v39  ;;  %v1319_v23 = vrot.slane %v13539_v37, %v13360_v39 }
 0x189   :  { %v1291_v62 = vcombine.low %v16863_v20, %v13523_v16  ;;  %v1239_v61 = vrot.slane %v1225_v63, %v13360_v39  ;;  %v1272_v31 = vcombine.low %v1250_v3, %v1257_v38  ;;  %v1273_v52 = vcombine.low %v1264_v46, %v1271_v18 }
 0x18a   :  { %v1298_v32 = vrot.slane %v1289_v54, %v13360_v39  ;;  %v1305_v15 = vrot.slane %v1290_v9, %v13360_v39  ;;  %v12652_v48 = vcombine.high %v13523_v16, %v13539_v37  ;;  %v1338_v28 = vcombine.low %v13536_v35, %v13550_v13  ;;  %v13809_v37 = vld [vmem:[#allocation2 + $0x14] sm:$0x1f] }
 0x18b   :  { %v1312_v25 = vrot.slane %v1291_v62, %v13360_v39  ;;  %v1240_v30 = vcombine.low %v1232_v50, %v1239_v61  ;;  %v12653_v17 = vcombine.high %v13536_v35, %v13550_v13  ;;  %v1280_v41 = vrot.slane %v1272_v31, %v13360_v39 }
 0x18c   :  { %v1287_v43 = vrot.slane %v1273_v52, %v13360_v39  ;;  %v1320_v21 = vcombine.low %v1298_v32, %v1305_v15  ;;  %v1346_v63 = vrot.slane %v12652_v48, %v13360_v39  ;;  %v1353_v3 = vrot.slane %v1338_v28, %v13360_v39 }
 0x18d   :  { %v1321_v18 = vcombine.low %v1312_v25, %v1319_v23  ;;  %v1360_v1 = vrot.slane %v12653_v17, %v13360_v39  ;;  %v1367_v16 = vrot.slane %v13544_v10, %v13360_v39  ;;  %1740 = vst.msk [vmem:[#allocation2 + $0x41] sm:$0x7f] %vm1736_vm5, %v1240_v30  ;;  %v16864_v38 = vcombine.high %v13544_v10, %v13544_v10 }
 0x18e   :  { %v1288_v35 = vcombine.low %v1280_v41, %v1287_v43  ;;  %v1328_v13 = vrot.slane %v1320_v21, %v13360_v39  ;;  %v16865_v55 = vmov 0.0   ;;  %v1368_v9 = vcombine.low %v1346_v63, %v1353_v3 }
 0x18f   :  { %v1335_v54 = vrot.slane %v1321_v18, %v13360_v39  ;;  %v1385_v46 = vcombine.low %v13553_v14, %v16864_v38  ;;  %9019 = vst.msk [vmem:[#allocation2 + $0x18] sm:$0x1] %vm1013_vm4, %v16865_v55  ;;  %v1369_v20 = vcombine.low %v1360_v1, %v1367_v16  ;;  %v16866_v62 = vcombine.high %v13553_v14, %v13553_v14 }
 0x190   :  { %v16867_v61 = vcombine.high %v13547_v12, %v13547_v12  ;;  %12213 = vst.msk [vmem:[#allocation2 + $0x18] sm:$0x1] %vm1013_vm4, %v16865_v55  ;;  %v16868_v31 = vcombine.high %v13560_v2, %v13560_v2  ;;  %v1433_v14 = vcombine.low %v13572_v49, %v13585_v40  ;;  %v12654_v48 = vcombine.high %v13572_v49, %v13585_v40 }
 0x191   :  { %v1386_v50 = vcombine.low %v16866_v62, %v13547_v12  ;;  %v1336_v10 = vcombine.low %v1328_v13, %v1335_v54  ;;  %v1394_v23 = vrot.slane %v1385_v46, %v13360_v39  ;;  %1741 = vst.msk [vmem:[#allocation2 + $0x51] sm:$0x7f] %vm1736_vm5, %v1288_v35  ;;  %v1376_v12 = vrot.slane %v1368_v9, %v13360_v39 }
 0x192   :  { %v1387_v32 = vcombine.low %v13560_v2, %v16867_v61  ;;  %v1415_v52 = vrot.slane %v16868_v31, %v13360_v39  ;;  %v1383_v15 = vrot.slane %v1369_v20, %v13360_v39  ;;  %v1435_v2 = vcombine.low %v13582_v7, %v13596_v33 }
 0x193   :  { %v1401_v25 = vrot.slane %v1386_v50, %v13360_v39  ;;  %v1442_v28 = vrot.slane %v1433_v14, %v13360_v39  ;;  %v16869_v17 = vcombine.high %v13582_v7, %v13582_v7  ;;  %1742 = vst.msk [vmem:[#allocation2 + $0x61] sm:$0x7f] %vm1736_vm5, %v1336_v10  ;;  %v16870_v63 = vcombine.high %v13596_v33, %v13596_v33 }
 0x194   :  { %v1408_v30 = vrot.slane %v1387_v32, %v13360_v39  ;;  %v1384_v43 = vcombine.low %v1376_v12, %v1383_v15  ;;  %v1449_v40 = vrot.slane %v12654_v48, %v13360_v39  ;;  %v1456_v3 = vrot.slane %v1435_v2, %v13360_v39  ;;  %v13873_v62 = vld [vmem:[#allocation2 + $0x44] sm:$0x1f] }
 0x195   :  { %v1463_v41 = vrot.slane %v16869_v17, %v13360_v39  ;;  %v1416_v21 = vcombine.low %v1394_v23, %v1401_v25  ;;  %v1481_v49 = vcombine.low %v16870_v63, %v13590_v5  ;;  %v16871_v1 = vcombine.high %v13590_v5, %v13590_v5  ;;  %v13877_v50 = vld [vmem:[#allocation2 + $0x44] sm:$0x1f] }
 0x196   :  { %v1417_v18 = vcombine.low %v1408_v30, %v1415_v52  ;;  %v16872_v16 = vcombine.high %v13602_v11, %v13602_v11  ;;  %v1511_v38 = vrot.slane %v13605_v53, %v13360_v39  ;;  %1743 = vst.msk [vmem:[#allocation2 + $0x71] sm:$0x7f] %vm1736_vm5, %v1384_v43  ;;  %v1464_v46 = vcombine.low %v1442_v28, %v1449_v40 }
 0x197   :  { %v1482_v7 = vcombine.low %v13602_v11, %v16871_v1  ;;  %v1424_v13 = vrot.slane %v1416_v21, %v13360_v39  ;;  %v1490_v33 = vrot.slane %v1481_v49, %v13360_v39  ;;  %v1465_v5 = vcombine.low %v1456_v3, %v1463_v41  ;;  %v13875_v11 = vld [vmem:[#allocation2 + $0x44] sm:$0x1f] }
 0x198   :  { %v1483_v35 = vcombine.low %v16872_v16, %v13593_v51  ;;  %v1431_v54 = vrot.slane %v1417_v18, %v13360_v39  ;;  %v12655_v32 = vcombine.high %v13593_v51, %v13605_v53  ;;  %v1530_v10 = vcombine.low %v13610_v27, %v13618_v45  ;;  %v13885_v31 = vld [vmem:[#allocation2 + $0x50] sm:$0x1f]  ;;  %9025 = vst.msk [vmem:[#allocation2 + $0x48] sm:$0x1] %vm1013_vm4, %v16865_v55 }
 0x199   :  { %v1497_v9 = vrot.slane %v1482_v7, %v13360_v39  ;;  %v12656_v23 = vcombine.high %v13610_v27, %v13618_v45  ;;  %v13887_v52 = vld [vmem:[#allocation2 + $0x52] sm:$0x1f]  ;;  %v1472_v12 = vrot.slane %v1464_v46, %v13360_v39  ;;  %v1479_v15 = vrot.slane %v1465_v5, %v13360_v39  ;;  %12219 = vst.msk [vmem:[#allocation2 + $0x48] sm:$0x1] %vm1013_vm4, %v16865_v55 }
 0x19a   :  { %v1504_v20 = vrot.slane %v1483_v35, %v13360_v39  ;;  %v1432_v61 = vcombine.low %v1424_v13, %v1431_v54  ;;  %v13889_v14 = vld [vmem:[#allocation2 + $0x54] sm:$0x1f]  ;;  %v1538_v45 = vrot.slane %v12655_v32, %v13360_v39  ;;  %v1545_v48 = vrot.slane %v1530_v10, %v13360_v39  ;;  %v13921_v63 = vld [vmem:[#allocation2 + $0x64] sm:$0x1f] }
 0x19b   :  { %v1512_v51 = vcombine.low %v1490_v33, %v1497_v9  ;;  %v13895_v25 = vld [vmem:[#allocation2 + $0x54] sm:$0x1f]  ;;  %v1552_v2 = vrot.slane %v12656_v23, %v13360_v39  ;;  %v1559_v28 = vrot.slane %v13615_v59, %v13360_v39  ;;  %v1480_v17 = vcombine.low %v1472_v12, %v1479_v15  ;;  %v13923_v49 = vld [vmem:[#allocation2 + $0x64] sm:$0x1f] }
 0x19c   :  { %v1513_v53 = vcombine.low %v1504_v20, %v1511_v38  ;;  %v13897_v30 = vld [vmem:[#allocation2 + $0x50] sm:$0x1f]  ;;  %1744 = vst.msk [vmem:[#allocation2 + $0xa1] sm:$0x7f] %vm1736_vm5, %v1432_v61  ;;  %v16873_v21 = vcombine.high %v13615_v59, %v13615_v59  ;;  %v1560_v40 = vcombine.low %v1538_v45, %v1545_v48  ;;  %v16874_v1 = vcombine.high %v13629_v47, %v13629_v47 }
 0x19d   :  { %v13899_v27 = vld [vmem:[#allocation2 + $0x52] sm:$0x1f]  ;;  %9027 = vst.msk [vmem:[#allocation2 + $0x58] sm:$0x1] %vm1013_vm4, %v16865_v55  ;;  %v1520_v41 = vrot.slane %v1512_v51, %v13360_v39  ;;  %v1561_v3 = vcombine.low %v1552_v2, %v1559_v28  ;;  %v16875_v16 = vcombine.high %v13642_v29, %v13642_v29  ;;  %9029 = vst.msk [vmem:[#allocation2 + $0x68] sm:$0x1] %vm1013_vm4, %v16865_v55 }
 0x19e   :  { %9026 = vst.msk [vmem:[#allocation2 + $0x50] sm:$0xff] %vm234_vm2, %v16865_v55  ;;  %v1527_v43 = vrot.slane %v1513_v53, %v13360_v39  ;;  %v1577_v18 = vcombine.low %v13629_v47, %v16873_v21  ;;  %v1578_v7 = vcombine.low %v16874_v1, %v13642_v29  ;;  %v16876_v54 = vcombine.high %v13656_v8, %v13656_v8  ;;  %v13943_v38 = vld [vmem:[#allocation2 + $0x70] sm:$0x1f] }
 0x19f   :  { %12221 = vst.msk [vmem:[#allocation2 + $0x58] sm:$0x1] %vm1013_vm4, %v16865_v55  ;;  %v1579_v59 = vcombine.low %v13656_v8, %v16875_v16  ;;  %v1625_v47 = vcombine.low %v13653_v4, %v13669_v60  ;;  %v13945_v29 = vld [vmem:[#allocation2 + $0x72] sm:$0x1f]  ;;  %12223 = vst.msk [vmem:[#allocation2 + $0x68] sm:$0x1] %vm1013_vm4, %v16865_v55  ;;  %v1568_v5 = vrot.slane %v1560_v40, %v13360_v39 }
 0x1a0   :  { %v1528_v35 = vcombine.low %v1520_v41, %v1527_v43  ;;  %v1586_v13 = vrot.slane %v1577_v18, %v13360_v39  ;;  %v1607_v33 = vrot.slane %v16876_v54, %v13360_v39  ;;  %1745 = vst.msk [vmem:[#allocation2 + $0xb1] sm:$0x7f] %vm1736_vm5, %v1480_v17  ;;  %v13947_v46 = vld [vmem:[#allocation2 + $0x74] sm:$0x1f]  ;;  %v1575_v9 = vrot.slane %v1561_v3, %v13360_v39 }
 0x1a1   :  { %v1593_v8 = vrot.slane %v1578_v7, %v13360_v39  ;;  %v1600_v20 = vrot.slane %v1579_v59, %v13360_v39  ;;  %9030 = vst.msk [vmem:[#allocation2 + $0x70] sm:$0xff] %vm234_vm2, %v16865_v55  ;;  %v12657_v61 = vcombine.high %v13653_v4, %v13669_v60  ;;  %v1627_v32 = vcombine.low %v13648_v19, %v13664_v34  ;;  %v13989_v43 = vld [vmem:[#allocation2 + $0x12] sm:$0x1f]  ;;  %v4213_v59 = vld [vmem:[#allocation2 + $0x40] sm:$0x1f] }
 0x1a2   :  { %9031 = vst.msk [vmem:[#allocation2 + $0x78] sm:$0x1] %vm1013_vm4, %v16865_v55  ;;  %v1634_v10 = vrot.slane %v1625_v47, %v13360_v39  ;;  %v16877_v23 = vcombine.high %v13648_v19, %v13648_v19  ;;  %v1576_v15 = vcombine.low %v1568_v5, %v1575_v9  ;;  %v16878_v51 = vcombine.high %v13664_v34, %v13664_v34 }
 0x1a3   :  { %1746 = vst.msk [vmem:[#allocation2 + $0xc1] sm:$0x7f] %vm1736_vm5, %v1528_v35  ;;  %v1608_v60 = vcombine.low %v1586_v13, %v1593_v8  ;;  %v1609_v4 = vcombine.low %v1600_v20, %v1607_v33  ;;  %v1641_v45 = vrot.slane %v12657_v61, %v13360_v39  ;;  %v1648_v19 = vrot.slane %v1627_v32, %v13360_v39  ;;  %v16884_v32 = vld [vmem:[#allocation4_spill] sm:$0xff] }
 0x1a4   :  { %v1655_v12 = vrot.slane %v16877_v23, %v13360_v39  ;;  %12224 = vst.msk [vmem:[#allocation2 + $0x70] sm:$0xff] %vm234_vm2, %v16865_v55  ;;  %v1673_v53 = vcombine.low %v16878_v51, %v13661_v22  ;;  %v16879_v48 = vcombine.high %v13661_v22, %v13661_v22  ;;  %v16880_v28 = vrot.slane %v13638_v56, %v13360_v39 }
 0x1a5   :  { %12225 = vst.msk [vmem:[#allocation2 + $0x78] sm:$0x1] %vm1013_vm4, %v16865_v55  ;;  %v16881_v17 = vcombine.high %v13679_v6, %v13679_v6  ;;  %v1616_v34 = vrot.slane %v1608_v60, %v13360_v39  ;;  %v1623_v21 = vrot.slane %v1609_v4, %v13360_v39  ;;  %v1703_v22 = vrot.slane %v13676_v0, %v13360_v39 }
 0x1a6   :  { %v1674_v2 = vcombine.low %v13679_v6, %v16879_v48  ;;  %v1682_v18 = vrot.slane %v1673_v53, %v13360_v39  ;;  %1747 = vst.msk [vmem:[#allocation2 + $0xd1] sm:$0x7f] %vm1736_vm5, %v1576_v15  ;;  %v1656_v40 = vcombine.low %v1634_v10, %v1641_v45  ;;  %v1657_v3 = vcombine.low %v1648_v19, %v1655_v12 }
 0x1a7   :  { %v1675_v41 = vcombine.low %v16881_v17, %v16880_v28  ;;  %v1624_v1 = vcombine.low %v1616_v34, %v1623_v21  ;;  %v1143_v7 = vrot.slane %v13727_v58, %v13360_v39  ;;  %v1192_v16 = vcombine.low %v13756_v44, %v1191_v26  ;;  %v16882_v26 = vld [vmem:[#allocation6_spill] sm:$0xff] }
 0x1a8   :  { %v1689_v56 = vrot.slane %v1674_v2, %v13360_v39  ;;  %v2227_v0 = vrot.slane %v13989_v43, %v13360_v39  ;;  %v1664_v35 = vrot.slane %v1656_v40, %v13360_v39  ;;  %v1671_v13 = vrot.slane %v1657_v3, %v13360_v39  ;;  %v14063_v3 = vld [vmem:[#allocation2 + $0x60] sm:$0x1f] }
 0x1a9   :  { %v1696_v6 = vrot.slane %v1675_v41, %v13360_v39  ;;  %1748 = vst.msk [vmem:[#allocation2 + $0xe1] sm:$0x7f] %vm1736_vm5, %v1624_v1  ;;  %v1144_v58 = vcombine.low %v1136_v24, %v1143_v7  ;;  %1739 = vst.msk [vmem:[#allocation2 + $0x31] sm:$0x7f] %vm1736_vm5, %v1192_v16  ;;  %v16883_v47 = vcombine.low %v13377_v57, %v16882_v26  ;;  %v14091_v26 = vld [vmem:[#allocation2 + $0x62] sm:$0x1f] }
 0x1aa   :  { %v1704_v54 = vcombine.low %v1682_v18, %v1689_v56  ;;  %v2235_v36 = vcombine.high %v2227_v0, %v2227_v0  ;;  %v2242_v44 = vrot.slane %v2227_v0, %v13360_v39  ;;  %v1672_v9 = vcombine.low %v1664_v35, %v1671_v13  ;;  %v14065_v56 = vld [vmem:[#allocation2 + $0x62] sm:$0x1f] }
 0x1ab   :  { %v1705_v33 = vcombine.low %v1696_v6, %v1703_v22  ;;  %v14019_v5 = vrot.slane %v16883_v47, %v13360_v39  ;;  %v4233_v61 = vcombine.high %v4213_v59, %v4213_v59  ;;  %1738 = vst.msk [vmem:[#allocation2 + $0x21] sm:$0x7f] %vm1736_vm5, %v1144_v58  ;;  %v16885_v10 = vrot.slane %v16884_v32, %v13360_v39 }
 0x1ac   :  { %v1712_v8 = vrot.slane %v1704_v54, %v13360_v39  ;;  %v14025_v42 = vrot.slane %v2235_v36, %v13360_v39  ;;  %v2257_v24 = vcombine.high %v2242_v44, %v2242_v44  ;;  %v4240_v57 = vrot.slane %v4213_v59, %v13360_v39  ;;  %1749 = vst.msk [vmem:[#allocation2 + $0xf1] sm:$0x7f] %vm1736_vm5, %v1672_v9 }
 0x1ad   :  { %v1719_v20 = vrot.slane %v1705_v33, %v13360_v39  ;;  %v14030_v23 = vcombine.low %v16885_v10, %v2242_v44  ;;  %v2170_v15 = vld [vmem:[#allocation2 + $0xd2] sm:$0x1f]  ;;  %v14035_v4 = vrot.slane %v4233_v61, %v13360_v39  ;;  %v14039_v51 = vrot.slane %v13885_v31, %v13360_v39  ;;  %v14089_v44 = vld [vmem:[#allocation2 + $0x60] sm:$0x1f] }
 0x1ae   :  { %v2580_v60 = vld [vmem:[#allocation2 + $0xd4] sm:$0x1f]  ;;  %v14043_v53 = vrot.slane %v13809_v37, %v13360_v39  ;;  %v2532_v45 = vcombine.high %v2170_v15, %v2170_v15  ;;  %v2539_v19 = vrot.slane %v2170_v15, %v13360_v39  ;;  %v14051_v28 = vcombine.low %v14025_v42, %v2257_v24  ;;  %9028 = vst.msk [vmem:[#allocation2 + $0x60] sm:$0xff] %vm234_vm2, %v16865_v55  ;;  %v14115_v15 = vld [vmem:[#allocation2 + $0x80] sm:$0x1f] }
 0x1af   :  { %v1720_v12 = vcombine.low %v1712_v8, %v1719_v20  ;;  %v2942_v48 = vcombine.high %v2580_v60, %v2580_v60  ;;  %v14047_v2 = vrot.slane %v2580_v60, %v13360_v39  ;;  %v4248_v41 = vcombine.high %v4240_v57, %v4240_v57  ;;  %v14117_v60 = vld [vmem:[#allocation2 + $0x82] sm:$0x1f] }
 0x1b0   :  { %v14056_v34 = vrot.slane %v4240_v57, %v13360_v39  ;;  %v2546_v21 = vrot.slane %v2532_v45, %v13360_v39  ;;  %v2547_v18 = vcombine.high %v2539_v19, %v2539_v19  ;;  %v14060_v22 = vrot.slane %v2539_v19, %v13360_v39  ;;  %v14069_v1 = vld [vmem:[#allocation2 + $0x30] sm:$0x1f] }
 0x1b1   :  { %16886 = vst [vmem:[#allocation6_spill] sm:$0xff] %v14047_v2  ;;  %1750 = vst.msk [vmem:[#allocation2 + $0x101] sm:$0x7f] %vm1736_vm5, %v1720_v12  ;;  %v2956_v40 = vrot.slane %v2942_v48, %v13360_v39  ;;  %v2957_v6 = vcombine.high %v14047_v2, %v14047_v2  ;;  %v14071_v7 = vld [vmem:[#allocation2 + $0x32] sm:$0x1f]  ;;  %v14080_v35 = vrot.slane %v4248_v41, %v13360_v39 }
 0x1b2   :  { %16887 = vst [vmem:[#allocation4_spill] sm:$0xff] %v14060_v22  ;;  %v14073_v16 = vld [vmem:[#allocation2 + $0x34] sm:$0x1f]  ;;  %v2561_v13 = vrot.slane %v2546_v21, %v13360_v39  ;;  %v2568_v54 = vrot.slane %v2547_v18, %v13360_v39  ;;  %v2569_v33 = vcombine.high %v14060_v22, %v14060_v22  ;;  %v2982_v9 = vld [vmem:[#allocation2 + $0x20] sm:$0x1f]  ;;  %v3048_v8 = vrot.slane %v14069_v1, %v13360_v39 }
 0x1b3   :  { %v2971_v58 = vrot.slane %v2956_v40, %v13360_v39  ;;  %v14087_v36 = vld [vmem:[#allocation2 + $0x34] sm:$0x1f]  ;;  %v14094_v47 = vrot.slane %v2957_v6, %v13360_v39  ;;  %v14100_v20 = vrot.slane %v14071_v7, %v13360_v39  ;;  %v14104_v61 = vrot.slane %v14073_v16, %v13360_v39  ;;  %v14122_v21 = vld [vmem:[#allocation2 + $0x24] sm:$0x1f] }
 0x1b4   :  { %9023 = vst.msk [vmem:[#allocation2 + $0x38] sm:$0x1] %vm1013_vm4, %v16865_v55  ;;  %v2570_v24 = vcombine.high %v2568_v54, %v2568_v54  ;;  %v14110_v32 = vcombine.low %v2568_v54, %v2569_v33  ;;  %v3002_v10 = vcombine.high %v2982_v9, %v2982_v9  ;;  %v3009_v57 = vrot.slane %v2982_v9, %v13360_v39  ;;  %v2991_v12 = vld [vmem:[#allocation2 + $0xf0] sm:$0x1f]  ;;  %v14124_v18 = vld [vmem:[#allocation2 + $0x24] sm:$0x1f] }
 0x1b5   :  { %16888 = vst [vmem:[#allocation9_spill] sm:$0xff] %v14094_v47  ;;  %12217 = vst.msk [vmem:[#allocation2 + $0x38] sm:$0x1] %vm1013_vm4, %v16865_v55  ;;  %v2980_v45 = vcombine.high %v14094_v47, %v14094_v47  ;;  %v3056_v19 = vcombine.high %v3048_v8, %v3048_v8  ;;  %v3063_v48 = vrot.slane %v3048_v8, %v13360_v39  ;;  %v14126_v40 = vld [vmem:[#allocation2 + $0x84] sm:$0x1f] }
 0x1b6   :  { %16889 = vst [vmem:[#allocation10_spill] sm:$0xff] %v14110_v32  ;;  %v3353_v41 = vcombine.high %v2991_v12, %v2991_v12  ;;  %16890 = vst [vmem:[#allocation11_spill] sm:$0xff] %v14126_v40  ;;  %v6053_v6 = vcombine.low %v2570_v24, %v2561_v13  ;;  %v3016_v54 = vrot.slane %v3002_v10, %v13360_v39  ;;  %v3392_v47 = vld [vmem:[#allocation2 + $0x22] sm:$0x1f] }
 0x1b7   :  { %v3017_v33 = vcombine.high %v3009_v57, %v3009_v57  ;;  %v3024_v9 = vrot.slane %v3009_v57, %v13360_v39  ;;  %9021 = vst.msk [vmem:[#allocation2 + $0x28] sm:$0x1] %vm1013_vm4, %v16865_v55  ;;  %9033 = vst.msk [vmem:[#allocation2 + $0x88] sm:$0x1] %vm1013_vm4, %v16865_v55  ;;  %v6383_v8 = vcombine.low %v2980_v45, %v2971_v58  ;;  %v3401_v45 = vld [vmem:[#allocation2 + $0xf2] sm:$0x1f] }
 0x1b8   :  { %9032 = vst.msk [vmem:[#allocation2 + $0x80] sm:$0xff] %vm234_vm2, %v16865_v55  ;;  %v14137_v59 = vrot.slane %v3056_v19, %v13360_v39  ;;  %v3078_v17 = vcombine.high %v3063_v48, %v3063_v48  ;;  %v14140_v13 = vrot.slane %v2991_v12, %v13360_v39  ;;  %v6060_v24 = vrot.slane %v6053_v6, %v13360_v39 }
 0x1b9   :  { %12215 = vst.msk [vmem:[#allocation2 + $0x28] sm:$0x1] %vm1013_vm4, %v16865_v55  ;;  %12227 = vst.msk [vmem:[#allocation2 + $0x88] sm:$0x1] %vm1013_vm4, %v16865_v55  ;;  %v3031_v58 = vrot.slane %v3016_v54, %v13360_v39  ;;  %v3038_v10 = vrot.slane %v3017_v33, %v13360_v39  ;;  %v3367_v57 = vrot.slane %v3353_v41, %v13360_v39 }
 0x1ba   :  { %16891 = vst [vmem:[#allocation12_spill] sm:$0xff] %v14140_v13  ;;  %12226 = vst.msk [vmem:[#allocation2 + $0x80] sm:$0xff] %vm234_vm2, %v16865_v55  ;;  %v6390_v12 = vrot.slane %v6383_v8, %v13360_v39  ;;  %v6422_v19 = vcombine.low %v14137_v59, %v3078_v17  ;;  %v3368_v0 = vcombine.high %v14140_v13, %v14140_v13 }
 0x1bb   :  { %v6067_v2 = vrot.slane %v6060_v24, %v13360_v39  ;;  %v6419_v6 = vcombine.low %v3024_v9, %v3038_v10  ;;  %v12673_v22 = vcombine.high %v3024_v9, %v3038_v10  ;;  %v6421_v54 = vcombine.low %v3031_v58, %v3063_v48 }
 0x1bc   :  { %v6397_v33 = vrot.slane %v6390_v12, %v13360_v39  ;;  %v6450_v41 = vrot.slane %v6422_v19, %v13360_v39  ;;  %v3382_v8 = vrot.slane %v3367_v57, %v13360_v39  ;;  %v14163_v32 = vrot.slane %v3368_v0, %v13360_v39 }
 0x1bd   :  { %6080 = vrot.lane.b32.xlu0 %v6067_v2, %s13036_s11  ;;  %v6429_v17 = vrot.slane %v6419_v6, %v13360_v39  ;;  %v6436_v24 = vrot.slane %v12673_v22, %v13360_v39  ;;  %v6443_v9 = vrot.slane %v6421_v54, %v13360_v39  ;;  %v3412_v48 = vcombine.high %v3392_v47, %v3392_v47 }
 0x1be   :  { %16892 = vst [vmem:[#allocation13_spill] sm:$0xff] %v14163_v32  ;;  %v3391_v58 = vcombine.high %v14163_v32, %v14163_v32  ;;  %v3419_v10 = vrot.slane %v3392_v47, %v13360_v39  ;;  %v3466_v0 = vcombine.high %v14100_v20, %v14100_v20  ;;  %v3473_v57 = vrot.slane %v14100_v20, %v13360_v39 }
 0x1bf   :  { %v6451_v12 = vcombine.low %v6429_v17, %v6436_v24  ;;  %v6452_v2 = vcombine.low %v6443_v9, %v6450_v41  ;;  %v3426_v19 = vrot.slane %v3412_v48, %v13360_v39  ;;  %v3763_v6 = vcombine.high %v3401_v45, %v3401_v45 }
 0x1c0   :  { %v6713_v22 = vcombine.low %v3391_v58, %v3382_v8  ;;  %v3427_v13 = vcombine.high %v3419_v10, %v3419_v10  ;;  %v3434_v54 = vrot.slane %v3419_v10, %v13360_v39  ;;  %v14179_v40 = vrot.slane %v3466_v0, %v13360_v39 }
 0x1c1   :  { %6410 = vrot.lane.b32.xlu0 %v6397_v33, %s13037_s12  ;;  %v6459_v47 = vrot.slane %v6451_v12, %v13360_v39  ;;  %v6466_v32 = vrot.slane %v6452_v2, %v13360_v39  ;;  %v3441_v20 = vrot.slane %v3426_v19, %v13360_v39  ;;  %v3488_v41 = vcombine.high %v3473_v57, %v3473_v57 }
 0x1c2   :  { %v6720_v17 = vrot.slane %v6713_v22, %v13360_v39  ;;  %v3448_v8 = vrot.slane %v3427_v13, %v13360_v39  ;;  %v14188_v24 = vrot.slane %v3401_v45, %v13360_v39  ;;  %v3777_v9 = vrot.slane %v3763_v6, %v13360_v39 }
 0x1c3   :  { %v6467_v48 = vcombine.low %v6459_v47, %v6466_v32  ;;  %v6751_v58 = vcombine.low %v3441_v20, %v3473_v57  ;;  %v6752_v33 = vcombine.low %v14179_v40, %v3488_v41  ;;  %v3822_v10 = vcombine.high %v14122_v21, %v14122_v21 }
 0x1c4   :  { %v6727_v0 = vrot.slane %v6720_v17, %v13360_v39  ;;  %v6749_v12 = vcombine.low %v3434_v54, %v3448_v8  ;;  %v12678_v2 = vcombine.high %v3434_v54, %v3448_v8  ;;  %v3778_v19 = vcombine.high %v14188_v24, %v14188_v24 }
 0x1c5   :  { %6728 = vrot.lane.b32.xlu1 %v6467_v48, %s13038_s13  ;;  %v6773_v13 = vrot.slane %v6751_v58, %v13360_v39  ;;  %v6780_v32 = vrot.slane %v6752_v33, %v13360_v39  ;;  %v3792_v45 = vrot.slane %v3777_v9, %v13360_v39  ;;  %v3829_v57 = vrot.slane %v14122_v21, %v13360_v39 }
 0x1c6   :  { %6740 = vrot.lane.b32.xlu0 %v6727_v0, %s13038_s13  ;;  %v6759_v6 = vrot.slane %v6749_v12, %v13360_v39  ;;  %v6766_v22 = vrot.slane %v12678_v2, %v13360_v39  ;;  %v14207_v54 = vrot.slane %v3778_v19, %v13360_v39  ;;  %v3836_v47 = vrot.slane %v3822_v10, %v13360_v39 }
 0x1c7   :  { %v6782_v20 = vcombine.low %v6773_v13, %v6780_v32  ;;  %v3837_v41 = vcombine.high %v3829_v57, %v3829_v57  ;;  %v3844_v17 = vrot.slane %v3829_v57, %v13360_v39  ;;  %v3876_v8 = vcombine.high %v14104_v61, %v14104_v61 }
 0x1c8   :  { %16893 = vst [vmem:[#allocation14_spill] sm:$0xff] %v14207_v54  ;;  %v6781_v9 = vcombine.low %v6759_v6, %v6766_v22  ;;  %v3801_v21 = vcombine.high %v14207_v54, %v14207_v54  ;;  %v3851_v48 = vrot.slane %v3836_v47, %v13360_v39  ;;  %v3883_v58 = vrot.slane %v14104_v61, %v13360_v39 }
 0x1c9   :  { %v6796_v33 = vrot.slane %v6782_v20, %v13360_v39  ;;  %v3858_v10 = vrot.slane %v3837_v41, %v13360_v39  ;;  %v14221_v0 = vrot.slane %v3876_v8, %v13360_v39  ;;  %v16894_v12 = vrot.slane %v14051_v28, %v13360_v39  ;;  %v14233_v41 = vld [vmem:[#allocation2 + $0x94] sm:$0x1f] }
 0x1ca   :  { %v16895_v2 = vrot.slane %v14030_v23, %v13360_v39  ;;  %v6789_v13 = vrot.slane %v6781_v9, %v13360_v39  ;;  %v7043_v32 = vcombine.low %v3801_v21, %v3792_v45  ;;  %v3898_v57 = vcombine.high %v3883_v58, %v3883_v58  ;;  %9035 = vst.msk [vmem:[#allocation2 + $0x98] sm:$0x1] %vm1013_vm4, %v16865_v55 }
 0x1cb   :  { %v7081_v6 = vcombine.low %v3851_v48, %v3883_v58  ;;  %v7079_v61 = vcombine.low %v3844_v17, %v3858_v10  ;;  %v12683_v22 = vcombine.high %v3844_v17, %v3858_v10  ;;  %v4287_v20 = vcombine.high %v14039_v51, %v14039_v51  ;;  %v14245_v48 = vld [vmem:[#allocation2 + $0xa4] sm:$0x1f]  ;;  %12229 = vst.msk [vmem:[#allocation2 + $0x98] sm:$0x1] %vm1013_vm4, %v16865_v55 }
 0x1cc   :  { %v5792_v19 = vcombine.low %v16895_v2, %v16894_v12  ;;  %v6797_v8 = vcombine.low %v6789_v13, %v6796_v33  ;;  %v7050_v28 = vrot.slane %v7043_v32, %v13360_v39  ;;  %v7082_v23 = vcombine.low %v14221_v0, %v3898_v57  ;;  %9037 = vst.msk [vmem:[#allocation2 + $0xa8] sm:$0x1] %vm1013_vm4, %v16865_v55 }
 0x1cd   :  { %v7103_v12 = vrot.slane %v7081_v6, %v13360_v39  ;;  %v7089_v45 = vrot.slane %v7079_v61, %v13360_v39  ;;  %v7096_v17 = vrot.slane %v12683_v22, %v13360_v39  ;;  %v4294_v21 = vrot.slane %v14039_v51, %v13360_v39  ;;  %12231 = vst.msk [vmem:[#allocation2 + $0xa8] sm:$0x1] %vm1013_vm4, %v16865_v55 }
 0x1ce   :  { %v5806_v47 = vrot.slane %v5792_v19, %v13360_v39  ;;  %7058 = vrot.lane.b32.xlu1 %v6797_v8, %s13039_s14  ;;  %v7057_v58 = vrot.slane %v7050_v28, %v13360_v39  ;;  %v7110_v33 = vrot.slane %v7082_v23, %v13360_v39  ;;  %v14253_v10 = vrot.slane %v4287_v20, %v13360_v39  ;;  %v4623_v20 = vld [vmem:[#allocation2 + $0x42] sm:$0x1f] }
 0x1cf   :  { %v7111_v51 = vcombine.low %v7089_v45, %v7096_v17  ;;  %v4309_v2 = vcombine.high %v4294_v21, %v4294_v21  ;;  %v12688_v19 = vcombine.high %v14056_v34, %v14080_v35  ;;  %v16896_v13 = vrot.slane %v14035_v4, %v13360_v39  ;;  %v16898_v45 = vld [vmem:[#allocation7_spill] sm:$0xff] }
 0x1d0   :  { %v5807_v9 = vcombine.low %v14019_v5, %v5806_v47  ;;  %v7409_v5 = vcombine.low %v14056_v34, %v14080_v35  ;;  %7070 = vrot.lane.b32.xlu0 %v7057_v58, %s13039_s14  ;;  %v7112_v57 = vcombine.low %v7103_v12, %v7110_v33  ;;  %v2645_v61 = vcombine.high %v14043_v53, %v14043_v53  ;;  %v16897_v12 = vld [vmem:[#allocation8_spill] sm:$0xff]  ;;  %v16899_v33 = vld [vmem:[#allocation5_spill] sm:$0xff] }
 0x1d1   :  { %v7411_v32 = vcombine.low %v16896_v13, %v4294_v21  ;;  %v2652_v22 = vrot.slane %v14043_v53, %v13360_v39  ;;  %v7119_v34 = vrot.slane %v7111_v51, %v13360_v39  ;;  %v7412_v35 = vcombine.low %v14253_v10, %v4309_v2 }
 0x1d2   :  { %v7419_v6 = vrot.slane %v7409_v5, %v13360_v39  ;;  %v7426_v4 = vrot.slane %v12688_v19, %v13360_v39  ;;  %v7126_v8 = vrot.slane %v7112_v57, %v13360_v39  ;;  %v14278_v28 = vrot.slane %v2645_v61, %v13360_v39 }
 0x1d3   :  { %v7433_v47 = vrot.slane %v7411_v32, %v13360_v39  ;;  %v2667_v23 = vcombine.high %v2652_v22, %v2652_v22  ;;  %v6089_v17 = vcombine.low %v16898_v45, %v16897_v12  ;;  %v7440_v53 = vrot.slane %v7412_v35, %v13360_v39 }
 0x1d4   :  { %v7441_v21 = vcombine.low %v7419_v6, %v7426_v4  ;;  %v12668_v58 = vcombine.high %v16898_v45, %v16897_v12  ;;  %v16900_v5 = vrot.slane %v16899_v33, %v13360_v39  ;;  %v7127_v2 = vcombine.low %v7119_v34, %v7126_v8  ;;  %6068 = vrot.lane.b32.xlu0 %v5807_v9, %s13036_s11 }
 0x1d5   :  { %v6092_v19 = vcombine.low %v14278_v28, %v2667_v23  ;;  %v6099_v13 = vrot.slane %v6089_v17, %v13360_v39  ;;  %v4643_v32 = vcombine.high %v4623_v20, %v4623_v20  ;;  %v7442_v57 = vcombine.low %v7433_v47, %v7440_v53 }
 0x1d6   :  { %v6091_v51 = vcombine.low %v16900_v5, %v2652_v22  ;;  %v7449_v61 = vrot.slane %v7441_v21, %v13360_v39  ;;  %v6106_v6 = vrot.slane %v12668_v58, %v13360_v39  ;;  %7388 = vrot.lane.b32.xlu1 %v7127_v2, %s13040_s15  ;;  %v4650_v34 = vrot.slane %v4623_v20, %v13360_v39 }
 0x1d7   :  { %v6120_v22 = vrot.slane %v6092_v19, %v13360_v39  ;;  %v4657_v9 = vrot.slane %v4643_v32, %v13360_v39  ;;  %v4689_v4 = vrot.slane %v13887_v52, %v13360_v39  ;;  %v7456_v47 = vrot.slane %v7442_v57, %v13360_v39 }
 0x1d8   :  { %v6113_v35 = vrot.slane %v6091_v51, %v13360_v39  ;;  %v6121_v8 = vcombine.low %v6099_v13, %v6106_v6  ;;  %v5053_v23 = vcombine.high %v13873_v62, %v13873_v62  ;;  %v5060_v12 = vrot.slane %v13873_v62, %v13360_v39 }
 0x1d9   :  { %v4658_v17 = vcombine.high %v4650_v34, %v4650_v34  ;;  %v4665_v53 = vrot.slane %v4650_v34, %v13360_v39  ;;  %v4672_v20 = vrot.slane %v4657_v9, %v13360_v39  ;;  %v7457_v21 = vcombine.low %v7449_v61, %v7456_v47 }
 0x1da   :  { %v6122_v45 = vcombine.low %v6113_v35, %v6120_v22  ;;  %v6129_v58 = vrot.slane %v6121_v8, %v13360_v39  ;;  %v4697_v33 = vcombine.high %v4689_v4, %v4689_v4  ;;  %v4704_v5 = vrot.slane %v4689_v4, %v13360_v39 }
 0x1db   :  { %v4679_v2 = vrot.slane %v4658_v17, %v13360_v39  ;;  %v5067_v19 = vrot.slane %v5053_v23, %v13360_v39  ;;  %v5068_v13 = vcombine.high %v5060_v12, %v5060_v12  ;;  %7718 = vrot.lane.b32.xlu1 %v7457_v21, %s13041_s16  ;;  %v5075_v61 = vrot.slane %v5060_v12, %v13360_v39  ;;  %v2163_v23 = vld [vmem:[#allocation2 + $0x22] sm:$0x1f] }
 0x1dc   :  { %v6136_v51 = vrot.slane %v6122_v45, %v13360_v39  ;;  %v14314_v62 = vrot.slane %v4697_v33, %v13360_v39  ;;  %v4719_v32 = vcombine.high %v4704_v5, %v4704_v5  ;;  %v7741_v57 = vcombine.low %v4672_v20, %v4704_v5 }
 0x1dd   :  { %v7739_v35 = vcombine.low %v4665_v53, %v4679_v2  ;;  %v12693_v22 = vcombine.high %v4665_v53, %v4679_v2  ;;  %v5082_v34 = vrot.slane %v5067_v19, %v13360_v39  ;;  %v5089_v47 = vrot.slane %v5068_v13, %v13360_v39 }
 0x1de   :  { %v6137_v6 = vcombine.low %v6129_v58, %v6136_v51  ;;  %v7742_v9 = vcombine.low %v14314_v62, %v4719_v32  ;;  %v7763_v4 = vrot.slane %v7741_v57, %v13360_v39  ;;  %v5099_v8 = vrot.slane %v13889_v14, %v13360_v39 }
 0x1df   :  { %v7749_v45 = vrot.slane %v7739_v35, %v13360_v39  ;;  %v7756_v12 = vrot.slane %v12693_v22, %v13360_v39  ;;  %v2220_v17 = vcombine.high %v13989_v43, %v13989_v43  ;;  %v2258_v53 = vcombine.high %v14025_v42, %v14025_v42 }
 0x1e0   :  { %6398 = vrot.lane.b32.xlu0 %v6137_v6, %s13037_s12  ;;  %v7770_v20 = vrot.slane %v7742_v9, %v13360_v39  ;;  %v5107_v21 = vcombine.high %v5099_v8, %v5099_v8  ;;  %v5114_v58 = vrot.slane %v5099_v8, %v13360_v39  ;;  %v8069_v33 = vcombine.low %v5075_v61, %v5089_v47  ;;  %v14336_v6 = vld [vmem:[#allocation2 + $0x32] sm:$0x1f] }
 0x1e1   :  { %v7771_v5 = vcombine.low %v7749_v45, %v7756_v12  ;;  %v12698_v51 = vcombine.high %v5075_v61, %v5089_v47  ;;  %v2234_v2 = vrot.slane %v2220_v17, %v13360_v39  ;;  %v2259_v19 = vcombine.high %v2163_v23, %v2163_v23 }
 0x1e2   :  { %v7772_v13 = vcombine.low %v7763_v4, %v7770_v20  ;;  %v14334_v32 = vrot.slane %v5107_v21, %v13360_v39  ;;  %v5129_v57 = vcombine.high %v5114_v58, %v5114_v58  ;;  %v8071_v43 = vcombine.low %v5082_v34, %v5114_v58 }
 0x1e3   :  { %v7779_v42 = vrot.slane %v7771_v5, %v13360_v39  ;;  %v8079_v35 = vrot.slane %v8069_v33, %v13360_v39  ;;  %v8086_v22 = vrot.slane %v12698_v51, %v13360_v39  ;;  %v2249_v9 = vrot.slane %v2234_v2, %v13360_v39 }
 0x1e4   :  { %v7786_v61 = vrot.slane %v7772_v13, %v13360_v39  ;;  %v8072_v47 = vcombine.low %v14334_v32, %v5129_v57  ;;  %v8093_v4 = vrot.slane %v8071_v43, %v13360_v39  ;;  %v2266_v8 = vrot.slane %v2163_v23, %v13360_v39 }
 0x1e5   :  { %v8101_v45 = vcombine.low %v8079_v35, %v8086_v22  ;;  %v2273_v34 = vrot.slane %v2259_v19, %v13360_v39  ;;  %v14349_v12 = vrot.slane %v14336_v6, %v13360_v39  ;;  %v5808_v17 = vcombine.low %v2258_v53, %v2249_v9 }
 0x1e6   :  { %v7787_v20 = vcombine.low %v7779_v42, %v7786_v61  ;;  %v8100_v21 = vrot.slane %v8072_v47, %v13360_v39  ;;  %v2274_v58 = vcombine.high %v2266_v8, %v2266_v8  ;;  %v2281_v33 = vrot.slane %v2266_v8, %v13360_v39 }
 0x1e7   :  { %v8109_v5 = vrot.slane %v8101_v45, %v13360_v39  ;;  %v2288_v51 = vrot.slane %v2273_v34, %v13360_v39  ;;  %v14357_v23 = vrot.slane %v14349_v12, %v13360_v39  ;;  %v5818_v2 = vrot.slane %v5808_v17, %v13360_v39 }
 0x1e8   :  { %8048 = vrot.lane.b32.xlu1 %v7787_v20, %s13042_s17  ;;  %v8102_v53 = vcombine.low %v8093_v4, %v8100_v21  ;;  %v2295_v19 = vrot.slane %v2274_v58, %v13360_v39  ;;  %v3861_v13 = vcombine.high %v14073_v16, %v14073_v16  ;;  %v3899_v57 = vcombine.high %v14221_v0, %v14221_v0 }
 0x1e9   :  { %v5811_v43 = vcombine.low %v2288_v51, %v14357_v23  ;;  %v3900_v42 = vcombine.high %v13875_v11, %v13875_v11  ;;  %v3907_v35 = vrot.slane %v13875_v11, %v13360_v39  ;;  %v14373_v22 = vrot.slane %v13895_v25, %v13360_v39 }
 0x1ea   :  { %v8116_v9 = vrot.slane %v8102_v53, %v13360_v39  ;;  %v5809_v61 = vcombine.low %v2281_v33, %v2295_v19  ;;  %v12664_v47 = vcombine.high %v2281_v33, %v2295_v19  ;;  %v3875_v16 = vrot.slane %v3861_v13, %v13360_v39 }
 0x1eb   :  { %v5839_v0 = vrot.slane %v5811_v43, %v13360_v39  ;;  %v3914_v4 = vrot.slane %v3900_v42, %v13360_v39  ;;  %v3915_v8 = vcombine.high %v3907_v35, %v3907_v35  ;;  %v3922_v45 = vrot.slane %v3907_v35, %v13360_v39 }
 0x1ec   :  { %v8117_v34 = vcombine.low %v8109_v5, %v8116_v9  ;;  %v5825_v11 = vrot.slane %v5809_v61, %v13360_v39  ;;  %v5832_v17 = vrot.slane %v12664_v47, %v13360_v39  ;;  %v3890_v20 = vrot.slane %v3875_v16, %v13360_v39 }
 0x1ed   :  { %v3929_v21 = vrot.slane %v3914_v4, %v13360_v39  ;;  %v3936_v58 = vrot.slane %v3915_v8, %v13360_v39  ;;  %v14387_v33 = vrot.slane %v14373_v22, %v13360_v39  ;;  %v2630_v51 = vcombine.high %v13809_v37, %v13809_v37 }
 0x1ee   :  { %8378 = vrot.lane.b32.xlu1 %v8117_v34, %s13043_s18  ;;  %v5840_v5 = vcombine.low %v5818_v2, %v5825_v11  ;;  %v5841_v53 = vcombine.low %v5832_v17, %v5839_v0  ;;  %v7128_v19 = vcombine.low %v3899_v57, %v3890_v20  ;;  %v2668_v13 = vcombine.high %v14278_v28, %v14278_v28 }
 0x1ef   :  { %v7129_v43 = vcombine.low %v3922_v45, %v3936_v58  ;;  %v12684_v42 = vcombine.high %v3922_v45, %v3936_v58  ;;  %v7131_v35 = vcombine.low %v3929_v21, %v14387_v33  ;;  %v2644_v9 = vrot.slane %v2630_v51, %v13360_v39 }
 0x1f0   :  { %v5848_v61 = vrot.slane %v5840_v5, %v13360_v39  ;;  %v5855_v47 = vrot.slane %v5841_v53, %v13360_v39  ;;  %v7138_v37 = vrot.slane %v7128_v19, %v13360_v39  ;;  %v2669_v2 = vcombine.high %v14124_v18, %v14124_v18 }
 0x1f1   :  { %v7145_v57 = vrot.slane %v7129_v43, %v13360_v39  ;;  %v7152_v16 = vrot.slane %v12684_v42, %v13360_v39  ;;  %v7159_v28 = vrot.slane %v7131_v35, %v13360_v39  ;;  %v2659_v0 = vrot.slane %v2644_v9, %v13360_v39 }
 0x1f2   :  { %v5856_v4 = vcombine.low %v5848_v61, %v5855_v47  ;;  %v2676_v8 = vrot.slane %v14124_v18, %v13360_v39  ;;  %v2683_v45 = vrot.slane %v2669_v2, %v13360_v39  ;;  %v14410_v34 = vrot.slane %v14087_v36, %v13360_v39 }
 0x1f3   :  { %v7160_v11 = vcombine.low %v7138_v37, %v7145_v57  ;;  %v7161_v17 = vcombine.low %v7152_v16, %v7159_v28  ;;  %v6138_v20 = vcombine.low %v2668_v13, %v2659_v0  ;;  %v4272_v21 = vcombine.high %v13885_v31, %v13885_v31 }
 0x1f4   :  { %6070 = vrot.lane.b32.xlu0 %v5856_v4, %s13036_s11  ;;  %v2684_v58 = vcombine.high %v2676_v8, %v2676_v8  ;;  %v2691_v51 = vrot.slane %v2676_v8, %v13360_v39  ;;  %v2698_v5 = vrot.slane %v2683_v45, %v13360_v39  ;;  %v14419_v18 = vrot.slane %v14410_v34, %v13360_v39 }
 0x1f5   :  { %v7168_v53 = vrot.slane %v7160_v11, %v13360_v39  ;;  %v7175_v19 = vrot.slane %v7161_v17, %v13360_v39  ;;  %v6148_v13 = vrot.slane %v6138_v20, %v13360_v39  ;;  %v4286_v43 = vrot.slane %v4272_v21, %v13360_v39 }
 0x1f6   :  { %v2705_v31 = vrot.slane %v2684_v58, %v13360_v39  ;;  %v6141_v42 = vcombine.low %v2698_v5, %v14419_v18  ;;  %v4310_v35 = vcombine.high %v14253_v10, %v14253_v10  ;;  %v4311_v9 = vcombine.high %v14063_v3, %v14063_v3  ;;  %v2984_v10 = vld [vmem:[#allocation2 + $0x40] sm:$0x1f] }
 0x1f7   :  { %v7176_v61 = vcombine.low %v7168_v53, %v7175_v19  ;;  %v4301_v47 = vrot.slane %v4286_v43, %v13360_v39  ;;  %v4318_v37 = vrot.slane %v14063_v3, %v13360_v39  ;;  %v14436_v2 = vrot.slane %v13943_v38, %v13360_v39 }
 0x1f8   :  { %v6139_v57 = vcombine.low %v2691_v51, %v2705_v31  ;;  %v12669_v16 = vcombine.high %v2691_v51, %v2705_v31  ;;  %v6169_v28 = vrot.slane %v6141_v42, %v13360_v39  ;;  %v4325_v0 = vrot.slane %v4311_v9, %v13360_v39 }
 0x1f9   :  { %7390 = vrot.lane.b32.xlu1 %v7176_v61, %s13040_s15  ;;  %v4326_v4 = vcombine.high %v4318_v37, %v4318_v37  ;;  %v4333_v8 = vrot.slane %v4318_v37, %v13360_v39  ;;  %v14444_v45 = vrot.slane %v14436_v2, %v13360_v39  ;;  %v7458_v3 = vcombine.low %v4310_v35, %v4301_v47 }
 0x1fa   :  { %v6155_v11 = vrot.slane %v6139_v57, %v13360_v39  ;;  %v6162_v17 = vrot.slane %v12669_v16, %v13360_v39  ;;  %v4340_v20 = vrot.slane %v4325_v0, %v13360_v39  ;;  %v3041_v21 = vcombine.high %v14069_v1, %v14069_v1 }
 0x1fb   :  { %v4347_v58 = vrot.slane %v4326_v4, %v13360_v39  ;;  %v7468_v51 = vrot.slane %v7458_v3, %v13360_v39  ;;  %v3080_v5 = vcombine.high %v2984_v10, %v2984_v10  ;;  %v3087_v53 = vrot.slane %v2984_v10, %v13360_v39  ;;  %v14465_v4 = vld [vmem:[#allocation2 + $0xd4] sm:$0x1f] }
 0x1fc   :  { %v6170_v19 = vcombine.low %v6148_v13, %v6155_v11  ;;  %v6171_v43 = vcombine.low %v6162_v17, %v6169_v28  ;;  %v7461_v31 = vcombine.low %v4340_v20, %v14444_v45  ;;  %v3055_v42 = vrot.slane %v3041_v21, %v13360_v39 }
 0x1fd   :  { %v7459_v35 = vcombine.low %v4333_v8, %v4347_v58  ;;  %v12689_v9 = vcombine.high %v4333_v8, %v4347_v58  ;;  %v3094_v61 = vrot.slane %v3080_v5, %v13360_v39  ;;  %v3095_v47 = vcombine.high %v3087_v53, %v3087_v53  ;;  %v14467_v8 = vld [vmem:[#allocation2 + $0xd4] sm:$0x1f] }
 0x1fe   :  { %v6178_v1 = vrot.slane %v6170_v19, %v13360_v39  ;;  %v6185_v37 = vrot.slane %v6171_v43, %v13360_v39  ;;  %v7489_v57 = vrot.slane %v7461_v31, %v13360_v39  ;;  %v3070_v16 = vrot.slane %v3055_v42, %v13360_v39  ;;  %9043 = vst.msk [vmem:[#allocation2 + $0xd8] sm:$0x1] %vm1013_vm4, %v16865_v55 }
 0x1ff   :  { %v7475_v13 = vrot.slane %v7459_v35, %v13360_v39  ;;  %v7482_v28 = vrot.slane %v12689_v9, %v13360_v39  ;;  %v3102_v0 = vrot.slane %v3087_v53, %v13360_v39  ;;  %v3109_v10 = vrot.slane %v3094_v61, %v13360_v39  ;;  %12237 = vst.msk [vmem:[#allocation2 + $0xd8] sm:$0x1] %vm1013_vm4, %v16865_v55 }
 0x200   :  { %v6186_v3 = vcombine.low %v6178_v1, %v6185_v37  ;;  %v3116_v11 = vrot.slane %v3095_v47, %v13360_v39  ;;  %v14472_v17 = vrot.slane %v13897_v30, %v13360_v39  ;;  %v16901_v20 = vcombine.high %v14137_v59, %v14137_v59 }
 0x201   :  { %v7490_v58 = vcombine.low %v7468_v51, %v7475_v13  ;;  %v7491_v5 = vcombine.low %v7482_v28, %v7489_v57  ;;  %v4682_v53 = vcombine.high %v13887_v52, %v13887_v52  ;;  %v4720_v19 = vcombine.high %v14314_v62, %v14314_v62 }
 0x202   :  { %v6468_v21 = vcombine.low %v16901_v20, %v3070_v16  ;;  %6400 = vrot.lane.b32.xlu0 %v6186_v3, %s13037_s12  ;;  %v14488_v59 = vrot.slane %v14472_v17, %v13360_v39  ;;  %v6469_v43 = vcombine.low %v3102_v0, %v3116_v11  ;;  %v12674_v31 = vcombine.high %v3102_v0, %v3116_v11  ;;  %v3394_v11 = vld [vmem:[#allocation2 + $0x42] sm:$0x1f]  ;;  %v14509_v20 = vld [vmem:[#allocation2 + $0xb4] sm:$0x1f] }
 0x203   :  { %v7498_v42 = vrot.slane %v7490_v58, %v13360_v39  ;;  %v7505_v52 = vrot.slane %v7491_v5, %v13360_v39  ;;  %v4696_v35 = vrot.slane %v4682_v53, %v13360_v39  ;;  %v4721_v62 = vcombine.high %v14065_v56, %v14065_v56 }
 0x204   :  { %v6478_v51 = vrot.slane %v6468_v21, %v13360_v39  ;;  %v6471_v9 = vcombine.low %v3109_v10, %v14488_v59  ;;  %v6485_v61 = vrot.slane %v6469_v43, %v13360_v39  ;;  %v6492_v47 = vrot.slane %v12674_v31, %v13360_v39  ;;  %v14511_v21 = vld [vmem:[#allocation2 + $0xb4] sm:$0x1f] }
 0x205   :  { %v4728_v1 = vrot.slane %v14065_v56, %v13360_v39  ;;  %v7506_v37 = vcombine.low %v7498_v42, %v7505_v52  ;;  %v4711_v57 = vrot.slane %v4696_v35, %v13360_v39  ;;  %v4735_v16 = vrot.slane %v4721_v62, %v13360_v39  ;;  %9039 = vst.msk [vmem:[#allocation2 + $0xb8] sm:$0x1] %vm1013_vm4, %v16865_v55 }
 0x206   :  { %v14505_v13 = vrot.slane %v13945_v29, %v13360_v39  ;;  %v6499_v28 = vrot.slane %v6471_v9, %v13360_v39  ;;  %v6500_v0 = vcombine.low %v6478_v51, %v6485_v61  ;;  %v3451_v53 = vcombine.high %v14071_v7, %v14071_v7  ;;  %12233 = vst.msk [vmem:[#allocation2 + $0xb8] sm:$0x1] %vm1013_vm4, %v16865_v55 }
 0x207   :  { %v4736_v10 = vcombine.high %v4728_v1, %v4728_v1  ;;  %v4743_v3 = vrot.slane %v4728_v1, %v13360_v39  ;;  %7720 = vrot.lane.b32.xlu1 %v7506_v37, %s13041_s16  ;;  %v4750_v56 = vrot.slane %v4735_v16, %v13360_v39  ;;  %v7788_v5 = vcombine.low %v4720_v19, %v4711_v57 }
 0x208   :  { %v14517_v58 = vrot.slane %v14505_v13, %v13360_v39  ;;  %v6501_v43 = vcombine.low %v6492_v47, %v6499_v28  ;;  %v6508_v31 = vrot.slane %v6500_v0, %v13360_v39  ;;  %v3489_v42 = vcombine.high %v14179_v40, %v14179_v40 }
 0x209   :  { %v4757_v51 = vrot.slane %v4736_v10, %v13360_v39  ;;  %v7798_v19 = vrot.slane %v7788_v5, %v13360_v39  ;;  %v3465_v7 = vrot.slane %v3451_v53, %v13360_v39  ;;  %v3490_v35 = vcombine.high %v3394_v11, %v3394_v11 }
 0x20a   :  { %v7791_v52 = vcombine.low %v4750_v56, %v14517_v58  ;;  %v6515_v62 = vrot.slane %v6501_v43, %v13360_v39  ;;  %v3497_v47 = vrot.slane %v3394_v11, %v13360_v39  ;;  %v14539_v57 = vrot.slane %v13899_v27, %v13360_v39 }
 0x20b   :  { %v7789_v9 = vcombine.low %v4743_v3, %v4757_v51  ;;  %v12694_v61 = vcombine.high %v4743_v3, %v4757_v51  ;;  %v3480_v40 = vrot.slane %v3465_v7, %v13360_v39  ;;  %v3504_v37 = vrot.slane %v3490_v35, %v13360_v39 }
 0x20c   :  { %v7819_v1 = vrot.slane %v7791_v52, %v13360_v39  ;;  %v6516_v16 = vcombine.low %v6508_v31, %v6515_v62  ;;  %v3505_v10 = vcombine.high %v3497_v47, %v3497_v47  ;;  %v3512_v3 = vrot.slane %v3497_v47, %v13360_v39 }
 0x20d   :  { %v7805_v28 = vrot.slane %v7789_v9, %v13360_v39  ;;  %v7812_v0 = vrot.slane %v12694_v61, %v13360_v39  ;;  %v3519_v11 = vrot.slane %v3504_v37, %v13360_v39  ;;  %v14547_v56 = vrot.slane %v14539_v57, %v13360_v39 }
 0x20e   :  { %v6798_v5 = vcombine.low %v3489_v42, %v3480_v40  ;;  %6730 = vrot.lane.b32.xlu0 %v6516_v16, %s13038_s13  ;;  %v3526_v31 = vrot.slane %v3505_v10, %v13360_v39  ;;  %v5092_v51 = vcombine.high %v13889_v14, %v13889_v14  ;;  %v5130_v35 = vcombine.high %v14334_v32, %v14334_v32 }
 0x20f   :  { %v7820_v53 = vcombine.low %v7798_v19, %v7805_v28  ;;  %v7821_v43 = vcombine.low %v7812_v0, %v7819_v1  ;;  %v6801_v52 = vcombine.low %v3519_v11, %v14547_v56  ;;  %v5131_v62 = vcombine.high %v13921_v63, %v13921_v63 }
 0x210   :  { %v6808_v7 = vrot.slane %v6798_v5, %v13360_v39  ;;  %v6799_v9 = vcombine.low %v3512_v3, %v3526_v31  ;;  %v12679_v61 = vcombine.high %v3512_v3, %v3526_v31  ;;  %v5106_v14 = vrot.slane %v5092_v51, %v13360_v39 }
 0x211   :  { %v7828_v42 = vrot.slane %v7820_v53, %v13360_v39  ;;  %v7835_v19 = vrot.slane %v7821_v43, %v13360_v39  ;;  %v6829_v47 = vrot.slane %v6801_v52, %v13360_v39  ;;  %v5138_v1 = vrot.slane %v13921_v63, %v13360_v39  ;;  %v14583_v52 = vld [vmem:[#allocation2 + $0x42] sm:$0x1f] }
 0x212   :  { %v5145_v40 = vrot.slane %v5131_v62, %v13360_v39  ;;  %v6815_v32 = vrot.slane %v6799_v9, %v13360_v39  ;;  %v6822_v16 = vrot.slane %v12679_v61, %v13360_v39  ;;  %v14570_v28 = vrot.slane %v13947_v46, %v13360_v39 }
 0x213   :  { %v7836_v37 = vcombine.low %v7828_v42, %v7835_v19  ;;  %v5121_v0 = vrot.slane %v5106_v14, %v13360_v39  ;;  %v5146_v10 = vcombine.high %v5138_v1, %v5138_v1  ;;  %v5153_v3 = vrot.slane %v5138_v1, %v13360_v39 }
 0x214   :  { %v5160_v11 = vrot.slane %v5145_v40, %v13360_v39  ;;  %v6830_v63 = vcombine.low %v6808_v7, %v6815_v32  ;;  %v6831_v5 = vcombine.low %v6822_v16, %v6829_v47  ;;  %v14578_v53 = vrot.slane %v14570_v28, %v13360_v39 }
 0x215   :  { %8050 = vrot.lane.b32.xlu1 %v7836_v37, %s13042_s17  ;;  %v2298_v43 = vcombine.high %v14336_v6, %v14336_v6  ;;  %v5167_v31 = vrot.slane %v5146_v10, %v13360_v39  ;;  %v8118_v51 = vcombine.low %v5130_v35, %v5121_v0  ;;  %v2313_v62 = vcombine.high %v14349_v12, %v14349_v12 }
 0x216   :  { %v2335_v42 = vcombine.high %v14357_v23, %v14357_v23  ;;  %v6838_v7 = vrot.slane %v6830_v63, %v13360_v39  ;;  %v6845_v19 = vrot.slane %v6831_v5, %v13360_v39  ;;  %v8121_v9 = vcombine.low %v5160_v11, %v14578_v53 }
 0x217   :  { %v2312_v61 = vrot.slane %v2298_v43, %v13360_v39  ;;  %v8119_v6 = vcombine.low %v5153_v3, %v5167_v31  ;;  %v12699_v47 = vcombine.high %v5153_v3, %v5167_v31  ;;  %v8128_v35 = vrot.slane %v8118_v51, %v13360_v39 }
 0x218   :  { %v2334_v14 = vrot.slane %v2313_v62, %v13360_v39  ;;  %v6846_v1 = vcombine.low %v6838_v7, %v6845_v19  ;;  %v8149_v12 = vrot.slane %v8121_v9, %v13360_v39  ;;  %v2344_v23 = vrot.slane %v14583_v52, %v13360_v39 }
 0x219   :  { %v2327_v40 = vrot.slane %v2312_v61, %v13360_v39  ;;  %v8135_v37 = vrot.slane %v8119_v6, %v13360_v39  ;;  %v8142_v32 = vrot.slane %v12699_v47, %v13360_v39  ;;  %v3939_v11 = vcombine.high %v13895_v25, %v13895_v25 }
 0x21a   :  { %v2336_v16 = vcombine.high %v2334_v14, %v2334_v14  ;;  %v5857_v0 = vcombine.low %v2334_v14, %v2335_v42  ;;  %7060 = vrot.lane.b32.xlu0 %v6846_v1, %s13039_s14  ;;  %v2352_v10 = vcombine.high %v2344_v23, %v2344_v23  ;;  %v2359_v3 = vrot.slane %v2344_v23, %v13360_v39 }
 0x21b   :  { %v3954_v63 = vcombine.high %v14373_v22, %v14373_v22  ;;  %v8150_v5 = vcombine.low %v8128_v35, %v8135_v37  ;;  %v8151_v43 = vcombine.low %v8142_v32, %v8149_v12  ;;  %v3953_v42 = vrot.slane %v3939_v11, %v13360_v39 }
 0x21c   :  { %v5858_v31 = vcombine.low %v2336_v16, %v2327_v40  ;;  %v5867_v51 = vrot.slane %v5857_v0, %v13360_v39  ;;  %v2373_v62 = vrot.slane %v2352_v10, %v13360_v39  ;;  %v3976_v19 = vcombine.high %v14387_v33, %v14387_v33 }
 0x21d   :  { %v3975_v7 = vrot.slane %v3954_v63, %v13360_v39  ;;  %v8158_v9 = vrot.slane %v8150_v5, %v13360_v39  ;;  %v8165_v25 = vrot.slane %v8151_v43, %v13360_v39  ;;  %v3985_v61 = vrot.slane %v13923_v49, %v13360_v39 }
 0x21e   :  { %v5874_v22 = vrot.slane %v5858_v31, %v13360_v39  ;;  %v5859_v6 = vcombine.low %v2359_v3, %v2373_v62  ;;  %v12665_v47 = vcombine.high %v2359_v3, %v2373_v62  ;;  %v3968_v35 = vrot.slane %v3953_v42, %v13360_v39 }
 0x21f   :  { %v3977_v14 = vcombine.high %v3975_v7, %v3975_v7  ;;  %v8166_v1 = vcombine.low %v8158_v9, %v8165_v25  ;;  %v3993_v40 = vcombine.high %v3985_v61, %v3985_v61  ;;  %v4000_v23 = vrot.slane %v3985_v61, %v13360_v39 }
 0x220   :  { %v5889_v12 = vcombine.low %v5867_v51, %v5874_v22  ;;  %v5881_v33 = vrot.slane %v5859_v6, %v13360_v39  ;;  %v5888_v37 = vrot.slane %v12665_v47, %v13360_v39  ;;  %v7177_v32 = vcombine.low %v3975_v7, %v3976_v19 }
 0x221   :  { %v7178_v16 = vcombine.low %v3977_v14, %v3968_v35  ;;  %8380 = vrot.lane.b32.xlu1 %v8166_v1, %s13043_s18  ;;  %v4014_v10 = vrot.slane %v3993_v40, %v13360_v39  ;;  %v2708_v3 = vcombine.high %v14087_v36, %v14087_v36  ;;  %v2723_v11 = vcombine.high %v14410_v34, %v14410_v34 }
 0x222   :  { %v5897_v0 = vrot.slane %v5889_v12, %v13360_v39  ;;  %v5890_v63 = vcombine.low %v5881_v33, %v5888_v37  ;;  %v7187_v5 = vrot.slane %v7177_v32, %v13360_v39  ;;  %v2745_v31 = vcombine.high %v14419_v18, %v14419_v18 }
 0x223   :  { %v7194_v43 = vrot.slane %v7178_v16, %v13360_v39  ;;  %v7179_v51 = vcombine.low %v4000_v23, %v4014_v10  ;;  %v12685_v62 = vcombine.high %v4000_v23, %v4014_v10  ;;  %v2722_v42 = vrot.slane %v2708_v3, %v13360_v39 }
 0x224   :  { %v2744_v7 = vrot.slane %v2723_v11, %v13360_v39  ;;  %v5904_v19 = vrot.slane %v5890_v63, %v13360_v39  ;;  %v2754_v34 = vrot.slane %v13877_v50, %v13360_v39  ;;  %v4350_v9 = vcombine.high %v13943_v38, %v13943_v38 }
 0x225   :  { %v7209_v36 = vcombine.low %v7187_v5, %v7194_v43  ;;  %v7201_v25 = vrot.slane %v7179_v51, %v13360_v39  ;;  %v7208_v22 = vrot.slane %v12685_v62, %v13360_v39  ;;  %v2737_v18 = vrot.slane %v2722_v42, %v13360_v39 }
 0x226   :  { %v2746_v61 = vcombine.high %v2744_v7, %v2744_v7  ;;  %v5905_v6 = vcombine.low %v5897_v0, %v5904_v19  ;;  %v2762_v35 = vcombine.high %v2754_v34, %v2754_v34  ;;  %v2769_v14 = vrot.slane %v2754_v34, %v13360_v39 }
 0x227   :  { %v7217_v47 = vrot.slane %v7209_v36, %v13360_v39  ;;  %v7210_v1 = vcombine.low %v7201_v25, %v7208_v22  ;;  %v6187_v12 = vcombine.low %v2744_v7, %v2745_v31  ;;  %v4364_v23 = vrot.slane %v4350_v9, %v13360_v39 }
 0x228   :  { %v6188_v40 = vcombine.low %v2746_v61, %v2737_v18  ;;  %6072 = vrot.lane.b32.xlu0 %v5905_v6, %s13036_s11  ;;  %v2783_v38 = vrot.slane %v2762_v35, %v13360_v39  ;;  %v4365_v33 = vcombine.high %v14436_v2, %v14436_v2  ;;  %v4387_v37 = vcombine.high %v14444_v45, %v14444_v45 }
 0x229   :  { %v4396_v32 = vrot.slane %v14115_v15, %v13360_v39  ;;  %v7224_v16 = vrot.slane %v7210_v1, %v13360_v39  ;;  %v6197_v0 = vrot.slane %v6187_v12, %v13360_v39  ;;  %v4379_v3 = vrot.slane %v4364_v23, %v13360_v39 }
 0x22a   :  { %v6204_v10 = vrot.slane %v6188_v40, %v13360_v39  ;;  %v6189_v11 = vcombine.low %v2769_v14, %v2783_v38  ;;  %v12670_v63 = vcombine.high %v2769_v14, %v2783_v38  ;;  %v4386_v5 = vrot.slane %v4365_v33, %v13360_v39 }
 0x22b   :  { %v4404_v43 = vcombine.high %v4396_v32, %v4396_v32  ;;  %v7225_v2 = vcombine.low %v7217_v47, %v7224_v16  ;;  %v4411_v45 = vrot.slane %v4396_v32, %v13360_v39  ;;  %v3119_v51 = vcombine.high %v13897_v30, %v13897_v30 }
 0x22c   :  { %v6219_v31 = vcombine.low %v6197_v0, %v6204_v10  ;;  %v6211_v62 = vrot.slane %v6189_v11, %v13360_v39  ;;  %v6218_v42 = vrot.slane %v12670_v63, %v13360_v39  ;;  %v4388_v7 = vcombine.high %v4386_v5, %v4386_v5 }
 0x22d   :  { %v4425_v19 = vrot.slane %v4404_v43, %v13360_v39  ;;  %7392 = vrot.lane.b32.xlu1 %v7225_v2, %s13040_s15  ;;  %v7507_v34 = vcombine.low %v4386_v5, %v4387_v37  ;;  %v3133_v9 = vrot.slane %v3119_v51, %v13360_v39  ;;  %v3134_v25 = vcombine.high %v14472_v17, %v14472_v17 }
 0x22e   :  { %v6227_v36 = vrot.slane %v6219_v31, %v13360_v39  ;;  %v6220_v22 = vcombine.low %v6211_v62, %v6218_v42  ;;  %v7508_v18 = vcombine.low %v4388_v7, %v4379_v3  ;;  %v3156_v14 = vcombine.high %v14488_v59, %v14488_v59  ;;  %v14698_v62 = vld [vmem:[#allocation2 + $0xc4] sm:$0x1f] }
 0x22f   :  { %v7509_v30 = vcombine.low %v4411_v45, %v4425_v19  ;;  %v12690_v61 = vcombine.high %v4411_v45, %v4425_v19  ;;  %v7517_v6 = vrot.slane %v7507_v34, %v13360_v39  ;;  %v3148_v47 = vrot.slane %v3133_v9, %v13360_v39  ;;  %v14700_v42 = vld [vmem:[#allocation2 + $0xc4] sm:$0x1f]  ;;  %v14705_v9 = vld [vmem:[#allocation2 + $0xf0] sm:$0x1f] }
 0x230   :  { %v3155_v35 = vrot.slane %v3134_v25, %v13360_v39  ;;  %v6234_v1 = vrot.slane %v6220_v22, %v13360_v39  ;;  %v7524_v12 = vrot.slane %v7508_v18, %v13360_v39  ;;  %v3165_v38 = vrot.slane %v14089_v44, %v13360_v39  ;;  %9041 = vst.msk [vmem:[#allocation2 + $0xc8] sm:$0x1] %vm1013_vm4, %v16865_v55 }
 0x231   :  { %v7531_v40 = vrot.slane %v7509_v30, %v13360_v39  ;;  %v7538_v17 = vrot.slane %v12690_v61, %v13360_v39  ;;  %v4760_v37 = vcombine.high %v13945_v29, %v13945_v29  ;;  %v4775_v59 = vcombine.high %v14505_v13, %v14505_v13  ;;  %v14709_v30 = vld [vmem:[#allocation2 + $0xf2] sm:$0x1f]  ;;  %12235 = vst.msk [vmem:[#allocation2 + $0xc8] sm:$0x1] %vm1013_vm4, %v16865_v55 }
 0x232   :  { %v3157_v23 = vcombine.high %v3155_v35, %v3155_v35  ;;  %v6517_v33 = vcombine.low %v3155_v35, %v3156_v14  ;;  %v6235_v32 = vcombine.low %v6227_v36, %v6234_v1  ;;  %v7539_v16 = vcombine.low %v7517_v6, %v7524_v12  ;;  %v14711_v61 = vld [vmem:[#allocation2 + $0xf4] sm:$0x1f] }
 0x233   :  { %v7540_v0 = vcombine.low %v7531_v40, %v7538_v17  ;;  %v3173_v10 = vcombine.high %v3165_v38, %v3165_v38  ;;  %v3180_v3 = vrot.slane %v3165_v38, %v13360_v39  ;;  %v4774_v29 = vrot.slane %v4760_v37, %v13360_v39  ;;  %v14715_v6 = vld [vmem:[#allocation2 + $0xf4] sm:$0x1f]  ;;  %v14730_v38 = vld [vmem:[#allocation2 + $0xe4] sm:$0x1f] }
 0x234   :  { %v6518_v11 = vcombine.low %v3157_v23, %v3148_v47  ;;  %v6527_v63 = vrot.slane %v6517_v33, %v13360_v39  ;;  %6402 = vrot.lane.b32.xlu0 %v6235_v32, %s13037_s12  ;;  %v7547_v5 = vrot.slane %v7539_v16, %v13360_v39  ;;  %v4796_v2 = vrot.slane %v4775_v59, %v13360_v39  ;;  %v14728_v23 = vld [vmem:[#allocation2 + $0xe4] sm:$0x1f] }
 0x235   :  { %v7554_v43 = vrot.slane %v7540_v0, %v13360_v39  ;;  %v3194_v31 = vrot.slane %v3173_v10, %v13360_v39  ;;  %v4797_v45 = vcombine.high %v14517_v58, %v14517_v58  ;;  %v4806_v51 = vrot.slane %v14117_v60, %v13360_v39  ;;  %9047 = vst.msk [vmem:[#allocation2 + $0xf8] sm:$0x1] %vm1013_vm4, %v16865_v55 }
 0x236   :  { %v6534_v13 = vrot.slane %v6518_v11, %v13360_v39  ;;  %v4789_v19 = vrot.slane %v4774_v29, %v13360_v39  ;;  %v4798_v36 = vcombine.high %v4796_v2, %v4796_v2  ;;  %v3529_v34 = vcombine.high %v13899_v27, %v13899_v27  ;;  %9046 = vst.msk [vmem:[#allocation2 + $0xf0] sm:$0xff] %vm234_vm2, %v16865_v55 }
 0x237   :  { %v7555_v7 = vcombine.low %v7547_v5, %v7554_v43  ;;  %v6519_v58 = vcombine.low %v3180_v3, %v3194_v31  ;;  %v12675_v25 = vcombine.high %v3180_v3, %v3194_v31  ;;  %v4814_v18 = vcombine.high %v4806_v51, %v4806_v51  ;;  %12241 = vst.msk [vmem:[#allocation2 + $0xf8] sm:$0x1] %vm1013_vm4, %v16865_v55 }
 0x238   :  { %v6549_v22 = vcombine.low %v6527_v63, %v6534_v13  ;;  %v4821_v27 = vrot.slane %v4806_v51, %v13360_v39  ;;  %v7837_v47 = vcombine.low %v4796_v2, %v4797_v45  ;;  %v7838_v35 = vcombine.low %v4798_v36, %v4789_v19  ;;  %9045 = vst.msk [vmem:[#allocation2 + $0xe8] sm:$0x1] %vm1013_vm4, %v16865_v55 }
 0x239   :  { %7722 = vrot.lane.b32.xlu1 %v7555_v7, %s13041_s16  ;;  %v3543_v14 = vrot.slane %v3529_v34, %v13360_v39  ;;  %v6541_v1 = vrot.slane %v6519_v58, %v13360_v39  ;;  %v6548_v12 = vrot.slane %v12675_v25, %v13360_v39  ;;  %v4835_v17 = vrot.slane %v4814_v18, %v13360_v39 }
 0x23a   :  { %v6557_v40 = vrot.slane %v6549_v22, %v13360_v39  ;;  %v7847_v33 = vrot.slane %v7837_v47, %v13360_v39  ;;  %v7854_v37 = vrot.slane %v7838_v35, %v13360_v39  ;;  %v3544_v32 = vcombine.high %v14539_v57, %v14539_v57  ;;  %12239 = vst.msk [vmem:[#allocation2 + $0xe8] sm:$0x1] %vm1013_vm4, %v16865_v55  ;;  %v16902_v47 = vld [vmem:[#allocation11_spill] sm:$0xff] }
 0x23b   :  { %v3558_v16 = vrot.slane %v3543_v14, %v13360_v39  ;;  %v6550_v0 = vcombine.low %v6541_v1, %v6548_v12  ;;  %v7839_v59 = vcombine.low %v4821_v27, %v4835_v17  ;;  %v12695_v10 = vcombine.high %v4821_v27, %v4835_v17 }
 0x23c   :  { %v3566_v3 = vcombine.high %v14547_v56, %v14547_v56  ;;  %v7869_v11 = vcombine.low %v7847_v33, %v7854_v37  ;;  %v3565_v63 = vrot.slane %v3544_v32, %v13360_v39  ;;  %v3575_v57 = vrot.slane %v14091_v26, %v13360_v39  ;;  %v2166_v32 = vld [vmem:[#allocation2 + $0x92] sm:$0x1f] }
 0x23d   :  { %v5170_v5 = vcombine.high %v13947_v46, %v13947_v46  ;;  %v6564_v43 = vrot.slane %v6550_v0, %v13360_v39  ;;  %v7861_v29 = vrot.slane %v7839_v59, %v13360_v39  ;;  %v7868_v2 = vrot.slane %v12695_v10, %v13360_v39 }
 0x23e   :  { %v5185_v56 = vcombine.high %v14570_v28, %v14570_v28  ;;  %v7877_v31 = vrot.slane %v7869_v11, %v13360_v39  ;;  %v3567_v13 = vcombine.high %v3565_v63, %v3565_v63  ;;  %v3583_v45 = vcombine.high %v3575_v57, %v3575_v57 }
 0x23f   :  { %v3590_v51 = vrot.slane %v3575_v57, %v13360_v39  ;;  %v6565_v7 = vcombine.low %v6557_v40, %v6564_v43  ;;  %v7870_v19 = vcombine.low %v7861_v29, %v7868_v2  ;;  %v6847_v36 = vcombine.low %v3565_v63, %v3566_v3 }
 0x240   :  { %v5184_v46 = vrot.slane %v5170_v5, %v13360_v39  ;;  %v3604_v34 = vrot.slane %v3583_v45, %v13360_v39  ;;  %v6848_v58 = vcombine.low %v3567_v13, %v3558_v16  ;;  %v5206_v25 = vrot.slane %v5185_v56, %v13360_v39 }
 0x241   :  { %v5207_v22 = vcombine.high %v14578_v53, %v14578_v53  ;;  %6732 = vrot.lane.b32.xlu0 %v6565_v7, %s13038_s13  ;;  %v7884_v28 = vrot.slane %v7870_v19, %v13360_v39  ;;  %v6857_v18 = vrot.slane %v6847_v36, %v13360_v39  ;;  %v5216_v35 = vrot.slane %v16902_v47, %v13360_v39  ;;  %v14783_v19 = vld [vmem:[#allocation2 + $0xa2] sm:$0x1f] }
 0x242   :  { %v5199_v27 = vrot.slane %v5184_v46, %v13360_v39  ;;  %v6849_v14 = vcombine.low %v3590_v51, %v3604_v34  ;;  %v12680_v1 = vcombine.high %v3590_v51, %v3604_v34  ;;  %v6864_v12 = vrot.slane %v6848_v58, %v13360_v39  ;;  %v14786_v46 = vld [vmem:[#allocation2 + $0xe0] sm:$0x1f] }
 0x243   :  { %v5208_v40 = vcombine.high %v5206_v25, %v5206_v25  ;;  %v7885_v17 = vcombine.low %v7877_v31, %v7884_v28  ;;  %v5224_v33 = vcombine.high %v5216_v35, %v5216_v35  ;;  %v5231_v53 = vrot.slane %v5216_v35, %v13360_v39  ;;  %v14792_v28 = vld [vmem:[#allocation2 + $0xe2] sm:$0x1f] }
 0x244   :  { %v8167_v37 = vcombine.low %v5206_v25, %v5207_v22  ;;  %v6871_v16 = vrot.slane %v6849_v14, %v13360_v39  ;;  %v6878_v0 = vrot.slane %v12680_v1, %v13360_v39  ;;  %v6879_v59 = vcombine.low %v6857_v18, %v6864_v12  ;;  %v14794_v18 = vld [vmem:[#allocation2 + $0xe0] sm:$0x1f] }
 0x245   :  { %v8168_v10 = vcombine.low %v5208_v40, %v5199_v27  ;;  %8052 = vrot.lane.b32.xlu1 %v7885_v17, %s13042_s17  ;;  %v5245_v3 = vrot.slane %v5224_v33, %v13360_v39  ;;  %v2337_v63 = vcombine.high %v14583_v52, %v14583_v52  ;;  %v2376_v57 = vcombine.high %v2166_v32, %v2166_v32  ;;  %v14796_v27 = vld [vmem:[#allocation2 + $0xe2] sm:$0x1f] }
 0x246   :  { %v8177_v11 = vrot.slane %v8167_v37, %v13360_v39  ;;  %v6880_v5 = vcombine.low %v6871_v16, %v6878_v0  ;;  %v6887_v43 = vrot.slane %v6879_v59, %v13360_v39  ;;  %v2383_v2 = vrot.slane %v2166_v32, %v13360_v39  ;;  %9044 = vst.msk [vmem:[#allocation2 + $0xe0] sm:$0xff] %vm234_vm2, %v16865_v55 }
 0x247   :  { %v8184_v29 = vrot.slane %v8168_v10, %v13360_v39  ;;  %v8169_v56 = vcombine.low %v5231_v53, %v5245_v3  ;;  %v12700_v31 = vcombine.high %v5231_v53, %v5245_v3  ;;  %v2351_v13 = vrot.slane %v2337_v63, %v13360_v39 }
 0x248   :  { %v2390_v45 = vrot.slane %v2376_v57, %v13360_v39  ;;  %v6894_v51 = vrot.slane %v6880_v5, %v13360_v39  ;;  %v2391_v52 = vcombine.high %v2383_v2, %v2383_v2  ;;  %v2398_v36 = vrot.slane %v2383_v2, %v13360_v39 }
 0x249   :  { %v8199_v7 = vcombine.low %v8177_v11, %v8184_v29  ;;  %v8191_v34 = vrot.slane %v8169_v56, %v13360_v39  ;;  %v8198_v58 = vrot.slane %v12700_v31, %v13360_v39  ;;  %v2366_v25 = vrot.slane %v2351_v13, %v13360_v39 }
 0x24a   :  { %v2405_v22 = vrot.slane %v2390_v45, %v13360_v39  ;;  %v6895_v35 = vcombine.low %v6887_v43, %v6894_v51  ;;  %v2412_v1 = vrot.slane %v2391_v52, %v13360_v39  ;;  %v2413_v12 = vcombine.high %v2398_v36, %v2398_v36 }
 0x24b   :  { %v8207_v14 = vrot.slane %v8199_v7, %v13360_v39  ;;  %v8200_v40 = vcombine.low %v8191_v34, %v8198_v58  ;;  %v2422_v17 = vrot.slane %v14783_v19, %v13360_v39  ;;  %v5906_v33 = vcombine.low %v2366_v25, %v2398_v36 }
 0x24c   :  { %v3978_v53 = vcombine.high %v13923_v49, %v13923_v49  ;;  %7062 = vrot.lane.b32.xlu0 %v6895_v35, %s13039_s14  ;;  %v2414_v37 = vcombine.high %v2412_v1, %v2412_v1  ;;  %v5907_v32 = vcombine.low %v2412_v1, %v2413_v12  ;;  %v4017_v16 = vcombine.high %v14509_v20, %v14509_v20 }
 0x24d   :  { %v4024_v0 = vrot.slane %v14509_v20, %v13360_v39  ;;  %v8214_v59 = vrot.slane %v8200_v40, %v13360_v39  ;;  %v2430_v10 = vcombine.high %v2422_v17, %v2422_v17  ;;  %v14813_v3 = vrot.slane %v2422_v17, %v13360_v39 }
 0x24e   :  { %v5916_v11 = vrot.slane %v5906_v33, %v13360_v39  ;;  %v5908_v63 = vcombine.low %v2414_v37, %v2405_v22  ;;  %v5923_v49 = vrot.slane %v5907_v32, %v13360_v39  ;;  %v3992_v57 = vrot.slane %v3978_v53, %v13360_v39 }
 0x24f   :  { %v4031_v5 = vrot.slane %v4017_v16, %v13360_v39  ;;  %v8215_v43 = vcombine.low %v8207_v14, %v8214_v59  ;;  %v14820_v29 = vrot.slane %v2430_v10, %v13360_v39  ;;  %v4032_v20 = vcombine.high %v4024_v0, %v4024_v0 }
 0x250   :  { %v4039_v2 = vrot.slane %v4024_v0, %v13360_v39  ;;  %v5930_v56 = vrot.slane %v5908_v63, %v13360_v39  ;;  %v5938_v31 = vcombine.low %v5916_v11, %v5923_v49  ;;  %v4007_v13 = vrot.slane %v3992_v57, %v13360_v39 }
 0x251   :  { %v4046_v45 = vrot.slane %v4031_v5, %v13360_v39  ;;  %8382 = vrot.lane.b32.xlu1 %v8215_v43, %s13043_s18  ;;  %v5909_v51 = vcombine.low %v14813_v3, %v14820_v29  ;;  %v4053_v7 = vrot.slane %v4032_v20, %v13360_v39  ;;  %v4063_v36 = vrot.slane %v14698_v62, %v13360_v39 }
 0x252   :  { %v4054_v52 = vcombine.high %v4039_v2, %v4039_v2  ;;  %v5946_v34 = vrot.slane %v5938_v31, %v13360_v39  ;;  %v7226_v58 = vcombine.low %v4007_v13, %v4039_v2  ;;  %v2747_v25 = vcombine.high %v13877_v50, %v13877_v50 }
 0x253   :  { %v2786_v22 = vcombine.high %v14233_v41, %v14233_v41  ;;  %v5937_v35 = vrot.slane %v5909_v51, %v13360_v39  ;;  %v4055_v14 = vcombine.high %v4053_v7, %v4053_v7  ;;  %v4071_v1 = vcombine.high %v4063_v36, %v4063_v36 }
 0x254   :  { %v14839_v12 = vrot.slane %v4063_v36, %v13360_v39  ;;  %v7227_v40 = vcombine.low %v4053_v7, %v4054_v52  ;;  %v7236_v17 = vrot.slane %v7226_v58, %v13360_v39  ;;  %v2761_v33 = vrot.slane %v2747_v25, %v13360_v39  ;;  %v14867_v25 = vld [vmem:[#allocation2 + $0xd2] sm:$0x1f] }
 0x255   :  { %v2793_v53 = vrot.slane %v14233_v41, %v13360_v39  ;;  %v5939_v37 = vcombine.low %v5930_v56, %v5937_v35  ;;  %v14846_v50 = vrot.slane %v4071_v1, %v13360_v39  ;;  %v7228_v32 = vcombine.low %v4055_v14, %v4046_v45  ;;  %v4218_v45 = vld [vmem:[#allocation2 + $0xd0] sm:$0x1f]  ;;  %v14871_v35 = vld [vmem:[#allocation2 + $0x100] sm:$0x1f] }
 0x256   :  { %v2800_v16 = vrot.slane %v2786_v22, %v13360_v39  ;;  %v7243_v0 = vrot.slane %v7227_v40, %v13360_v39  ;;  %v2776_v59 = vrot.slane %v2761_v33, %v13360_v39  ;;  %v2832_v2 = vrot.slane %v14245_v48, %v13360_v39  ;;  %v14869_v22 = vld [vmem:[#allocation2 + $0x110] sm:$0x1f]  ;;  %v14880_v33 = vld [vmem:[#allocation2 + $0x104] sm:$0x1f] }
 0x257   :  { %v2801_v10 = vcombine.high %v2793_v53, %v2793_v53  ;;  %v2808_v11 = vrot.slane %v2793_v53, %v13360_v39  ;;  %v5953_v63 = vrot.slane %v5939_v37, %v13360_v39  ;;  %v7229_v49 = vcombine.low %v14839_v12, %v14846_v50  ;;  %16903 = vst [vmem:[#allocation8_spill] sm:$0xff] %v14880_v33  ;;  %v14882_v53 = vld [vmem:[#allocation2 + $0x114] sm:$0x1f] }
 0x258   :  { %v7250_v41 = vrot.slane %v7228_v32, %v13360_v39  ;;  %v2815_v57 = vrot.slane %v2800_v16, %v13360_v39  ;;  %v7258_v5 = vcombine.low %v7236_v17, %v7243_v0  ;;  %v4389_v51 = vcombine.high %v14115_v15, %v14115_v15  ;;  %v14878_v17 = vld [vmem:[#allocation2 + $0x112] sm:$0x1f]  ;;  %16904 = vst [vmem:[#allocation7_spill] sm:$0xff] %v14882_v53 }
 0x259   :  { %v2822_v43 = vrot.slane %v2801_v10, %v13360_v39  ;;  %v2823_v20 = vcombine.high %v2808_v11, %v2808_v11  ;;  %v5954_v56 = vcombine.low %v5946_v34, %v5953_v63  ;;  %v7257_v31 = vrot.slane %v7229_v49, %v13360_v39  ;;  %v14873_v34 = vld [vmem:[#allocation2 + $0x102] sm:$0x1f]  ;;  %v14890_v10 = vld [vmem:[#allocation2 + $0xd2] sm:$0x1f]  ;;  %9049 = vst.msk [vmem:[#allocation2 + $0x108] sm:$0x1] %vm1013_vm4, %v16865_v55 }
 0x25a   :  { %v6236_v13 = vcombine.low %v2776_v59, %v2808_v11  ;;  %v7266_v7 = vrot.slane %v7258_v5, %v13360_v39  ;;  %v2840_v36 = vcombine.high %v2832_v2, %v2832_v2  ;;  %v14865_v58 = vrot.slane %v2832_v2, %v13360_v39  ;;  %v14888_v59 = vld [vmem:[#allocation2 + $0xd0] sm:$0x1f]  ;;  %9048 = vst.msk [vmem:[#allocation2 + $0x100] sm:$0xff] %vm234_vm2, %v16865_v55 }
 0x25b   :  { %v2824_v52 = vcombine.high %v2822_v43, %v2822_v43  ;;  %6074 = vrot.lane.b32.xlu0 %v5954_v56, %s13036_s11  ;;  %v7259_v14 = vcombine.low %v7250_v41, %v7257_v31  ;;  %v6237_v1 = vcombine.low %v2822_v43, %v2823_v20  ;;  %v4403_v40 = vrot.slane %v4389_v51, %v13360_v39  ;;  %v14900_v11 = vld [vmem:[#allocation2 + $0xd0] sm:$0x1f] }
 0x25c   :  { %v6246_v15 = vrot.slane %v6236_v13, %v13360_v39  ;;  %v14885_v37 = vrot.slane %v2840_v36, %v13360_v39  ;;  %v4428_v16 = vcombine.high %v4218_v45, %v4218_v45  ;;  %v4435_v0 = vrot.slane %v4218_v45, %v13360_v39  ;;  %9050 = vst.msk [vmem:[#allocation2 + $0x110] sm:$0xff] %vm234_vm2, %v16865_v55  ;;  %v2987_v51 = vld [vmem:[#allocation2 + $0xb0] sm:$0x1f] }
 0x25d   :  { %v6238_v32 = vcombine.low %v2824_v52, %v2815_v57  ;;  %9051 = vst.msk [vmem:[#allocation2 + $0x118] sm:$0x1] %vm1013_vm4, %v16865_v55  ;;  %16905 = vst [vmem:[#allocation5_spill] sm:$0xff] %v14900_v11  ;;  %v7273_v63 = vrot.slane %v7259_v14, %v13360_v39  ;;  %v6253_v49 = vrot.slane %v6237_v1, %v13360_v39 }
 0x25e   :  { %v4418_v41 = vrot.slane %v4403_v40, %v13360_v39  ;;  %v4474_v57 = vrot.slane %v14786_v46, %v13360_v39  ;;  %12242 = vst.msk [vmem:[#allocation2 + $0x100] sm:$0xff] %vm234_vm2, %v16865_v55  ;;  %12244 = vst.msk [vmem:[#allocation2 + $0x110] sm:$0xff] %vm234_vm2, %v16865_v55  ;;  %v6239_v5 = vcombine.low %v14865_v58, %v14885_v37 }
 0x25f   :  { %12243 = vst.msk [vmem:[#allocation2 + $0x108] sm:$0x1] %vm1013_vm4, %v16865_v55  ;;  %12245 = vst.msk [vmem:[#allocation2 + $0x118] sm:$0x1] %vm1013_vm4, %v16865_v55  ;;  %v6260_v43 = vrot.slane %v6238_v32, %v13360_v39  ;;  %v4442_v20 = vrot.slane %v4428_v16, %v13360_v39  ;;  %v4443_v2 = vcombine.high %v4435_v0, %v4435_v0 }
 0x260   :  { %9042 = vst.msk [vmem:[#allocation2 + $0xd0] sm:$0xff] %vm234_vm2, %v16865_v55  ;;  %v7274_v56 = vcombine.low %v7266_v7, %v7273_v63  ;;  %v6268_v31 = vcombine.low %v6246_v15, %v6253_v49  ;;  %v4450_v13 = vrot.slane %v4435_v0, %v13360_v39  ;;  %v4482_v45 = vcombine.high %v4474_v57, %v4474_v57 }
 0x261   :  { %v6267_v52 = vrot.slane %v6239_v5, %v13360_v39  ;;  %v4457_v36 = vrot.slane %v4442_v20, %v13360_v39  ;;  %v4464_v14 = vrot.slane %v4443_v2, %v13360_v39  ;;  %v14926_v1 = vrot.slane %v4474_v57, %v13360_v39 }
 0x262   :  { %7394 = vrot.lane.b32.xlu1 %v7274_v56, %s13040_s15  ;;  %v6276_v40 = vrot.slane %v6268_v31, %v13360_v39  ;;  %v4465_v32 = vcombine.high %v4450_v13, %v4450_v13  ;;  %v14931_v7 = vrot.slane %v4482_v45, %v13360_v39  ;;  %v7556_v15 = vcombine.low %v4418_v41, %v4450_v13  ;;  %v14940_v45 = vld [vmem:[#allocation2 + $0xc0] sm:$0x1f] }
 0x263   :  { %v6269_v16 = vcombine.low %v6260_v43, %v6267_v52  ;;  %v4466_v0 = vcombine.high %v4464_v14, %v4464_v14  ;;  %v3158_v63 = vcombine.high %v14089_v44, %v14089_v44  ;;  %v3197_v49 = vcombine.high %v2987_v51, %v2987_v51  ;;  %v14944_v13 = vld [vmem:[#allocation2] sm:$0x1f] }
 0x264   :  { %v7557_v5 = vcombine.low %v4464_v14, %v4465_v32  ;;  %v7559_v57 = vcombine.low %v14926_v1, %v14931_v7  ;;  %v7566_v20 = vrot.slane %v7556_v15, %v13360_v39  ;;  %v3204_v2 = vrot.slane %v2987_v51, %v13360_v39  ;;  %16906 = vst [vmem:[#allocation11_spill] sm:$0xff] %v14944_v13  ;;  %v15002_v13 = vld [vmem:[#allocation2 + $0xc2] sm:$0x1f] }
 0x265   :  { %v6283_v56 = vrot.slane %v6269_v16, %v13360_v39  ;;  %v7558_v31 = vcombine.low %v4466_v0, %v4457_v36  ;;  %v3172_v41 = vrot.slane %v3158_v63, %v13360_v39  ;;  %v3211_v43 = vrot.slane %v3197_v49, %v13360_v39  ;;  %9016 = vst.msk [vmem:[#allocation2] sm:$0xff] %vm234_vm2, %v16865_v55 }
 0x266   :  { %v7573_v44 = vrot.slane %v7557_v5, %v13360_v39  ;;  %v7587_v52 = vrot.slane %v7559_v57, %v13360_v39  ;;  %v3212_v14 = vcombine.high %v3204_v2, %v3204_v2  ;;  %v3219_v32 = vrot.slane %v3204_v2, %v13360_v39 }
 0x267   :  { %v6284_v51 = vcombine.low %v6276_v40, %v6283_v56  ;;  %v7580_v36 = vrot.slane %v7558_v31, %v13360_v39  ;;  %v3187_v15 = vrot.slane %v3172_v41, %v13360_v39  ;;  %v3226_v16 = vrot.slane %v3211_v43, %v13360_v39 }
 0x268   :  { %v7588_v0 = vcombine.low %v7566_v20, %v7573_v44  ;;  %v3233_v63 = vrot.slane %v3212_v14, %v13360_v39  ;;  %v3234_v49 = vcombine.high %v3219_v32, %v3219_v32  ;;  %v3243_v5 = vrot.slane %v14940_v45, %v13360_v39 }
 0x269   :  { %6404 = vrot.lane.b32.xlu0 %v6284_v51, %s13037_s12  ;;  %v7589_v57 = vcombine.low %v7580_v36, %v7587_v52  ;;  %v6566_v2 = vcombine.low %v3187_v15, %v3219_v32  ;;  %v4799_v40 = vcombine.high %v14117_v60, %v14117_v60  ;;  %v4838_v56 = vcombine.high %v14867_v25, %v14867_v25 }
 0x26a   :  { %v7596_v31 = vrot.slane %v7588_v0, %v13360_v39  ;;  %v3235_v41 = vcombine.high %v3233_v63, %v3233_v63  ;;  %v3251_v20 = vcombine.high %v3243_v5, %v3243_v5  ;;  %v14964_v43 = vrot.slane %v3243_v5, %v13360_v39  ;;  %v14975_v0 = vld [vmem:[#allocation2 + $0x10] sm:$0x1f] }
 0x26b   :  { %v7603_v44 = vrot.slane %v7589_v57, %v13360_v39  ;;  %v6567_v14 = vcombine.low %v3233_v63, %v3234_v49  ;;  %v6576_v51 = vrot.slane %v6566_v2, %v13360_v39  ;;  %v4813_v52 = vrot.slane %v4799_v40, %v13360_v39  ;;  %16907 = vst [vmem:[#allocation15_spill] sm:$0xff] %v14975_v0  ;;  %v14977_v5 = vld [vmem:[#allocation2 + $0x30] sm:$0x1f] }
 0x26c   :  { %v14970_v32 = vrot.slane %v3251_v20, %v13360_v39  ;;  %v6568_v60 = vcombine.low %v3235_v41, %v3226_v16  ;;  %v4845_v36 = vrot.slane %v14867_v25, %v13360_v39  ;;  %v4852_v15 = vrot.slane %v4838_v56, %v13360_v39  ;;  %16908 = vst [vmem:[#allocation16_spill] sm:$0xff] %v14977_v5  ;;  %v3397_v56 = vld [vmem:[#allocation2 + $0xb2] sm:$0x1f] }
 0x26d   :  { %v7604_v11 = vcombine.low %v7596_v31, %v7603_v44  ;;  %v6583_v63 = vrot.slane %v6567_v14, %v13360_v39  ;;  %v4828_v49 = vrot.slane %v4813_v52, %v13360_v39  ;;  %v4884_v57 = vrot.slane %v14792_v28, %v13360_v39  ;;  %9018 = vst.msk [vmem:[#allocation2 + $0x10] sm:$0xff] %vm234_vm2, %v16865_v55 }
 0x26e   :  { %9022 = vst.msk [vmem:[#allocation2 + $0x30] sm:$0xff] %vm234_vm2, %v16865_v55  ;;  %v6569_v25 = vcombine.low %v14964_v43, %v14970_v32  ;;  %v6590_v16 = vrot.slane %v6568_v60, %v13360_v39  ;;  %v4853_v2 = vcombine.high %v4845_v36, %v4845_v36  ;;  %v4860_v40 = vrot.slane %v4845_v36, %v13360_v39 }
 0x26f   :  { %7724 = vrot.lane.b32.xlu1 %v7604_v11, %s13041_s16  ;;  %v6598_v31 = vcombine.low %v6576_v51, %v6583_v63  ;;  %v4867_v41 = vrot.slane %v4852_v15, %v13360_v39  ;;  %v4892_v20 = vcombine.high %v4884_v57, %v4884_v57  ;;  %v14994_v44 = vrot.slane %v4884_v57, %v13360_v39 }
 0x270   :  { %v6597_v14 = vrot.slane %v6569_v25, %v13360_v39  ;;  %v4874_v52 = vrot.slane %v4853_v2, %v13360_v39  ;;  %v4875_v5 = vcombine.high %v4860_v40, %v4860_v40  ;;  %v7886_v0 = vcombine.low %v4828_v49, %v4860_v40 }
 0x271   :  { %v6606_v60 = vrot.slane %v6598_v31, %v13360_v39  ;;  %v15000_v36 = vrot.slane %v4892_v20, %v13360_v39  ;;  %v3568_v11 = vcombine.high %v14091_v26, %v14091_v26  ;;  %v3607_v51 = vcombine.high %v3397_v56, %v3397_v56 }
 0x272   :  { %v6599_v15 = vcombine.low %v6590_v16, %v6597_v14  ;;  %v4876_v63 = vcombine.high %v4874_v52, %v4874_v52  ;;  %v7887_v57 = vcombine.low %v4874_v52, %v4875_v5  ;;  %v7896_v25 = vrot.slane %v7886_v0, %v13360_v39 }
 0x273   :  { %v7889_v2 = vcombine.low %v14994_v44, %v15000_v36  ;;  %v3582_v49 = vrot.slane %v3568_v11, %v13360_v39  ;;  %v3614_v40 = vrot.slane %v3397_v56, %v13360_v39  ;;  %v3621_v31 = vrot.slane %v3607_v51, %v13360_v39 }
 0x274   :  { %v6613_v20 = vrot.slane %v6599_v15, %v13360_v39  ;;  %v7888_v53 = vcombine.low %v4876_v63, %v4867_v41  ;;  %v7903_v26 = vrot.slane %v7887_v57, %v13360_v39  ;;  %v3653_v16 = vrot.slane %v15002_v13, %v13360_v39  ;;  %v15021_v15 = vld [vmem:[#allocation2 + $0x20] sm:$0x1f] }
 0x275   :  { %v7917_v5 = vrot.slane %v7889_v2, %v13360_v39  ;;  %v3597_v0 = vrot.slane %v3582_v49, %v13360_v39  ;;  %v3622_v14 = vcombine.high %v3614_v40, %v3614_v40  ;;  %v3629_v52 = vrot.slane %v3614_v40, %v13360_v39  ;;  %v15023_v41 = vld [vmem:[#allocation2 + $0x40] sm:$0x1f]  ;;  %9020 = vst.msk [vmem:[#allocation2 + $0x20] sm:$0xff] %vm234_vm2, %v16865_v55  ;;  %v15037_v40 = vld [vmem:[#allocation2 + $0x90] sm:$0x1f] }
 0x276   :  { %v6614_v11 = vcombine.low %v6606_v60, %v6613_v20  ;;  %v7910_v56 = vrot.slane %v7888_v53, %v13360_v39  ;;  %v7918_v33 = vcombine.low %v7896_v25, %v7903_v26  ;;  %v3636_v51 = vrot.slane %v3621_v31, %v13360_v39  ;;  %16909 = vst [vmem:[#allocation17_spill] sm:$0xff] %v15023_v41 }
 0x277   :  { %v3643_v63 = vrot.slane %v3622_v14, %v13360_v39  ;;  %v3644_v57 = vcombine.high %v3629_v52, %v3629_v52  ;;  %v3661_v54 = vcombine.high %v3653_v16, %v3653_v16  ;;  %v15027_v2 = vrot.slane %v3653_v16, %v13360_v39  ;;  %9024 = vst.msk [vmem:[#allocation2 + $0x40] sm:$0xff] %vm234_vm2, %v16865_v55  ;;  %v15051_v14 = vld [vmem:[#allocation2 + $0xa0] sm:$0x1f] }
 0x278   :  { %6734 = vrot.lane.b32.xlu0 %v6614_v11, %s13038_s13  ;;  %v7919_v53 = vcombine.low %v7910_v56, %v7917_v5  ;;  %v7926_v60 = vrot.slane %v7918_v33, %v13360_v39  ;;  %v6896_v25 = vcombine.low %v3597_v0, %v3629_v52  ;;  %v5209_v49 = vcombine.high %v16902_v47, %v16902_v47 }
 0x279   :  { %16910 = vst [vmem:[#allocation18_spill] sm:$0xff] %v15037_v40  ;;  %v3645_v31 = vcombine.high %v3643_v63, %v3643_v63  ;;  %v15040_v20 = vrot.slane %v3661_v54, %v13360_v39  ;;  %v6897_v26 = vcombine.low %v3643_v63, %v3644_v57  ;;  %v5248_v16 = vcombine.high %v14465_v4, %v14465_v4 }
 0x27a   :  { %9034 = vst.msk [vmem:[#allocation2 + $0x90] sm:$0xff] %vm234_vm2, %v16865_v55  ;;  %v7933_v5 = vrot.slane %v7919_v53, %v13360_v39  ;;  %v6906_v33 = vrot.slane %v6896_v25, %v13360_v39  ;;  %v5223_v0 = vrot.slane %v5209_v49, %v13360_v39  ;;  %v5255_v47 = vrot.slane %v14465_v4, %v13360_v39  ;;  %v2168_v4 = vld [vmem:[#allocation2 + $0xb2] sm:$0x1f] }
 0x27b   :  { %16911 = vst [vmem:[#allocation19_spill] sm:$0xff] %v15051_v14  ;;  %v6898_v54 = vcombine.low %v3645_v31, %v3636_v51  ;;  %v6899_v52 = vcombine.low %v15027_v2, %v15040_v20  ;;  %v6913_v11 = vrot.slane %v6897_v26, %v13360_v39  ;;  %v5262_v56 = vrot.slane %v5248_v16, %v13360_v39 }
 0x27c   :  { %9036 = vst.msk [vmem:[#allocation2 + $0xa0] sm:$0xff] %vm234_vm2, %v16865_v55  ;;  %v7934_v63 = vcombine.low %v7926_v60, %v7933_v5  ;;  %v5238_v57 = vrot.slane %v5223_v0, %v13360_v39  ;;  %v5263_v53 = vcombine.high %v5255_v47, %v5255_v47  ;;  %v5270_v25 = vrot.slane %v5255_v47, %v13360_v39 }
 0x27d   :  { %v6920_v49 = vrot.slane %v6898_v54, %v13360_v39  ;;  %v6927_v51 = vrot.slane %v6899_v52, %v13360_v39  ;;  %v6928_v31 = vcombine.low %v6906_v33, %v6913_v11  ;;  %v5277_v14 = vrot.slane %v5262_v56, %v13360_v39 }
 0x27e   :  { %8054 = vrot.lane.b32.xlu1 %v7934_v63, %s13042_s17  ;;  %v5284_v26 = vrot.slane %v5263_v53, %v13360_v39  ;;  %v5285_v16 = vcombine.high %v5270_v25, %v5270_v25  ;;  %v5294_v60 = vrot.slane %v14728_v23, %v13360_v39  ;;  %v8216_v5 = vcombine.low %v5238_v57, %v5270_v25 }
 0x27f   :  { %v6929_v0 = vcombine.low %v6920_v49, %v6927_v51  ;;  %v6936_v47 = vrot.slane %v6928_v31, %v13360_v39  ;;  %v2415_v54 = vcombine.high %v14783_v19, %v14783_v19  ;;  %v2454_v40 = vcombine.high %v2168_v4, %v2168_v4 }
 0x280   :  { %v5286_v52 = vcombine.high %v5284_v26, %v5284_v26  ;;  %v5302_v33 = vcombine.high %v5294_v60, %v5294_v60  ;;  %v15072_v11 = vrot.slane %v5294_v60, %v13360_v39  ;;  %v8217_v56 = vcombine.low %v5284_v26, %v5285_v16 }
 0x281   :  { %v6943_v63 = vrot.slane %v6929_v0, %v13360_v39  ;;  %v8226_v53 = vrot.slane %v8216_v5, %v13360_v39  ;;  %v2429_v41 = vrot.slane %v2415_v54, %v13360_v39  ;;  %v2461_v57 = vrot.slane %v2168_v4, %v13360_v39 }
 0x282   :  { %v15079_v25 = vrot.slane %v5302_v33, %v13360_v39  ;;  %v8218_v49 = vcombine.low %v5286_v52, %v5277_v14  ;;  %v8233_v19 = vrot.slane %v8217_v56, %v13360_v39  ;;  %v2468_v51 = vrot.slane %v2454_v40, %v13360_v39 }
 0x283   :  { %v6944_v31 = vcombine.low %v6936_v47, %v6943_v63  ;;  %v2444_v60 = vrot.slane %v2429_v41, %v13360_v39  ;;  %v2469_v26 = vcombine.high %v2461_v57, %v2461_v57  ;;  %v2476_v16 = vrot.slane %v2461_v57, %v13360_v39 }
 0x284   :  { %v8219_v5 = vcombine.low %v15072_v11, %v15079_v25  ;;  %v8240_v0 = vrot.slane %v8218_v49, %v13360_v39  ;;  %v8248_v4 = vcombine.low %v8226_v53, %v8233_v19  ;;  %v2483_v54 = vrot.slane %v2468_v51, %v13360_v39  ;;  %v15101_v51 = vld [vmem:[#allocation2 + $0xb0] sm:$0x1f] }
 0x285   :  { %7064 = vrot.lane.b32.xlu0 %v6944_v31, %s13039_s14  ;;  %v2490_v14 = vrot.slane %v2469_v26, %v13360_v39  ;;  %v2491_v52 = vcombine.high %v2476_v16, %v2476_v16  ;;  %v12666_v40 = vcombine.high %v14813_v3, %v14820_v29  ;;  %v5956_v41 = vcombine.low %v2444_v60, %v2476_v16 }
 0x286   :  { %v8247_v47 = vrot.slane %v8219_v5, %v13360_v39  ;;  %v8256_v33 = vrot.slane %v8248_v4, %v13360_v39  ;;  %v4056_v56 = vcombine.high %v14698_v62, %v14698_v62  ;;  %v4095_v63 = vcombine.high %v14467_v8, %v14467_v8  ;;  %9038 = vst.msk [vmem:[#allocation2 + $0xb0] sm:$0xff] %vm234_vm2, %v16865_v55 }
 0x287   :  { %v2492_v53 = vcombine.high %v2490_v14, %v2490_v14  ;;  %v5957_v57 = vcombine.low %v2490_v14, %v2491_v52  ;;  %v5965_v49 = vrot.slane %v12666_v40, %v13360_v39  ;;  %v5972_v19 = vrot.slane %v5956_v41, %v13360_v39 }
 0x288   :  { %v8249_v3 = vcombine.low %v8240_v0, %v8247_v47  ;;  %v4070_v29 = vrot.slane %v4056_v56, %v13360_v39  ;;  %v4102_v31 = vrot.slane %v14467_v8, %v13360_v39  ;;  %v4109_v60 = vrot.slane %v4095_v63, %v13360_v39 }
 0x289   :  { %v5958_v62 = vcombine.low %v2492_v53, %v2483_v54  ;;  %v5979_v26 = vrot.slane %v5957_v57, %v13360_v39  ;;  %v5987_v16 = vcombine.low %v5965_v49, %v5972_v19  ;;  %v12686_v5 = vcombine.high %v14839_v12, %v14846_v50 }
 0x28a   :  { %v8263_v4 = vrot.slane %v8249_v3, %v13360_v39  ;;  %v4085_v0 = vrot.slane %v4070_v29, %v13360_v39  ;;  %v4110_v14 = vcombine.high %v4102_v31, %v4102_v31  ;;  %v4117_v52 = vrot.slane %v4102_v31, %v13360_v39 }
 0x28b   :  { %v5986_v8 = vrot.slane %v5958_v62, %v13360_v39  ;;  %v5995_v40 = vrot.slane %v5987_v16, %v13360_v39  ;;  %v4124_v41 = vrot.slane %v4109_v60, %v13360_v39  ;;  %v7285_v54 = vrot.slane %v12686_v5, %v13360_v39 }
 0x28c   :  { %v8264_v47 = vcombine.low %v8256_v33, %v8263_v4  ;;  %v4131_v56 = vrot.slane %v4110_v14, %v13360_v39  ;;  %v4132_v63 = vcombine.high %v4117_v52, %v4117_v52  ;;  %v7276_v12 = vcombine.low %v4085_v0, %v4117_v52  ;;  %v15135_v4 = vld [vmem:[#allocation2 + $0xc2] sm:$0x1f] }
 0x28d   :  { %v5988_v50 = vcombine.low %v5979_v26, %v5986_v8  ;;  %v2825_v53 = vcombine.high %v14245_v48, %v14245_v48  ;;  %v2864_v57 = vcombine.high %v14511_v21, %v14511_v21  ;;  %v2871_v49 = vrot.slane %v14511_v21, %v13360_v39  ;;  %v15137_v0 = vld [vmem:[#allocation2 + $0xc0] sm:$0x1f] }
 0x28e   :  { %8384 = vrot.lane.b32.xlu1 %v8264_v47, %s13043_s18  ;;  %v4133_v19 = vcombine.high %v4131_v56, %v4131_v56  ;;  %v7277_v3 = vcombine.low %v4131_v56, %v4132_v63  ;;  %v7292_v33 = vrot.slane %v7276_v12, %v13360_v39  ;;  %v12671_v29 = vcombine.high %v14865_v58, %v14885_v37 }
 0x28f   :  { %v6002_v31 = vrot.slane %v5988_v50, %v13360_v39  ;;  %v2839_v60 = vrot.slane %v2825_v53, %v13360_v39  ;;  %v2878_v48 = vrot.slane %v2864_v57, %v13360_v39  ;;  %v2879_v62 = vcombine.high %v2871_v49, %v2871_v49  ;;  %9040 = vst.msk [vmem:[#allocation2 + $0xc0] sm:$0xff] %vm234_vm2, %v16865_v55 }
 0x290   :  { %v7278_v26 = vcombine.low %v4133_v19, %v4124_v41  ;;  %v7299_v16 = vrot.slane %v7277_v3, %v13360_v39  ;;  %v7307_v21 = vcombine.low %v7285_v54, %v7292_v33  ;;  %v2886_v5 = vrot.slane %v2871_v49, %v13360_v39 }
 0x291   :  { %v6003_v14 = vcombine.low %v5995_v40, %v6002_v31  ;;  %v2854_v58 = vrot.slane %v2839_v60, %v13360_v39  ;;  %v2893_v37 = vrot.slane %v2878_v48, %v13360_v39  ;;  %v2900_v52 = vrot.slane %v2879_v62, %v13360_v39 }
 0x292   :  { %v7306_v8 = vrot.slane %v7278_v26, %v13360_v39  ;;  %v7315_v41 = vrot.slane %v7307_v21, %v13360_v39  ;;  %v2901_v54 = vcombine.high %v2886_v5, %v2886_v5  ;;  %v6295_v47 = vrot.slane %v12671_v29, %v13360_v39 }
 0x293   :  { %6076 = vrot.lane.b32.xlu0 %v6003_v14, %s13036_s11  ;;  %v2902_v56 = vcombine.high %v2900_v52, %v2900_v52  ;;  %v6286_v40 = vcombine.low %v2854_v58, %v2886_v5  ;;  %v4467_v63 = vcombine.high %v14786_v46, %v14786_v46  ;;  %v4506_v12 = vcombine.high %v14705_v9, %v14705_v9 }
 0x294   :  { %v7308_v50 = vcombine.low %v7299_v16, %v7306_v8  ;;  %v6287_v53 = vcombine.low %v2900_v52, %v2901_v54  ;;  %v4513_v57 = vrot.slane %v14705_v9, %v13360_v39  ;;  %v12691_v49 = vcombine.high %v14926_v1, %v14931_v7 }
 0x295   :  { %v6288_v19 = vcombine.low %v2902_v56, %v2893_v37  ;;  %v6302_v3 = vrot.slane %v6286_v40, %v13360_v39  ;;  %v4481_v33 = vrot.slane %v4467_v63, %v13360_v39  ;;  %v4520_v29 = vrot.slane %v4506_v12, %v13360_v39 }
 0x296   :  { %v7322_v46 = vrot.slane %v7308_v50, %v13360_v39  ;;  %v6309_v31 = vrot.slane %v6287_v53, %v13360_v39  ;;  %v4521_v60 = vcombine.high %v4513_v57, %v4513_v57  ;;  %v4528_v48 = vrot.slane %v4513_v57, %v13360_v39 }
 0x297   :  { %v6316_v62 = vrot.slane %v6288_v19, %v13360_v39  ;;  %v6317_v9 = vcombine.low %v6295_v47, %v6302_v3  ;;  %v4496_v26 = vrot.slane %v4481_v33, %v13360_v39  ;;  %v4535_v1 = vrot.slane %v4520_v29, %v13360_v39 }
 0x298   :  { %v7323_v7 = vcombine.low %v7315_v41, %v7322_v46  ;;  %v4542_v16 = vrot.slane %v4521_v60, %v13360_v39  ;;  %v4543_v21 = vcombine.high %v4528_v48, %v4528_v48  ;;  %v7615_v5 = vrot.slane %v12691_v49, %v13360_v39 }
 0x299   :  { %v6318_v14 = vcombine.low %v6309_v31, %v6316_v62  ;;  %v6325_v58 = vrot.slane %v6317_v9, %v13360_v39  ;;  %v7606_v37 = vcombine.low %v4496_v26, %v4528_v48  ;;  %v3236_v52 = vcombine.high %v14940_v45, %v14940_v45 }
 0x29a   :  { %7396 = vrot.lane.b32.xlu1 %v7323_v7, %s13040_s15  ;;  %v4544_v8 = vcombine.high %v4542_v16, %v4542_v16  ;;  %v7607_v54 = vcombine.low %v4542_v16, %v4543_v21  ;;  %v3275_v47 = vcombine.high %v14888_v59, %v14888_v59  ;;  %v3282_v41 = vrot.slane %v14888_v59, %v13360_v39 }
 0x29b   :  { %v6332_v56 = vrot.slane %v6318_v14, %v13360_v39  ;;  %v7622_v40 = vrot.slane %v7606_v37, %v13360_v39  ;;  %v3250_v63 = vrot.slane %v3236_v52, %v13360_v39  ;;  %v12676_v12 = vcombine.high %v14964_v43, %v14970_v32 }
 0x29c   :  { %v7608_v45 = vcombine.low %v4544_v8, %v4535_v1  ;;  %v7629_v50 = vrot.slane %v7607_v54, %v13360_v39  ;;  %v3289_v53 = vrot.slane %v3275_v47, %v13360_v39  ;;  %v3290_v57 = vcombine.high %v3282_v41, %v3282_v41 }
 0x29d   :  { %v6333_v49 = vcombine.low %v6325_v58, %v6332_v56  ;;  %v7637_v19 = vcombine.low %v7615_v5, %v7622_v40  ;;  %v3265_v3 = vrot.slane %v3250_v63, %v13360_v39  ;;  %v3297_v59 = vrot.slane %v3282_v41, %v13360_v39 }
 0x29e   :  { %v7636_v33 = vrot.slane %v7608_v45, %v13360_v39  ;;  %v3304_v29 = vrot.slane %v3289_v53, %v13360_v39  ;;  %v3311_v46 = vrot.slane %v3290_v57, %v13360_v39  ;;  %v6625_v43 = vrot.slane %v12676_v12, %v13360_v39 }
 0x29f   :  { %6406 = vrot.lane.b32.xlu0 %v6333_v49, %s13037_s12  ;;  %v7645_v32 = vrot.slane %v7637_v19, %v13360_v39  ;;  %v3312_v31 = vcombine.high %v3297_v59, %v3297_v59  ;;  %v6616_v60 = vcombine.low %v3265_v3, %v3297_v59  ;;  %v4877_v48 = vcombine.high %v14792_v28, %v14792_v28 }
 0x2a0   :  { %v7638_v62 = vcombine.low %v7629_v50, %v7636_v33  ;;  %v3313_v9 = vcombine.high %v3311_v46, %v3311_v46  ;;  %v4916_v26 = vcombine.high %v14709_v30, %v14709_v30  ;;  %v4923_v1 = vrot.slane %v14709_v30, %v13360_v39 }
 0x2a1   :  { %v6617_v7 = vcombine.low %v3311_v46, %v3312_v31  ;;  %v6632_v16 = vrot.slane %v6616_v60, %v13360_v39  ;;  %v4891_v21 = vrot.slane %v4877_v48, %v13360_v39  ;;  %v12696_v5 = vcombine.high %v14994_v44, %v15000_v36 }
 0x2a2   :  { %v7652_v14 = vrot.slane %v7638_v62, %v13360_v39  ;;  %v6618_v58 = vcombine.low %v3313_v9, %v3304_v29  ;;  %v4930_v28 = vrot.slane %v4916_v26, %v13360_v39  ;;  %v4931_v37 = vcombine.high %v4923_v1, %v4923_v1 }
 0x2a3   :  { %v6639_v52 = vrot.slane %v6617_v7, %v13360_v39  ;;  %v6647_v8 = vcombine.low %v6625_v43, %v6632_v16  ;;  %v4906_v54 = vrot.slane %v4891_v21, %v13360_v39  ;;  %v4938_v30 = vrot.slane %v4923_v1, %v13360_v39 }
 0x2a4   :  { %v7653_v47 = vcombine.low %v7645_v32, %v7652_v14  ;;  %v6646_v41 = vrot.slane %v6618_v58, %v13360_v39  ;;  %v4945_v56 = vrot.slane %v4930_v28, %v13360_v39  ;;  %v4952_v44 = vrot.slane %v4931_v37, %v13360_v39 }
 0x2a5   :  { %v6655_v36 = vrot.slane %v6647_v8, %v13360_v39  ;;  %v4953_v40 = vcombine.high %v4938_v30, %v4938_v30  ;;  %v7936_v63 = vcombine.low %v4906_v54, %v4938_v30  ;;  %v7945_v12 = vrot.slane %v12696_v5, %v13360_v39 }
 0x2a6   :  { %7726 = vrot.lane.b32.xlu1 %v7653_v47, %s13041_s16  ;;  %v6648_v45 = vcombine.low %v6639_v52, %v6646_v41  ;;  %v4954_v50 = vcombine.high %v4952_v44, %v4952_v44  ;;  %v3646_v53 = vcombine.high %v15002_v13, %v15002_v13  ;;  %v3685_v57 = vcombine.high %v14890_v10, %v14890_v10  ;;  %v15247_v47 = vpop.permute.xlu0 %6080 }
 0x2a7   :  { %v7937_v49 = vcombine.low %v4952_v44, %v4953_v40  ;;  %v7952_v19 = vrot.slane %v7936_v63, %v13360_v39  ;;  %v3692_v3 = vrot.slane %v14890_v10, %v13360_v39  ;;  %v12681_v59 = vcombine.high %v15027_v2, %v15040_v20 }
 0x2a8   :  { %v6662_v33 = vrot.slane %v6648_v45, %v13360_v39  ;;  %v7938_v29 = vcombine.low %v4954_v50, %v4945_v56  ;;  %v3660_v46 = vrot.slane %v3646_v53, %v13360_v39  ;;  %v3699_v43 = vrot.slane %v3685_v57, %v13360_v39 }
 0x2a9   :  { %v7959_v13 = vrot.slane %v7937_v49, %v13360_v39  ;;  %v7967_v32 = vcombine.low %v7945_v12, %v7952_v19  ;;  %v3700_v31 = vcombine.high %v3692_v3, %v3692_v3  ;;  %v3707_v60 = vrot.slane %v3692_v3, %v13360_v39  ;;  %v16912_v19 = vld [vmem:[#allocation10_spill] sm:$0xff] }
 0x2aa   :  { %v6663_v48 = vcombine.low %v6655_v36, %v6662_v33  ;;  %v7966_v62 = vrot.slane %v7938_v29, %v13360_v39  ;;  %v3675_v10 = vrot.slane %v3660_v46, %v13360_v39  ;;  %v3714_v2 = vrot.slane %v3699_v43, %v13360_v39  ;;  %v16913_v43 = vld [vmem:[#allocation4_spill] sm:$0xff] }
 0x2ab   :  { %v7975_v20 = vrot.slane %v7967_v32, %v13360_v39  ;;  %v3721_v9 = vrot.slane %v3700_v31, %v13360_v39  ;;  %v3722_v26 = vcombine.high %v3707_v60, %v3707_v60  ;;  %v6955_v1 = vrot.slane %v12681_v59, %v13360_v39 }
 0x2ac   :  { %6736 = vrot.lane.b32.xlu0 %v6663_v48, %s13038_s13  ;;  %v7968_v7 = vcombine.low %v7959_v13, %v7966_v62  ;;  %v6946_v16 = vcombine.low %v3675_v10, %v3707_v60  ;;  %v4584_v21 = vcombine.high %v14869_v22, %v14869_v22  ;;  %v15236_v5 = vrot.slane %v14869_v22, %v13360_v39  ;;  %v15273_v62 = vpop.permute.xlu0 %6410  ;;  %v15275_v10 = vpop.permute.xlu1 %6728 }
 0x2ad   :  { %v3723_v14 = vcombine.high %v3721_v9, %v3721_v9  ;;  %v6947_v58 = vcombine.low %v3721_v9, %v3722_v26  ;;  %v2493_v28 = vcombine.high %v15135_v4, %v15135_v4  ;;  %v2500_v37 = vrot.slane %v15135_v4, %v13360_v39 }
 0x2ae   :  { %v7982_v52 = vrot.slane %v7968_v7, %v13360_v39  ;;  %v6962_v8 = vrot.slane %v6946_v16, %v13360_v39  ;;  %v4598_v54 = vrot.slane %v4584_v21, %v13360_v39  ;;  %v4599_v30 = vcombine.high %v15236_v5, %v15236_v5 }
 0x2af   :  { %v6948_v22 = vcombine.low %v3723_v14, %v3714_v2  ;;  %v6969_v41 = vrot.slane %v6947_v58, %v13360_v39  ;;  %v2507_v56 = vrot.slane %v2493_v28, %v13360_v39  ;;  %v2508_v44 = vcombine.high %v2500_v37, %v2500_v37 }
 0x2b0   :  { %v7983_v36 = vcombine.low %v7975_v20, %v7982_v52  ;;  %v6977_v40 = vcombine.low %v6955_v1, %v6962_v8  ;;  %v4613_v4 = vrot.slane %v4598_v54, %v13360_v39  ;;  %v15253_v63 = vrot.slane %v4599_v30, %v13360_v39 }
 0x2b1   :  { %v6976_v12 = vrot.slane %v6948_v22, %v13360_v39  ;;  %v2515_v45 = vrot.slane %v2500_v37, %v13360_v39  ;;  %v2522_v50 = vrot.slane %v2507_v56, %v13360_v39  ;;  %v2529_v53 = vrot.slane %v2508_v44, %v13360_v39 }
 0x2b2   :  { %8056 = vrot.lane.b32.xlu1 %v7983_v36, %s13042_s17  ;;  %v6985_v57 = vrot.slane %v6977_v40, %v13360_v39  ;;  %v4622_v49 = vcombine.high %v15253_v63, %v15253_v63  ;;  %v6035_v3 = vrot.slane %v16912_v19, %v13360_v39  ;;  %v5287_v59 = vcombine.high %v14728_v23, %v14728_v23 }
 0x2b3   :  { %v6978_v33 = vcombine.low %v6969_v41, %v6976_v12  ;;  %v6004_v29 = vcombine.low %v2515_v45, %v2529_v53  ;;  %v12667_v46 = vcombine.high %v2515_v45, %v2529_v53  ;;  %v6006_v13 = vcombine.low %v2522_v50, %v16913_v43  ;;  %v16914_v50 = vld [vmem:[#allocation6_spill] sm:$0xff] }
 0x2b4   :  { %v7703_v32 = vcombine.low %v4622_v49, %v4613_v4  ;;  %v5301_v31 = vrot.slane %v5287_v59, %v13360_v39  ;;  %v5326_v60 = vcombine.high %v14711_v61, %v14711_v61  ;;  %v5333_v48 = vrot.slane %v14711_v61, %v13360_v39 }
 0x2b5   :  { %v6992_v23 = vrot.slane %v6978_v33, %v13360_v39  ;;  %v6014_v2 = vrot.slane %v6004_v29, %v13360_v39  ;;  %v6021_v20 = vrot.slane %v12667_v46, %v13360_v39  ;;  %v6028_v9 = vrot.slane %v6006_v13, %v13360_v39 }
 0x2b6   :  { %v7710_v26 = vrot.slane %v7703_v32, %v13360_v39  ;;  %v5316_v1 = vrot.slane %v5301_v31, %v13360_v39  ;;  %v5340_v7 = vrot.slane %v5326_v60, %v13360_v39  ;;  %v5341_v16 = vcombine.high %v5333_v48, %v5333_v48  ;;  %v16915_v60 = vld [vmem:[#allocation9_spill] sm:$0xff] }
 0x2b7   :  { %v6993_v61 = vcombine.low %v6985_v57, %v6992_v23  ;;  %v6036_v21 = vcombine.low %v6014_v2, %v6021_v20  ;;  %v6037_v14 = vcombine.low %v6028_v9, %v6035_v3  ;;  %v5348_v58 = vrot.slane %v5333_v48, %v13360_v39 }
 0x2b8   :  { %v7717_v28 = vrot.slane %v7710_v26, %v13360_v39  ;;  %v5355_v37 = vrot.slane %v5340_v7, %v13360_v39  ;;  %v5362_v52 = vrot.slane %v5341_v16, %v13360_v39  ;;  %v12701_v8 = vcombine.high %v15072_v11, %v15079_v25  ;;  %v15299_v11 = vpop.permute.xlu0 %6740  ;;  %v15301_v25 = vpop.permute.xlu1 %7058 }
 0x2b9   :  { %7066 = vrot.lane.b32.xlu0 %v6993_v61, %s13039_s14  ;;  %v6044_v54 = vrot.slane %v6036_v21, %v13360_v39  ;;  %v6051_v30 = vrot.slane %v6037_v14, %v13360_v39  ;;  %v5363_v22 = vcombine.high %v5348_v58, %v5348_v58  ;;  %v8266_v41 = vcombine.low %v5316_v1, %v5348_v58 }
 0x2ba   :  { %7730 = vrot.lane.b32.xlu1 %v7717_v28, %s13041_s16  ;;  %v5364_v56 = vcombine.high %v5362_v52, %v5362_v52  ;;  %v8275_v44 = vrot.slane %v12701_v8, %v13360_v39  ;;  %v2903_v36 = vcombine.high %v14700_v42, %v14700_v42  ;;  %v2910_v40 = vrot.slane %v14700_v42, %v13360_v39 }
 0x2bb   :  { %v6052_v4 = vcombine.low %v6044_v54, %v6051_v30  ;;  %v8267_v12 = vcombine.low %v5362_v52, %v5363_v22  ;;  %v8282_v45 = vrot.slane %v8266_v41, %v13360_v39  ;;  %v2964_v53 = vrot.slane %v16914_v50, %v13360_v39 }
 0x2bc   :  { %v8268_v57 = vcombine.low %v5364_v56, %v5355_v37  ;;  %v2917_v49 = vrot.slane %v2903_v36, %v13360_v39  ;;  %v2918_v19 = vcombine.high %v2910_v40, %v2910_v40  ;;  %v2925_v3 = vrot.slane %v2910_v40, %v13360_v39  ;;  %v15322_v7 = vpop.permute.xlu0 %7070  ;;  %v15324_v16 = vpop.permute.xlu1 %7388 }
 0x2bd   :  { %6078 = vrot.lane.b32.xlu0 %v6052_v4, %s13036_s11  ;;  %v8289_v42 = vrot.slane %v8267_v12, %v13360_v39  ;;  %v8297_v59 = vcombine.low %v8275_v44, %v8282_v45  ;;  %v2979_v33 = vcombine.high %v2964_v53, %v2964_v53  ;;  %v4134_v29 = vcombine.high %v14730_v38, %v14730_v38 }
 0x2be   :  { %v8296_v46 = vrot.slane %v8268_v57, %v13360_v39  ;;  %v2932_v43 = vrot.slane %v2917_v49, %v13360_v39  ;;  %v2939_v13 = vrot.slane %v2918_v19, %v13360_v39  ;;  %v4141_v32 = vrot.slane %v14730_v38, %v13360_v39 }
 0x2bf   :  { %v8305_v31 = vrot.slane %v8297_v59, %v13360_v39  ;;  %v6337_v48 = vcombine.low %v16915_v60, %v2979_v33  ;;  %v4148_v23 = vrot.slane %v4134_v29, %v13360_v39  ;;  %v4180_v2 = vrot.slane %v14715_v6, %v13360_v39 }
 0x2c0   :  { %v8298_v20 = vcombine.low %v8289_v42, %v8296_v46  ;;  %v6334_v9 = vcombine.low %v2925_v3, %v2939_v13  ;;  %v12672_v26 = vcombine.high %v2925_v3, %v2939_v13  ;;  %v6336_v1 = vcombine.low %v2932_v43, %v2964_v53  ;;  %v15346_v19 = vpop.permute.xlu0 %6068  ;;  %v15348_v3 = vpop.permute.xlu1 %7718 }
 0x2c1   :  { %v6365_v61 = vrot.slane %v6337_v48, %v13360_v39  ;;  %v4149_v38 = vcombine.high %v4141_v32, %v4141_v32  ;;  %v4156_v21 = vrot.slane %v4141_v32, %v13360_v39  ;;  %v4163_v14 = vrot.slane %v4148_v23, %v13360_v39  ;;  %v16916_v48 = vld [vmem:[#allocation12_spill] sm:$0xff] }
 0x2c2   :  { %v8312_v58 = vrot.slane %v8298_v20, %v13360_v39  ;;  %v6344_v28 = vrot.slane %v6334_v9, %v13360_v39  ;;  %v6351_v37 = vrot.slane %v12672_v26, %v13360_v39  ;;  %v6358_v52 = vrot.slane %v6336_v1, %v13360_v39 }
 0x2c3   :  { %v4170_v8 = vrot.slane %v4149_v38, %v13360_v39  ;;  %v4188_v54 = vcombine.high %v4180_v2, %v4180_v2  ;;  %v4195_v30 = vrot.slane %v4180_v2, %v13360_v39  ;;  %v3314_v22 = vcombine.high %v14794_v18, %v14794_v18 }
 0x2c4   :  { %v8313_v41 = vcombine.low %v8305_v31, %v8312_v58  ;;  %v6366_v56 = vcombine.low %v6344_v28, %v6351_v37  ;;  %v6367_v44 = vcombine.low %v6358_v52, %v6365_v61  ;;  %v3321_v36 = vrot.slane %v14794_v18, %v13360_v39  ;;  %v15371_v52 = vpop.permute.xlu0 %6398 }
 0x2c5   :  { %v15340_v40 = vrot.slane %v4188_v54, %v13360_v39  ;;  %v4210_v4 = vcombine.high %v4195_v30, %v4195_v30  ;;  %v7324_v12 = vcombine.low %v4156_v21, %v4170_v8  ;;  %v12687_v45 = vcombine.high %v4156_v21, %v4170_v8  ;;  %v15373_v8 = vpop.permute.xlu1 %8048 }
 0x2c6   :  { %8386 = vrot.lane.b32.xlu1 %v8313_v41, %s13043_s18  ;;  %v6374_v50 = vrot.slane %v6366_v56, %v13360_v39  ;;  %v6381_v53 = vrot.slane %v6367_v44, %v13360_v39  ;;  %v7326_v57 = vcombine.low %v4163_v14, %v4195_v30  ;;  %v3328_v49 = vrot.slane %v3314_v22, %v13360_v39 }
 0x2c7   :  { %v7327_v18 = vcombine.low %v15340_v40, %v4210_v4  ;;  %v7334_v42 = vrot.slane %v7324_v12, %v13360_v39  ;;  %v7341_v59 = vrot.slane %v12687_v45, %v13360_v39  ;;  %v3329_v33 = vcombine.high %v3321_v36, %v3321_v36 }
 0x2c8   :  { %v6382_v29 = vcombine.low %v6374_v50, %v6381_v53  ;;  %v7348_v46 = vrot.slane %v7326_v57, %v13360_v39  ;;  %v3336_v43 = vrot.slane %v3321_v36, %v13360_v39  ;;  %v3343_v13 = vrot.slane %v3328_v49, %v13360_v39 }
 0x2c9   :  { %v7355_v32 = vrot.slane %v7327_v18, %v13360_v39  ;;  %v7356_v31 = vcombine.low %v7334_v42, %v7341_v59  ;;  %v3350_v60 = vrot.slane %v3329_v33, %v13360_v39  ;;  %v3375_v23 = vrot.slane %v16916_v48, %v13360_v39 }
 0x2ca   :  { %6408 = vrot.lane.b32.xlu0 %v6382_v29, %s13037_s12  ;;  %v4545_v2 = vcombine.high %v14871_v35, %v14871_v35  ;;  %v4552_v20 = vrot.slane %v14871_v35, %v13360_v39  ;;  %v4606_v9 = vrot.slane %v15236_v5, %v13360_v39  ;;  %v3724_v26 = vcombine.high %v14796_v27, %v14796_v27  ;;  %v16917_v5 = vld [vmem:[#allocation13_spill] sm:$0xff] }
 0x2cb   :  { %v7357_v1 = vcombine.low %v7348_v46, %v7355_v32  ;;  %v7364_v61 = vrot.slane %v7356_v31, %v13360_v39  ;;  %v3390_v38 = vcombine.high %v3375_v23, %v3375_v23  ;;  %v6664_v21 = vcombine.low %v3336_v43, %v3350_v60  ;;  %v15393_v32 = vpop.permute.xlu1 %8378  ;;  %v15395_v31 = vpop.permute.xlu0 %6070 }
 0x2cc   :  { %v12677_v14 = vcombine.high %v3336_v43, %v3350_v60  ;;  %v6666_v58 = vcombine.low %v3343_v13, %v3375_v23  ;;  %v4559_v28 = vrot.slane %v4545_v2, %v13360_v39  ;;  %v4560_v37 = vcombine.high %v4552_v20, %v4552_v20 }
 0x2cd   :  { %v7371_v35 = vrot.slane %v7357_v1, %v13360_v39  ;;  %v6667_v54 = vcombine.low %v16917_v5, %v3390_v38  ;;  %v6674_v30 = vrot.slane %v6664_v21, %v13360_v39  ;;  %v4567_v22 = vrot.slane %v4552_v20, %v13360_v39 }
 0x2ce   :  { %v6681_v41 = vrot.slane %v12677_v14, %v13360_v39  ;;  %v6688_v56 = vrot.slane %v6666_v58, %v13360_v39  ;;  %v4574_v44 = vrot.slane %v4559_v28, %v13360_v39  ;;  %v4581_v36 = vrot.slane %v4560_v37, %v13360_v39 }
 0x2cf   :  { %v7372_v4 = vcombine.low %v7364_v61, %v7371_v35  ;;  %v6695_v12 = vrot.slane %v6667_v54, %v13360_v39  ;;  %v4621_v45 = vcombine.high %v4606_v9, %v4606_v9  ;;  %v3731_v50 = vrot.slane %v14796_v27, %v13360_v39 }
 0x2d0   :  { %v6696_v53 = vcombine.low %v6674_v30, %v6681_v41  ;;  %v7654_v57 = vcombine.low %v4567_v22, %v4581_v36  ;;  %v12692_v49 = vcombine.high %v4567_v22, %v4581_v36  ;;  %v7656_v18 = vcombine.low %v4574_v44, %v4606_v9  ;;  %v16918_v30 = vld [vmem:[#allocation14_spill] sm:$0xff]  ;;  %v15418_v44 = vpop.permute.xlu1 %7390  ;;  %v15420_v36 = vpop.permute.xlu0 %6400 }
 0x2d1   :  { %7398 = vrot.lane.b32.xlu1 %v7372_v4, %s13040_s15  ;;  %v6697_v42 = vcombine.low %v6688_v56, %v6695_v12  ;;  %v7657_v59 = vcombine.low %v15253_v63, %v4621_v45  ;;  %v3738_v33 = vrot.slane %v3724_v26, %v13360_v39  ;;  %v3739_v29 = vcombine.high %v3731_v50, %v3731_v50 }
 0x2d2   :  { %v6704_v46 = vrot.slane %v6696_v53, %v13360_v39  ;;  %v7664_v43 = vrot.slane %v7654_v57, %v13360_v39  ;;  %v7671_v13 = vrot.slane %v12692_v49, %v13360_v39  ;;  %v7678_v27 = vrot.slane %v7656_v18, %v13360_v39 }
 0x2d3   :  { %v6711_v60 = vrot.slane %v6697_v42, %v13360_v39  ;;  %v7685_v48 = vrot.slane %v7657_v59, %v13360_v39  ;;  %v3746_v63 = vrot.slane %v3731_v50, %v13360_v39  ;;  %v3753_v23 = vrot.slane %v3738_v33, %v13360_v39 }
 0x2d4   :  { %v7686_v2 = vcombine.low %v7664_v43, %v7671_v13  ;;  %v3760_v20 = vrot.slane %v3739_v29, %v13360_v39  ;;  %v3785_v9 = vrot.slane %v14188_v24, %v13360_v39  ;;  %v4955_v26 = vcombine.high %v14873_v34, %v14873_v34 }
 0x2d5   :  { %v6712_v1 = vcombine.low %v6704_v46, %v6711_v60  ;;  %v7687_v61 = vcombine.low %v7678_v27, %v7685_v48  ;;  %v4962_v38 = vrot.slane %v14873_v34, %v13360_v39  ;;  %v5001_v21 = vrot.slane %v14878_v17, %v13360_v39 }
 0x2d6   :  { %v7694_v14 = vrot.slane %v7686_v2, %v13360_v39  ;;  %v3800_v58 = vcombine.high %v3785_v9, %v3785_v9  ;;  %v6994_v28 = vcombine.low %v3746_v63, %v3760_v20  ;;  %v12682_v37 = vcombine.high %v3746_v63, %v3760_v20 }
 0x2d7   :  { %6738 = vrot.lane.b32.xlu0 %v6712_v1, %s13038_s13  ;;  %v7701_v24 = vrot.slane %v7687_v61, %v13360_v39  ;;  %v6996_v35 = vcombine.low %v3753_v23, %v3785_v9  ;;  %v4969_v5 = vrot.slane %v4955_v26, %v13360_v39  ;;  %v4970_v54 = vcombine.high %v4962_v38, %v4962_v38  ;;  %v15442_v26 = vpop.permute.xlu1 %7720  ;;  %v15444_v1 = vpop.permute.xlu0 %6730 }
 0x2d8   :  { %v6997_v22 = vcombine.low %v16918_v30, %v3800_v58  ;;  %v7004_v34 = vrot.slane %v6994_v28, %v13360_v39  ;;  %v7011_v41 = vrot.slane %v12682_v37, %v13360_v39  ;;  %v4977_v56 = vrot.slane %v4962_v38, %v13360_v39 }
 0x2d9   :  { %v7702_v4 = vcombine.low %v7694_v14, %v7701_v24  ;;  %v7018_v12 = vrot.slane %v6996_v35, %v13360_v39  ;;  %v4984_v45 = vrot.slane %v4969_v5, %v13360_v39  ;;  %v4991_v50 = vrot.slane %v4970_v54, %v13360_v39  ;;  %v16920_v14 = vld [vmem:[#allocation7_spill] sm:$0xff] }
 0x2da   :  { %v7025_v53 = vrot.slane %v6997_v22, %v13360_v39  ;;  %v7026_v57 = vcombine.low %v7004_v34, %v7011_v41  ;;  %v5009_v49 = vcombine.high %v5001_v21, %v5001_v21  ;;  %v5016_v18 = vrot.slane %v5001_v21, %v13360_v39 }
 0x2db   :  { %7728 = vrot.lane.b32.xlu1 %v7702_v4, %s13041_s16  ;;  %v7984_v42 = vcombine.low %v4977_v56, %v4991_v50  ;;  %v12697_v59 = vcombine.high %v4977_v56, %v4991_v50  ;;  %v4173_v33 = vcombine.high %v14715_v6, %v14715_v6  ;;  %v4211_v29 = vcombine.high %v15340_v40, %v15340_v40  ;;  %v16919_v6 = vld [vmem:[#allocation8_spill] sm:$0xff] }
 0x2dc   :  { %v7027_v46 = vcombine.low %v7018_v12, %v7025_v53  ;;  %v7034_v43 = vrot.slane %v7026_v57, %v13360_v39  ;;  %v5030_v13 = vrot.slane %v5009_v49, %v13360_v39  ;;  %v5031_v27 = vcombine.high %v5016_v18, %v5016_v18 }
 0x2dd   :  { %v7986_v60 = vcombine.low %v4984_v45, %v5016_v18  ;;  %v7994_v48 = vrot.slane %v7984_v42, %v13360_v39  ;;  %v8001_v63 = vrot.slane %v12697_v59, %v13360_v39  ;;  %v4187_v23 = vrot.slane %v4173_v33, %v13360_v39  ;;  %v15463_v59 = vpop.permute.xlu1 %8050  ;;  %v15465_v33 = vpop.permute.xlu0 %7060 }
 0x2de   :  { %v7041_v2 = vrot.slane %v7027_v46, %v13360_v39  ;;  %v7987_v20 = vcombine.low %v5030_v13, %v5031_v27  ;;  %v5365_v9 = vcombine.high %v16919_v6, %v16919_v6  ;;  %v5372_v40 = vrot.slane %v16919_v6, %v13360_v39 }
 0x2df   :  { %v8008_v61 = vrot.slane %v7986_v60, %v13360_v39  ;;  %v8016_v38 = vcombine.low %v7994_v48, %v8001_v63  ;;  %v4202_v21 = vrot.slane %v4187_v23, %v13360_v39  ;;  %v5411_v58 = vrot.slane %v16920_v14, %v13360_v39 }
 0x2e0   :  { %v7042_v28 = vcombine.low %v7034_v43, %v7041_v2  ;;  %v8015_v37 = vrot.slane %v7987_v20, %v13360_v39  ;;  %v5379_v24 = vrot.slane %v5365_v9, %v13360_v39  ;;  %v5380_v35 = vcombine.high %v5372_v40, %v5372_v40 }
 0x2e1   :  { %v8024_v5 = vrot.slane %v8016_v38, %v13360_v39  ;;  %v7373_v54 = vcombine.low %v4211_v29, %v4202_v21  ;;  %v5387_v30 = vrot.slane %v5372_v40, %v13360_v39  ;;  %v5419_v22 = vcombine.high %v5411_v58, %v5411_v58 }
 0x2e2   :  { %7068 = vrot.lane.b32.xlu0 %v7042_v28, %s13039_s14  ;;  %v8017_v34 = vcombine.low %v8008_v61, %v8015_v37  ;;  %v5394_v41 = vrot.slane %v5379_v24, %v13360_v39  ;;  %v5401_v56 = vrot.slane %v5380_v35, %v13360_v39  ;;  %v5426_v4 = vrot.slane %v5411_v58, %v13360_v39  ;;  %v15483_v58 = vpop.permute.xlu0 %6072  ;;  %v16921_v24 = vld [vmem:[#allocation11_spill] sm:$0xff] }
 0x2e3   :  { %v7380_v12 = vrot.slane %v7373_v54, %v13360_v39  ;;  %v5440_v45 = vrot.slane %v5419_v22, %v13360_v39  ;;  %v4994_v50 = vcombine.high %v14878_v17, %v14878_v17  ;;  %v5032_v53 = vcombine.high %v5030_v13, %v5030_v13 }
 0x2e4   :  { %v8031_v57 = vrot.slane %v8017_v34, %v13360_v39  ;;  %v5441_v49 = vcombine.high %v5426_v4, %v5426_v4  ;;  %v8314_v18 = vcombine.low %v5387_v30, %v5401_v56  ;;  %v12702_v42 = vcombine.high %v5387_v30, %v5401_v56 }
 0x2e5   :  { %v7387_v29 = vrot.slane %v7380_v12, %v13360_v39  ;;  %v8316_v46 = vcombine.low %v5394_v41, %v5426_v4  ;;  %v5008_v43 = vrot.slane %v4994_v50, %v13360_v39  ;;  %v5404_v27 = vcombine.high %v16920_v14, %v16920_v14  ;;  %v15481_v14 = vpop.permute.xlu1 %8380  ;;  %v16922_v41 = vld [vmem:[#allocation15_spill] sm:$0xff] }
 0x2e6   :  { %v8032_v60 = vcombine.low %v8024_v5, %v8031_v57  ;;  %v8317_v17 = vcombine.low %v5440_v45, %v5441_v49  ;;  %v8324_v13 = vrot.slane %v8314_v18, %v13360_v39  ;;  %v8331_v48 = vrot.slane %v12702_v42, %v13360_v39  ;;  %v8466_v50 = vld [vmem:[%s16813_s5 + $0x20] sm:$0xf] }
 0x2e7   :  { %7400 = vrot.lane.b32.xlu0 %v7387_v29, %s13040_s15  ;;  %v8338_v63 = vrot.slane %v8316_v46, %v13360_v39  ;;  %v5023_v23 = vrot.slane %v5008_v43, %v13360_v39  ;;  %v5418_v2 = vrot.slane %v5404_v27, %v13360_v39  ;;  %v5442_v20 = vcombine.high %v5440_v45, %v5440_v45  ;;  %v8465_v29 = vld [vmem:[%s16813_s5 + $0x18] sm:$0xff]  ;;  %v15511_v43 = vpop.permute.xlu0 %6402 }
 0x2e8   :  { %8058 = vrot.lane.b32.xlu1 %v8032_v60, %s13042_s17  ;;  %v8345_v6 = vrot.slane %v8317_v17, %v13360_v39  ;;  %v8346_v9 = vcombine.low %v8324_v13, %v8331_v48  ;;  %v1771_v35 = vcombine.high %v16921_v24, %v16921_v24  ;;  %v1778_v54 = vrot.slane %v16921_v24, %v13360_v39 }
 0x2e9   :  { %v8033_v40 = vcombine.low %v5032_v53, %v5023_v23  ;;  %v5433_v61 = vrot.slane %v5418_v2, %v13360_v39  ;;  %v1817_v56 = vrot.slane %v16922_v41, %v13360_v39  ;;  %v15509_v46 = vpop.permute.xlu1 %7392  ;;  %12901 = vmatpush3.msk.msra.mxu1 %vm8494_vm6, %v8466_v50  ;;  %v1810_v2 = vcombine.high %v16922_v41, %v16922_v41 }
 0x2ea   :  { %v8347_v38 = vcombine.low %v8338_v63, %v8345_v6  ;;  %v8354_v21 = vrot.slane %v8346_v9, %v13360_v39  ;;  %v1785_v34 = vrot.slane %v1771_v35, %v13360_v39  ;;  %v1786_v12 = vcombine.high %v1778_v54, %v1778_v54  ;;  %12902 = vmatprep.subr.mxu1 %v16865_v55  ;;  %v8464_v63 = vld [vmem:[%s16813_s5 + $0x10] sm:$0xff] }
 0x2eb   :  { %v8040_v28 = vrot.slane %v8033_v40, %v13360_v39  ;;  %v8363_v37 = vcombine.low %v5442_v20, %v5433_v61  ;;  %v1793_v45 = vrot.slane %v1778_v54, %v13360_v39  ;;  %v1825_v57 = vcombine.high %v1817_v56, %v1817_v56  ;;  %12903 = vmatpush3.msra.mxu1 %v8465_v29  ;;  %v8463_v40 = vld [vmem:[%s16813_s5 + $0x8] sm:$0xff]  ;;  %v8462_v54 = vld [vmem:[%s16813_s5] sm:$0xff] }
 0x2ec   :  { %v8361_v5 = vrot.slane %v8347_v38, %v13360_v39  ;;  %v1800_v53 = vrot.slane %v1785_v34, %v13360_v39  ;;  %v1832_v49 = vrot.slane %v1817_v56, %v13360_v39  ;;  %v1807_v42 = vrot.slane %v1786_v12, %v13360_v39  ;;  %12904 = vmatprep.subr.mxu1 %v16865_v55 }
 0x2ed   :  { %v8047_v30 = vrot.slane %v8040_v28, %v13360_v39  ;;  %v8370_v22 = vrot.slane %v8363_v37, %v13360_v39  ;;  %v1846_v27 = vrot.slane %v1825_v57, %v13360_v39  ;;  %12905 = vmatpush3.msra.mxu1 %v8464_v63  ;;  %v1824_v38 = vrot.slane %v1810_v2, %v13360_v39  ;;  %v16923_v28 = vld [vmem:[#allocation16_spill] sm:$0xff] }
 0x2ee   :  { %v8362_v4 = vcombine.low %v8354_v21, %v8361_v5  ;;  %v1847_v60 = vcombine.high %v1832_v49, %v1832_v49  ;;  %v5445_v17 = vcombine.low %v1800_v53, %v1832_v49  ;;  %v5443_v13 = vcombine.low %v1793_v45, %v1807_v42  ;;  %12906 = vmatprep.subr.mxu1 %v16865_v55 }
 0x2ef   :  { %8060 = vrot.lane.b32.xlu0 %v8047_v30, %s13042_s17  ;;  %v8377_v18 = vrot.slane %v8370_v22, %v13360_v39  ;;  %v12658_v48 = vcombine.high %v1793_v45, %v1807_v42  ;;  %v1848_v21 = vcombine.high %v1846_v27, %v1846_v27  ;;  %v1895_v37 = vrot.slane %v16923_v28, %v13360_v39  ;;  %v15541_v30 = vpop.permute.xlu1 %7722  ;;  %v15543_v22 = vpop.permute.xlu0 %6732 }
 0x2f0   :  { %8388 = vrot.lane.b32.xlu1 %v8362_v4, %s13043_s18  ;;  %v5446_v23 = vcombine.low %v1846_v27, %v1847_v60  ;;  %v5453_v20 = vrot.slane %v5443_v13, %v13360_v39  ;;  %v5467_v9 = vrot.slane %v5445_v17, %v13360_v39  ;;  %v1849_v35 = vcombine.high %v15021_v15, %v15021_v15  ;;  %v16924_v17 = vld [vmem:[#allocation17_spill] sm:$0xff] }
 0x2f1   :  { %v5460_v6 = vrot.slane %v12658_v48, %v13360_v39  ;;  %v1856_v5 = vrot.slane %v15021_v15, %v13360_v39  ;;  %v1839_v41 = vrot.slane %v1824_v38, %v13360_v39  ;;  %v1910_v56 = vrot.slane %v1895_v37, %v13360_v39  ;;  %12907 = vmatpush3.msra.mxu1 %v8463_v40 }
 0x2f2   :  { %v5474_v61 = vrot.slane %v5446_v23, %v13360_v39  ;;  %v1863_v15 = vrot.slane %v1849_v35, %v13360_v39  ;;  %12908 = vmatprep.subr.mxu1 %v16865_v55  ;;  %v1903_v42 = vcombine.high %v1895_v37, %v1895_v37  ;;  %v1934_v13 = vrot.slane %v16924_v17, %v13360_v39 }
 0x2f3   :  { %v5475_v24 = vcombine.low %v5453_v20, %v5460_v6  ;;  %v1864_v12 = vcombine.high %v1856_v5, %v1856_v5  ;;  %v5492_v50 = vcombine.low %v1848_v21, %v1839_v41  ;;  %v1871_v53 = vrot.slane %v1856_v5, %v13360_v39  ;;  %12909 = vmatpush3.msra.mxu1 %v8462_v54  ;;  %v15561_v20 = vpop.permute.xlu1 %8052  ;;  %v15563_v6 = vpop.permute.xlu0 %7062 }
 0x2f4   :  { %8390 = vrot.lane.b32.xlu1 %v8377_v18, %s13043_s18  ;;  %v5476_v34 = vcombine.low %v5467_v9, %v5474_v61  ;;  %v1878_v57 = vrot.slane %v1863_v15, %v13360_v39  ;;  %v1888_v18 = vcombine.high %v16923_v28, %v16923_v28  ;;  %12931 = vmatprep.subr.mxu1 %v16865_v55 }
 0x2f5   :  { %v5483_v4 = vrot.slane %v5475_v24, %v13360_v39  ;;  %v1885_v49 = vrot.slane %v1864_v12, %v13360_v39  ;;  %v5502_v27 = vrot.slane %v5492_v50, %v13360_v39  ;;  %v1925_v60 = vcombine.high %v1910_v56, %v1910_v56 }
 0x2f6   :  { %v5490_v45 = vrot.slane %v5476_v34, %v13360_v39  ;;  %v5495_v23 = vcombine.low %v1878_v57, %v1910_v56  ;;  %v1902_v2 = vrot.slane %v1888_v18, %v13360_v39  ;;  %v1924_v40 = vrot.slane %v1903_v42, %v13360_v39 }
 0x2f7   :  { %v5493_v48 = vcombine.low %v1871_v53, %v1885_v49  ;;  %v12659_v63 = vcombine.high %v1871_v53, %v1885_v49  ;;  %v1942_v61 = vcombine.high %v1934_v13, %v1934_v13  ;;  %v1949_v38 = vrot.slane %v1934_v13, %v13360_v39  ;;  %v15587_v49 = vpop.permute.xlu1 %8382  ;;  %v16925_v13 = vld [vmem:[#allocation18_spill] sm:$0xff] }
 0x2f8   :  { %v5491_v29 = vcombine.low %v5483_v4, %v5490_v45  ;;  %v5523_v24 = vrot.slane %v5495_v23, %v13360_v39  ;;  %v1917_v5 = vrot.slane %v1902_v2, %v13360_v39  ;;  %v1973_v23 = vrot.slane %v16925_v13, %v13360_v39  ;;  %v16926_v2 = vld [vmem:[#allocation19_spill] sm:$0xff] }
 0x2f9   :  { %v5509_v28 = vrot.slane %v5493_v48, %v13360_v39  ;;  %v5516_v37 = vrot.slane %v12659_v63, %v13360_v39  ;;  %v1963_v54 = vrot.slane %v1942_v61, %v13360_v39  ;;  %v1966_v48 = vcombine.high %v16925_v13, %v16925_v13 }
 0x2fa   :  { %v8399_v9 = vsel %vm234_vm2, %v5491_v29, %v15346_v19  ;;  %v1926_v19 = vcombine.high %v1924_v40, %v1924_v40 }
 0x2fb   :  { %v8407_v21 = vsel %vm8406_vm7, %v8399_v9, %v15371_v52  ;;  %v5524_v41 = vcombine.low %v5502_v27, %v5509_v28  ;;  %v5525_v56 = vcombine.low %v5516_v37, %v5523_v24  ;;  %v5541_v52 = vcombine.low %v1924_v40, %v1925_v60 }
 0x2fc   :  { %v8415_v35 = vsel %vm8414_vm8, %v8407_v21, %v15275_v10  ;;  %v5542_v15 = vcombine.low %v1926_v19, %v1917_v5  ;;  %v5543_v12 = vcombine.low %v1949_v38, %v1963_v54  ;;  %v12660_v45 = vcombine.high %v1949_v38, %v1963_v54  ;;  %v15622_v5 = vpop.permute.xlu1 %7394 }
 0x2fd   :  { %v8423_v34 = vsel %vm8422_vm10, %v8415_v35, %v15301_v25  ;;  %v5532_v50 = vrot.slane %v5524_v41, %v13360_v39  ;;  %v5539_v53 = vrot.slane %v5525_v56, %v13360_v39  ;;  %v5551_v57 = vrot.slane %v5541_v52, %v13360_v39  ;;  %v15589_v25 = vpop.permute.xlu0 %6074 }
 0x2fe   :  { %v8431_v4 = vsel %vm8430_vm9, %v8423_v34, %v15324_v16  ;;  %v5558_v16 = vrot.slane %v5542_v15, %v13360_v39  ;;  %v5565_v42 = vrot.slane %v5543_v12, %v13360_v39  ;;  %v5572_v29 = vrot.slane %v12660_v45, %v13360_v39 }
 0x2ff   :  { %v8439_v10 = vsel %vm8438_vm11, %v8431_v4, %v15348_v3  ;;  %v5540_v27 = vcombine.low %v5532_v50, %v5539_v53  ;;  %v1927_v60 = vcombine.high %v16924_v17, %v16924_v17  ;;  %v2012_v9 = vrot.slane %v16926_v2, %v13360_v39 }
 0x300   :  { %v8447_v18 = vsel %vm8446_vm12, %v8439_v10, %v15373_v8  ;;  %v5573_v63 = vcombine.low %v5551_v57, %v5558_v16  ;;  %v5574_v8 = vcombine.low %v5565_v42, %v5572_v29  ;;  %v1980_v40 = vrot.slane %v1966_v48, %v13360_v39 }
 0x301   :  { %v8455_v3 = vsel %vm8454_vm13, %v8447_v18, %v15393_v32  ;;  %v8400_v32 = vsel %vm234_vm2, %v5540_v27, %v15395_v31  ;;  %v1941_v17 = vrot.slane %v1927_v60, %v13360_v39  ;;  %v1981_v28 = vcombine.high %v1973_v23, %v1973_v23  ;;  %v6405_v19 = vpop.permute.xlu0 %6404 }
 0x302   :  { %12911 = vmatmul.mubr.msk.f32.vlgmr.msra.gmra.mxu1 %vm8472_vm14, %v8455_v3  ;;  %v8408_v61 = vsel %vm8406_vm7, %v8400_v32, %v15420_v36  ;;  %v5581_v38 = vrot.slane %v5573_v63, %v13360_v39  ;;  %v5588_v21 = vrot.slane %v5574_v8, %v13360_v39  ;;  %v1988_v24 = vrot.slane %v1973_v23, %v13360_v39 }
 0x303   :  { %12913 = vmatprep.mubr.msk.f32.mxu1 %vm13034_vm0, %v16865_v55  ;;  %v8416_v37 = vsel %vm8414_vm8, %v8408_v61, %v15444_v1  ;;  %v1956_v31 = vrot.slane %v1941_v17, %v13360_v39  ;;  %v1995_v35 = vrot.slane %v1980_v40, %v13360_v39  ;;  %v2002_v34 = vrot.slane %v1981_v28, %v13360_v39 }
 0x304   :  { %v8424_v36 = vsel %vm8422_vm10, %v8416_v37, %v15465_v33  ;;  %v5589_v54 = vcombine.low %v5581_v38, %v5588_v21  ;;  %v2020_v41 = vcombine.high %v2012_v9, %v2012_v9  ;;  %v2003_v1 = vcombine.high %v1988_v24, %v1988_v24 }
 0x305   :  { %v8432_v56 = vsel %vm8430_vm9, %v8424_v36, %v15418_v44  ;;  %v15630_v52 = vrot.slane %v2012_v9, %v13360_v39  ;;  %v5590_v4 = vcombine.low %v1956_v31, %v1988_v24  ;;  %v2004_v45 = vcombine.high %v2002_v34, %v2002_v34  ;;  %v6735_v42 = vpop.permute.xlu0 %6734 }
 0x306   :  { %v8440_v15 = vsel %vm8438_vm11, %v8432_v56, %v15442_v26  ;;  %v8401_v12 = vsel %vm234_vm2, %v5589_v54, %v15483_v58  ;;  %v2041_v33 = vrot.slane %v2020_v41, %v13360_v39  ;;  %v5591_v50 = vcombine.low %v2002_v34, %v2003_v1 }
 0x307   :  { %v8448_v10 = vsel %vm8446_vm12, %v8440_v15, %v15463_v59  ;;  %v8409_v44 = vsel %vm8406_vm7, %v8401_v12, %v15511_v43  ;;  %v5600_v53 = vrot.slane %v5590_v4, %v13360_v39  ;;  %v5592_v18 = vcombine.low %v2004_v45, %v1995_v35  ;;  %v7725_v43 = vpop.permute.xlu1 %7724 }
 0x308   :  { %v8456_v57 = vsel %vm8454_vm13, %v8448_v10, %v15481_v14  ;;  %v8417_v26 = vsel %vm8414_vm8, %v8409_v44, %v15543_v22  ;;  %v5593_v58 = vcombine.low %v15630_v52, %v2041_v33  ;;  %v5607_v16 = vrot.slane %v5591_v50, %v13360_v39 }
 0x309   :  { %12914 = vmatmul.mubr.msk.f32.gmra.mxu1 %vm8472_vm14, %v8456_v57  ;;  %v8425_v59 = vsel %vm8422_vm10, %v8417_v26, %v15563_v6  ;;  %v5614_v14 = vrot.slane %v5592_v18, %v13360_v39  ;;  %v2051_v22 = vrot.slane %v15101_v51, %v13360_v39  ;;  %v2005_v60 = vcombine.high %v16926_v2, %v16926_v2  ;;  %v7065_v32 = vpop.permute.xlu0 %7064 }
 0x30a   :  { %v8433_v29 = vsel %vm8430_vm9, %v8425_v59, %v15509_v46  ;;  %v5621_v3 = vrot.slane %v5593_v58, %v13360_v39  ;;  %12916 = vmatprep.mubr.msk.f32.mxu1 %vm13034_vm0, %v16865_v55  ;;  %v5622_v27 = vcombine.low %v5600_v53, %v5607_v16  ;;  %v2044_v46 = vcombine.high %v15101_v51, %v15101_v51 }
 0x30b   :  { %v8441_v6 = vsel %vm8438_vm11, %v8433_v29, %v15541_v30  ;;  %v2059_v63 = vcombine.high %v2051_v22, %v2051_v22  ;;  %v8055_v2 = vpop.permute.xlu1 %8054  ;;  %v2019_v51 = vrot.slane %v2005_v60, %v13360_v39 }
 0x30c   :  { %v8449_v13 = vsel %vm8446_vm12, %v8441_v6, %v15561_v20  ;;  %v5623_v48 = vcombine.low %v5614_v14, %v5621_v3  ;;  %v5630_v23 = vrot.slane %v5622_v27, %v13360_v39  ;;  %v2058_v17 = vrot.slane %v2044_v46, %v13360_v39 }
 0x30d   :  { %v8457_v8 = vsel %vm8454_vm13, %v8449_v13, %v15587_v49  ;;  %v2080_v30 = vrot.slane %v2059_v63, %v13360_v39  ;;  %v2066_v20 = vrot.slane %v2051_v22, %v13360_v39  ;;  %v2034_v21 = vrot.slane %v2019_v51, %v13360_v39  ;;  %v6077_v54 = vpop.permute.xlu0 %6076 }
 0x30e   :  { %v5637_v9 = vrot.slane %v5623_v48, %v13360_v39  ;;  %12917 = vmatmul.mubr.msk.f32.gmra.mxu1 %vm8472_vm14, %v8457_v8  ;;  %v2073_v28 = vrot.slane %v2058_v17, %v13360_v39  ;;  %v2083_v6 = vcombine.high %v15137_v0, %v15137_v0  ;;  %v2090_v27 = vrot.slane %v15137_v0, %v13360_v39  ;;  %v16927_v48 = vld [vmem:[#allocation5_spill] sm:$0xff] }
 0x30f   :  { %12919 = vmatprep.mubr.msk.f32.mxu1 %vm13034_vm0, %v16865_v55  ;;  %v2082_v40 = vcombine.high %v2080_v30, %v2080_v30  ;;  %v2081_v37 = vcombine.high %v2066_v20, %v2066_v20  ;;  %v8385_v35 = vpop.permute.xlu1 %8384  ;;  %v2129_v63 = vrot.slane %v16927_v48, %v13360_v39 }
 0x310   :  { %v5638_v49 = vcombine.low %v5630_v23, %v5637_v9  ;;  %v2097_v8 = vrot.slane %v2083_v6, %v13360_v39  ;;  %v2098_v23 = vcombine.high %v2090_v27, %v2090_v27  ;;  %v2105_v51 = vrot.slane %v2090_v27, %v13360_v39 }
 0x311   :  { %v5642_v36 = vcombine.low %v2082_v40, %v2073_v28  ;;  %v5641_v56 = vcombine.low %v2080_v30, %v2081_v37  ;;  %v6407_v44 = vpop.permute.xlu0 %6406  ;;  %v2137_v9 = vcombine.high %v2129_v63, %v2129_v63  ;;  %v2144_v30 = vrot.slane %v2129_v63, %v13360_v39 }
 0x312   :  { %v8402_v61 = vsel %vm234_vm2, %v5638_v49, %v15589_v25  ;;  %v12661_v25 = vcombine.high %v15630_v52, %v2041_v33  ;;  %v2112_v0 = vrot.slane %v2097_v8, %v13360_v39 }
 0x313   :  { %v8410_v38 = vsel %vm8406_vm7, %v8402_v61, %v6405_v19  ;;  %v5640_v19 = vcombine.low %v2034_v21, %v2066_v20  ;;  %v5670_v15 = vrot.slane %v5642_v36, %v13360_v39  ;;  %v7397_v10 = vpop.permute.xlu1 %7396  ;;  %v2159_v17 = vcombine.high %v2144_v30, %v2144_v30 }
 0x314   :  { %v8418_v31 = vsel %vm8414_vm8, %v8410_v38, %v6735_v42  ;;  %v5649_v12 = vrot.slane %v12661_v25, %v13360_v39  ;;  %v5690_v40 = vcombine.low %v2112_v0, %v2144_v30 }
 0x315   :  { %v8426_v24 = vsel %vm8422_vm10, %v8418_v31, %v7065_v32  ;;  %v5656_v45 = vrot.slane %v5640_v19, %v13360_v39  ;;  %v2158_v32 = vrot.slane %v2137_v9, %v13360_v39  ;;  %v2122_v31 = vcombine.high %v16927_v48, %v16927_v48 }
 0x316   :  { %v8434_v34 = vsel %vm8430_vm9, %v8426_v24, %v15622_v5  ;;  %v5663_v5 = vrot.slane %v5641_v56, %v13360_v39  ;;  %v5712_v37 = vrot.slane %v5690_v40, %v13360_v39 }
 0x317   :  { %v8442_v41 = vsel %vm8438_vm11, %v8434_v34, %v7725_v43  ;;  %v5671_v33 = vcombine.low %v5649_v12, %v5656_v45  ;;  %v5691_v38 = vcombine.low %v2158_v32, %v2159_v17  ;;  %v2136_v34 = vrot.slane %v2122_v31, %v13360_v39 }
 0x318   :  { %v8450_v1 = vsel %vm8446_vm12, %v8442_v41, %v8055_v2  ;;  %v5672_v52 = vcombine.low %v5663_v5, %v5670_v15  ;;  %v7727_v53 = vpop.permute.xlu1 %7726  ;;  %v2119_v2 = vrot.slane %v2098_v23, %v13360_v39  ;;  %v2160_v41 = vcombine.high %v2158_v32, %v2158_v32 }
 0x319   :  { %v8458_v4 = vsel %vm8454_vm13, %v8450_v1, %v8385_v35  ;;  %v5679_v26 = vrot.slane %v5671_v33, %v13360_v39  ;;  %v5719_v24 = vrot.slane %v5691_v38, %v13360_v39 }
 0x31a   :  { %12920 = vmatmul.mubr.msk.f32.gmra.mxu1 %vm8472_vm14, %v8458_v4  ;;  %v5686_v50 = vrot.slane %v5672_v52, %v13360_v39  ;;  %v5688_v20 = vcombine.low %v2105_v51, %v2119_v2  ;;  %v12662_v49 = vcombine.high %v2105_v51, %v2119_v2  ;;  %v2151_v4 = vrot.slane %v2136_v34, %v13360_v39 }
 0x31b   :  { %12922 = vmatprep.mubr.msk.f32.mxu1 %vm13034_vm0, %v16865_v55 }
 0x31c   :  { %v5687_v18 = vcombine.low %v5679_v26, %v5686_v50  ;;  %v5698_v21 = vrot.slane %v5688_v20, %v13360_v39  ;;  %v5705_v28 = vrot.slane %v12662_v49, %v13360_v39  ;;  %v5737_v15 = vcombine.low %v2160_v41, %v2151_v4 }
 0x31e   :  { %v6737_v57 = vpop.permute.xlu0 %6736  ;;  %v8403_v58 = vsel %vm234_vm2, %v5687_v18, %v6077_v54  ;;  %v5720_v36 = vcombine.low %v5698_v21, %v5705_v28  ;;  %v5721_v54 = vcombine.low %v5712_v37, %v5719_v24  ;;  %v5744_v52 = vrot.slane %v5737_v15, %v13360_v39 }
 0x31f   :  { %v8411_v43 = vsel %vm8406_vm7, %v8403_v58, %v6407_v44 }
 0x320   :  { %v8419_v42 = vsel %vm8414_vm8, %v8411_v43, %v6737_v57  ;;  %v5728_v25 = vrot.slane %v5720_v36, %v13360_v39  ;;  %v5735_v19 = vrot.slane %v5721_v54, %v13360_v39 }
 0x322   :  { %v5736_v12 = vcombine.low %v5728_v25, %v5735_v19 }
 0x324   :  { %v8057_v59 = vpop.permute.xlu1 %8056 }
 0x32b   :  { %v7067_v16 = vpop.permute.xlu0 %7066 }
 0x32c   :  { %v8427_v29 = vsel %vm8422_vm10, %v8419_v42, %v7067_v16  ;;  %v15705_v3 = vpop.permute.xlu1 %7730 }
 0x32d   :  { %v8435_v14 = vsel %vm8430_vm9, %v8427_v29, %v7397_v10 }
 0x32e   :  { %v8443_v22 = vsel %vm8438_vm11, %v8435_v14, %v7727_v53  ;;  %v5751_v53 = vrot.slane %v5744_v52, %v13360_v39 }
 0x32f   :  { %v8451_v46 = vsel %vm8446_vm12, %v8443_v22, %v8057_v59  ;;  %v6079_v61 = vpop.permute.xlu0 %6078 }
 0x330   :  { %v8404_v45 = vsel %vm234_vm2, %v5736_v12, %v6079_v61  ;;  %v8405_v58 = vsel %vm234_vm2, %v5751_v53, %v15247_v47 }
 0x331   :  { %v8413_v59 = vsel %vm8406_vm7, %v8405_v58, %v15273_v62 }
 0x332   :  { %v8421_v43 = vsel %vm8414_vm8, %v8413_v59, %v15299_v11 }
 0x333   :  { %v8429_v42 = vsel %vm8422_vm10, %v8421_v43, %v15322_v7 }
 0x338   :  { %v8387_v60 = vpop.permute.xlu1 %8386 }
 0x339   :  { %v8459_v13 = vsel %vm8454_vm13, %v8451_v46, %v8387_v60 }
 0x33a   :  { %12923 = vmatmul.mubr.msk.f32.gmra.mxu1 %vm8472_vm14, %v8459_v13  ;;  %v12703_v13 = vld [vmem:[%s16814_s6] ss:$0 sm:$0xff] }
 0x33b   :  { %12925 = vmatprep.mubr.msk.f32.mxu1 %vm13034_vm0, %v16865_v55 }
 0x33c   :  { %v6409_v35 = vpop.permute.xlu0 %6408 }
 0x33d   :  { %v8412_v44 = vsel %vm8406_vm7, %v8404_v45, %v6409_v35 }
 0x343   :  { %v7399_v56 = vpop.permute.xlu1 %7398 }
 0x349   :  { %v6739_v1 = vpop.permute.xlu0 %6738 }
 0x34a   :  { %v8420_v33 = vsel %vm8414_vm8, %v8412_v44, %v6739_v1 }
 0x34d   :  { %v7729_v5 = vpop.permute.xlu1 %7728 }
 0x354   :  { %v7069_v10 = vpop.permute.xlu0 %7068 }
 0x355   :  { %v8428_v50 = vsel %vm8422_vm10, %v8420_v33, %v7069_v10 }
 0x356   :  { %v8436_v57 = vsel %vm8430_vm9, %v8428_v50, %v7399_v56 }
 0x357   :  { %v8444_v16 = vsel %vm8438_vm11, %v8436_v57, %v7729_v5 }
 0x359   :  { %v7401_v18 = vpop.permute.xlu0 %7400 }
 0x35a   :  { %v8059_v26 = vpop.permute.xlu1 %8058  ;;  %v8437_v14 = vsel %vm8430_vm9, %v8429_v42, %v7401_v18 }
 0x35b   :  { %v8452_v29 = vsel %vm8446_vm12, %v8444_v16, %v8059_v26  ;;  %v8445_v47 = vsel %vm8438_vm11, %v8437_v14, %v15705_v3 }
 0x361   :  { %v8061_v27 = vpop.permute.xlu0 %8060 }
 0x362   :  { %v8389_v22 = vpop.permute.xlu1 %8388  ;;  %v8453_v62 = vsel %vm8446_vm12, %v8445_v47, %v8061_v27 }
 0x363   :  { %v8460_v6 = vsel %vm8454_vm13, %v8452_v29, %v8389_v22 }
 0x364   :  { %12926 = vmatmul.mubr.msk.f32.gmra.mxu1 %vm8472_vm14, %v8460_v6 }
 0x365   :  { %12928 = vmatprep.mubr.msk.f32.mxu1 %vm13034_vm0, %v16865_v55 }
 0x366   :  { %v8391_v11 = vpop.permute.xlu1 %8390 }
 0x367   :  { %v8461_v7 = vsel %vm8454_vm13, %v8453_v62, %v8391_v11 }
 0x368   :  { %12929 = vmatmul.mubr.msk.f32.gmra.mxu1 %vm8472_vm14, %v8461_v7 }
 0x369   :  { %12941 = vmatprep.mubr.msk.f32.mxu1 %vm13034_vm0, %v16865_v55 }
 0x3c2   :  { %v8564_v60 = vpop.f32.mrf.mxu1 }
 0x3c3   :  { %v8565_v3 = vadd.f32 %v12703_v13, %v8564_v60 }
 0x3c4   :  { %v12912_v46 = vpop.f32.mrf.mxu1 }
 0x3c5   :  { %v8600_v23 = vsel %vm234_vm2, %v8565_v3, 0.0 }
 0x3c9   :  { %v8569_v48 = vpop.f32.mrf.mxu1 }
 0x3ca   :  { %v8570_v63 = vadd.f32 %v12703_v13, %v8569_v48 }
 0x3cb   :  { %v12915_v8 = vpop.f32.mrf.mxu1 }
 0x3cc   :  { %v8601_v9 = vsel %vm234_vm2, %v8570_v63, 0.0 }
 0x3cd   :  { %v8602_v30 = vadd.f32 %v8601_v9, %v8600_v23 }
 0x3ce   :  { %v8574_v0 = vpop.f32.mrf.mxu1 }
 0x3cf   :  { %v8575_v2 = vadd.f32 %v12703_v13, %v8574_v0  ;;  %v12757_v0 = vld.sshfl [vmem:[#allocation2 + $0x60] sm:$0x13 pattern:$0x75316420] }
 0x3d0   :  { %v12918_v32 = vpop.f32.mrf.mxu1 }
 0x3d1   :  { %v8603_v51 = vsel %vm234_vm2, %v8575_v2, 0.0 }
 0x3d2   :  { %v8604_v17 = vadd.f32 %v8603_v51, %v8602_v30  ;;  %v12769_v51 = vld.sshfl [vmem:[#allocation2 + $0x64] sm:$0x13 pattern:$0x75316420] }
 0x3da   :  { %v8579_v20 = vpop.f32.mrf.mxu1 }
 0x3db   :  { %v8580_v49 = vadd.f32 %v12703_v13, %v8579_v20  ;;  %v12731_v20 = vld.sshfl [vmem:[#allocation2 + $0x4] sm:$0x13 pattern:$0x75316420] }
 0x3dc   :  { %v12921_v40 = vpop.f32.mrf.mxu1 }
 0x3dd   :  { %v8605_v61 = vsel %vm234_vm2, %v8580_v49, 0.0  ;;  %v12760_v40 = vld.sshfl [vmem:[#allocation2 + $0xf0] sm:$0x13 pattern:$0x75316420] }
 0x3de   :  { %v8606_v38 = vadd.f32 %v8605_v61, %v8604_v17  ;;  %v12725_v61 = vld.sshfl [vmem:[#allocation2 + $0x2] sm:$0x13 pattern:$0x75316420] }
 0x3fa   :  { %v8584_v21 = vpop.f32.mrf.mxu1 }
 0x3fb   :  { %v8585_v37 = vadd.f32 %v12703_v13, %v8584_v21 }
 0x3fc   :  { %v12924_v28 = vpop.f32.mrf.mxu1 }
 0x3fd   :  { %v8607_v24 = vsel %vm234_vm2, %v8585_v37, 0.0  ;;  %v12728_v28 = vld.sshfl [vmem:[#allocation2 + $0x92] sm:$0x13 pattern:$0x75316420] }
 0x3fe   :  { %v8608_v34 = vadd.f32 %v8607_v24, %v8606_v38  ;;  %v10497_v38 = vcombine.high %v12760_v40, %v12760_v40 }
 0x424   :  { %v8589_v31 = vpop.f32.mrf.mxu1 }
 0x425   :  { %v8590_v35 = vadd.f32 %v12703_v13, %v8589_v31  ;;  %v12734_v31 = vld.sshfl [vmem:[#allocation2 + $0x94] sm:$0x13 pattern:$0x75316420] }
 0x426   :  { %v12927_v36 = vpop.f32.mrf.mxu1 }
 0x427   :  { %v8609_v54 = vsel %vm234_vm2, %v8590_v35, 0.0  ;;  %v10428_v36 = vcombine.high %v12757_v0, %v12757_v0 }
 0x428   :  { %v8594_v41 = vpop.f32.mrf.mxu1  ;;  %v8610_v19 = vadd.f32 %v8609_v54, %v8608_v34  ;;  %v15812_v54 = vrot.slane %v12760_v40, %v13360_v39 }
 0x429   :  { %v8595_v25 = vadd.f32 %v12703_v13, %v8594_v41  ;;  %v9701_v41 = vcombine.high %v12728_v28, %v12728_v28 }
 0x42a   :  { %v12930_v56 = vpop.f32.mrf.mxu1 }
 0x42b   :  { %v8611_v1 = vsel %vm258_vm3, %v8595_v25, 0.0  ;;  %v10512_v56 = vcombine.high %v15812_v54, %v15812_v54 }
 0x42c   :  { %v8612_v4 = vadd.f32 %v8611_v1, %v8610_v19  ;;  %v10511_v19 = vrot.slane %v10497_v38, %v13360_v39  ;;  %v9851_v1 = vcombine.high %v12734_v31, %v12734_v31 }
 0x42e   :  { %v8613_v15 = vrot.slane %v8612_v4, 4 }
 0x430   :  { %v8614_v12 = vadd.f32 %v8613_v15, %v8612_v4  ;;  %v15821_v4 = vrot.slane %v12734_v31, %v13360_v39  ;;  %v10728_v15 = vcombine.high %v12769_v51, %v12769_v51 }
 0x432   :  { %v8615_v45 = vrot.slane %v8614_v12, 2 }
 0x434   :  { %v8616_v5 = vadd.f32 %v8615_v45, %v8614_v12 }
 0x436   :  { %v8617_v10 = vrot.slane %v8616_v5, 1 }
 0x438   :  { %v8618_v44 = vadd.f32 %v8617_v10, %v8616_v5  ;;  %v10442_v5 = vrot.slane %v10428_v36, %v13360_v39 }
 0x43a   :  { %v8620_v52 = vmul.f32 0.02, %v8618_v44  ;;  %v9715_v44 = vrot.slane %v9701_v41, %v13360_v39 }
 0x43c   :  { %v15774_v33 = vsub.f32 %v8565_v3, %v8620_v52  ;;  %v15776_v50 = vsub.f32 %v8570_v63, %v8620_v52  ;;  %v15778_v53 = vsub.f32 %v8575_v2, %v8620_v52  ;;  %v15780_v57 = vsub.f32 %v8580_v49, %v8620_v52  ;;  %v12763_v2 = vld.sshfl [vmem:[#allocation2 + $0x62] sm:$0x13 pattern:$0x75316420] }
 0x43d   :  { %v15782_v26 = vsub.f32 %v8585_v37, %v8620_v52  ;;  %v15790_v16 = vsub.f32 %v8590_v35, %v8620_v52  ;;  %v15796_v22 = vsub.f32 %v8595_v25, %v8620_v52  ;;  %12222 = vst.msk [vmem:[#allocation2 + $0x60] sm:$0xff] %vm234_vm2, %v16865_v55  ;;  %v9782_v37 = vcombine.high %v12731_v20, %v12731_v20 }
 0x43e   :  { %v8628_v18 = vmul.f32 %v15774_v33, %v15774_v33  ;;  %v8629_v58 = vmul.f32 %v15776_v50, %v15776_v50  ;;  %v8630_v59 = vmul.f32 %v15778_v53, %v15778_v53  ;;  %v8631_v43 = vmul.f32 %v15780_v57, %v15780_v57 }
 0x43f   :  { %v8632_v6 = vmul.f32 %v15782_v26, %v15782_v26  ;;  %v8633_v62 = vmul.f32 %v15790_v16, %v15790_v16  ;;  %v8634_v60 = vmul.f32 %v15796_v22, %v15796_v22  ;;  %v9632_v35 = vcombine.high %v12725_v61, %v12725_v61 }
 0x440   :  { %v8635_v42 = vsel %vm234_vm2, %v8628_v18, 0.0  ;;  %v8636_v29 = vsel %vm234_vm2, %v8629_v58, 0.0  ;;  %v8638_v27 = vsel %vm234_vm2, %v8630_v59, 0.0  ;;  %v8640_v11 = vsel %vm234_vm2, %v8631_v43, 0.0 }
 0x441   :  { %v8637_v14 = vadd.f32 %v8636_v29, %v8635_v42  ;;  %v8642_v46 = vsel %vm234_vm2, %v8632_v6, 0.0  ;;  %v8644_v3 = vsel %vm234_vm2, %v8633_v62, 0.0  ;;  %v8646_v63 = vsel %vm258_vm3, %v8634_v60, 0.0 }
 0x442   :  { %v10578_v34 = vcombine.high %v12763_v2, %v12763_v2  ;;  %v15815_v25 = vrot.slane %v12728_v28, %v13360_v39  ;;  %v9796_v12 = vrot.slane %v9782_v37, %v13360_v39  ;;  %v9646_v45 = vrot.slane %v9632_v35, %v13360_v39 }
 0x443   :  { %v8639_v47 = vadd.f32 %v8638_v27, %v8637_v14  ;;  %v11637_v18 = vcombine.low %v10511_v19, %v10512_v56  ;;  %v9865_v58 = vrot.slane %v9851_v1, %v13360_v39  ;;  %v9866_v59 = vcombine.high %v15821_v4, %v15821_v4  ;;  %v15905_v19 = vld.sshfl [vmem:[#allocation2 + $0xf4] sm:$0x13 pattern:$0x75316420] }
 0x444   :  { %v10592_v10 = vrot.slane %v10578_v34, %v13360_v39  ;;  %v9716_v52 = vcombine.high %v15815_v25, %v15815_v25  ;;  %v15834_v43 = vrot.slane %v12731_v20, %v13360_v39  ;;  %v15837_v42 = vrot.slane %v12725_v61, %v13360_v39  ;;  %v12712_v20 = vld [vmem:[%s16811_s3 + $0x1] ss:$0 sm:$0xff]  ;;  %16928 = vst [vmem:[#allocation10_spill] sm:$0xff] %v15905_v19 }
 0x445   :  { %v8641_v7 = vadd.f32 %v8640_v11, %v8639_v47  ;;  %v15840_v29 = vrot.slane %v12757_v0, %v13360_v39  ;;  %v10742_v14 = vrot.slane %v10728_v15, %v13360_v39  ;;  %v15844_v6 = vrot.slane %v12763_v2, %v13360_v39 }
 0x446   :  { %v11051_v27 = vcombine.low %v15834_v43, %v9796_v12  ;;  %v10929_v47 = vcombine.low %v15837_v42, %v9646_v45  ;;  %v15850_v11 = vrot.slane %v12769_v51, %v13360_v39  ;;  %v15853_v60 = vcombine.low %v9715_v44, %v9716_v52 }
 0x447   :  { %v8643_v13 = vadd.f32 %v8642_v46, %v8641_v7  ;;  %v11542_v62 = vcombine.low %v15840_v29, %v10442_v5  ;;  %v11664_v7 = vcombine.low %v15844_v6, %v10592_v10  ;;  %v11644_v46 = vrot.slane %v11637_v18, %v13360_v39 }
 0x449   :  { %v8645_v48 = vadd.f32 %v8644_v3, %v8643_v13  ;;  %v15856_v13 = vcombine.low %v9865_v58, %v9866_v59  ;;  %v11786_v3 = vcombine.low %v15850_v11, %v10742_v14  ;;  %v15873_v0 = vrot.slane %v11664_v7, %v13360_v39 }
 0x44b   :  { %v8647_v8 = vadd.f32 %v8646_v63, %v8645_v48  ;;  %v12766_v63 = vld.sshfl [vmem:[#allocation2 + $0xf2] sm:$0x13 pattern:$0x75316420] }
 0x44c   :  { %v15893_v38 = vrot.slane %v12766_v63, %v13360_v39  ;;  %v10647_v41 = vcombine.high %v12766_v63, %v12766_v63  ;;  %12240 = vst.msk [vmem:[#allocation2 + $0xf0] sm:$0xff] %vm234_vm2, %v16865_v55 }
 0x44d   :  { %v8648_v23 = vrot.slane %v8647_v8, 4 }
 0x44e   :  { %v10661_v12 = vrot.slane %v10647_v41, %v13360_v39  ;;  %v10662_v52 = vcombine.high %v15893_v38, %v15893_v38 }
 0x44f   :  { %v8649_v9 = vadd.f32 %v8648_v23, %v8647_v8  ;;  %v15862_v8 = vrot.slane %v11051_v27, %v13360_v39 }
 0x450   :  { %v15915_v7 = vcombine.low %v10661_v12, %v10662_v52 }
 0x451   :  { %v8650_v30 = vrot.slane %v8649_v9, 2 }
 0x453   :  { %v8651_v32 = vadd.f32 %v8650_v30, %v8649_v9  ;;  %v15867_v9 = vrot.slane %v10929_v47, %v13360_v39  ;;  %v15870_v30 = vrot.slane %v11542_v62, %v13360_v39 }
 0x455   :  { %v8652_v17 = vrot.slane %v8651_v32, 1 }
 0x457   :  { %v8653_v49 = vadd.f32 %v8652_v17, %v8651_v32  ;;  %v15878_v32 = vrot.slane %v11644_v46, %v13360_v39 }
 0x459   :  { %v8654_v21 = vmul.f32 0.02, %v8653_v49  ;;  %v15886_v49 = vrot.slane %v11786_v3, %v13360_v39 }
 0x45b   :  { %v8655_v24 = vadd.f32 1e-05, %v8654_v21 }
 0x45d   :  { %13027 = vrsqrt.f32 %v8655_v24  ;;  %v12713_v24 = vld [vmem:[%s16812_s4 + $0x1] ss:$0 sm:$0xff] }
 0x46a   :  { %v13028_v17 = vpop.eup %13027 }
 0x46b   :  { %v8657_v21 = vmul.f32 %v13028_v17, %v15774_v33  ;;  %v8658_v28 = vmul.f32 %v13028_v17, %v15776_v50  ;;  %v8659_v37 = vmul.f32 %v13028_v17, %v15778_v53  ;;  %v8660_v31 = vmul.f32 %v13028_v17, %v15780_v57 }
 0x46c   :  { %v8661_v35 = vmul.f32 %v13028_v17, %v15782_v26  ;;  %v8662_v36 = vmul.f32 %v13028_v17, %v15790_v16  ;;  %v8663_v34 = vmul.f32 %v13028_v17, %v15796_v22 }
 0x46d   :  { %v8668_v33 = vmul.f32 %v12712_v20, %v8657_v21  ;;  %v8669_v56 = vmul.f32 %v12712_v20, %v8658_v28  ;;  %v8670_v50 = vmul.f32 %v12712_v20, %v8659_v37  ;;  %v8671_v1 = vmul.f32 %v12712_v20, %v8660_v31 }
 0x46e   :  { %v8672_v53 = vmul.f32 %v12712_v20, %v8661_v35  ;;  %v8673_v57 = vmul.f32 %v12712_v20, %v8662_v36  ;;  %v8674_v15 = vmul.f32 %v12712_v20, %v8663_v34 }
 0x46f   :  { %v8679_v26 = vadd.f32 %v12713_v24, %v8668_v33  ;;  %v8680_v45 = vadd.f32 %v12713_v24, %v8669_v56  ;;  %v8681_v16 = vadd.f32 %v12713_v24, %v8670_v50  ;;  %v8682_v5 = vadd.f32 %v12713_v24, %v8671_v1 }
 0x470   :  { %v8683_v22 = vadd.f32 %v12713_v24, %v8672_v53  ;;  %v8684_v10 = vadd.f32 %v12713_v24, %v8673_v57  ;;  %v15910_v44 = vadd.f32 %v12713_v24, %v8674_v15 }
 0x471   :  { %v8686_v18 = vmax.f32 %v8679_v26, 0.0  ;;  %v8687_v58 = vmax.f32 %v8680_v45, 0.0  ;;  %v8688_v59 = vmax.f32 %v8681_v16, 0.0  ;;  %v8689_v14 = vmax.f32 %v8682_v5, 0.0 }
 0x472   :  { %v8690_v27 = vmax.f32 %v8683_v22, 0.0  ;;  %v8691_v47 = vmax.f32 %v8684_v10, 0.0  ;;  %v8692_v62 = vmax.f32 %v15910_v44, 0.0 }
 0x473   :  { %v8700_v46 = vcombine.high %v8686_v18, %v8686_v18  ;;  %v8707_v3 = vrot.slane %v8686_v18, %v13360_v39  ;;  %v8749_v63 = vcombine.high %v8687_v58, %v8687_v58  ;;  %v8756_v17 = vrot.slane %v8687_v58, %v13360_v39 }
 0x474   :  { %v8798_v20 = vcombine.high %v8688_v59, %v8688_v59  ;;  %v8805_v21 = vrot.slane %v8688_v59, %v13360_v39  ;;  %v8847_v28 = vcombine.high %v8689_v14, %v8689_v14  ;;  %v8854_v37 = vrot.slane %v8689_v14, %v13360_v39 }
 0x475   :  { %v8714_v31 = vrot.slane %v8700_v46, %v13360_v39  ;;  %v8715_v24 = vcombine.high %v8707_v3, %v8707_v3  ;;  %v15923_v35 = vrot.slane %v8707_v3, %v13360_v39  ;;  %v8763_v36 = vrot.slane %v8749_v63, %v13360_v39 }
 0x476   :  { %v8764_v34 = vcombine.high %v8756_v17, %v8756_v17  ;;  %v15927_v41 = vrot.slane %v8756_v17, %v13360_v39  ;;  %v8812_v33 = vrot.slane %v8798_v20, %v13360_v39  ;;  %v8813_v56 = vcombine.high %v8805_v21, %v8805_v21 }
 0x477   :  { %v8716_v50 = vcombine.high %v8714_v31, %v8714_v31  ;;  %v15931_v1 = vrot.slane %v8714_v31, %v13360_v39  ;;  %v8737_v53 = vrot.slane %v8715_v24, %v13360_v39  ;;  %v8765_v57 = vcombine.high %v8763_v36, %v8763_v36 }
 0x478   :  { %v15935_v15 = vrot.slane %v8763_v36, %v13360_v39  ;;  %v15938_v12 = vrot.slane %v8764_v34, %v13360_v39  ;;  %v8814_v26 = vcombine.high %v8812_v33, %v8812_v33  ;;  %v15941_v45 = vrot.slane %v8805_v21, %v13360_v39 }
 0x479   :  { %v8744_v16 = vrot.slane %v8716_v50, %v13360_v39  ;;  %v8746_v5 = vcombine.high %v15931_v1, %v15931_v1  ;;  %v15947_v22 = vrot.slane %v8765_v57, %v13360_v39  ;;  %v15950_v10 = vrot.slane %v8812_v33, %v13360_v39 }
 0x47a   :  { %v8795_v52 = vcombine.high %v15935_v15, %v15935_v15  ;;  %v15955_v18 = vrot.slane %v8813_v56, %v13360_v39  ;;  %v15958_v58 = vrot.slane %v8814_v26, %v13360_v39  ;;  %v8843_v59 = vcombine.high %v15941_v45, %v15941_v45 }
 0x47b   :  { %v8748_v14 = vcombine.high %v8744_v16, %v8744_v16  ;;  %v8797_v46 = vcombine.high %v15947_v22, %v15947_v22  ;;  %v8861_v3 = vrot.slane %v8847_v28, %v13360_v39  ;;  %v8862_v63 = vcombine.high %v8854_v37, %v8854_v37 }
 0x47c   :  { %v8845_v17 = vcombine.high %v15955_v18, %v15955_v18  ;;  %v15968_v20 = vrot.slane %v8854_v37, %v13360_v39  ;;  %v8896_v21 = vcombine.high %v8690_v27, %v8690_v27  ;;  %v8903_v31 = vrot.slane %v8690_v27, %v13360_v39 }
 0x47d   :  { %v8863_v24 = vcombine.high %v8861_v3, %v8861_v3  ;;  %v15972_v36 = vrot.slane %v8861_v3, %v13360_v39  ;;  %v15975_v34 = vrot.slane %v8862_v63, %v13360_v39  ;;  %v8945_v33 = vcombine.high %v8691_v47, %v8691_v47 }
 0x47e   :  { %v8892_v28 = vcombine.high %v15968_v20, %v15968_v20  ;;  %v8910_v56 = vrot.slane %v8896_v21, %v13360_v39  ;;  %v8911_v50 = vcombine.high %v8903_v31, %v8903_v31  ;;  %v15981_v37 = vrot.slane %v8903_v31, %v13360_v39 }
 0x47f   :  { %v15984_v57 = vrot.slane %v8863_v24, %v13360_v39  ;;  %v8952_v26 = vrot.slane %v8691_v47, %v13360_v39  ;;  %v8959_v3 = vrot.slane %v8945_v33, %v13360_v39  ;;  %v9052_v23 = vcombine.low %v15923_v35, %v8737_v53 }
 0x480   :  { %v8912_v63 = vcombine.high %v8910_v56, %v8910_v56  ;;  %v15991_v61 = vrot.slane %v8910_v56, %v13360_v39  ;;  %v15994_v21 = vrot.slane %v8911_v50, %v13360_v39  ;;  %v16014_v50 = vrot.slane %v8692_v62, %v13360_v39 }
 0x481   :  { %v8960_v40 = vcombine.high %v8952_v26, %v8952_v26  ;;  %v8961_v24 = vcombine.high %v8959_v3, %v8959_v3  ;;  %v15999_v51 = vrot.slane %v8952_v26, %v13360_v39  ;;  %v16002_v2 = vrot.slane %v8959_v3, %v13360_v39 }
 0x482   :  { %v16005_v47 = vrot.slane %v8912_v63, %v13360_v39  ;;  %v9001_v44 = vcombine.high %v16014_v50, %v16014_v50  ;;  %v9060_v33 = vrot.slane %v9052_v23, %v13360_v39  ;;  %v9074_v63 = vrot.slane %v15931_v1, %v13360_v39 }
 0x483   :  { %v16017_v26 = vrot.slane %v8960_v40, %v13360_v39  ;;  %v16020_v3 = vrot.slane %v8961_v24, %v13360_v39  ;;  %v12714_v40 = vcombine.high %v15923_v35, %v8737_v53  ;;  %v9091_v56 = vcombine.low %v8744_v16, %v8746_v5 }
 0x484   :  { %v16038_v31 = vrot.slane %v9001_v44, %v13360_v39  ;;  %v9092_v27 = vcombine.low %v8748_v14, %v15927_v41  ;;  %v9113_v62 = vrot.slane %v15938_v12, %v13360_v39  ;;  %v9089_v35 = vrot.slane %v9074_v63, %v13360_v39 }
 0x485   :  { %v9067_v48 = vrot.slane %v12714_v40, %v13360_v39  ;;  %v9099_v53 = vrot.slane %v9091_v56, %v13360_v39  ;;  %v12715_v23 = vcombine.high %v15927_v41, %v15938_v12  ;;  %v9131_v1 = vcombine.low %v15935_v15, %v15947_v22 }
 0x486   :  { %v9106_v5 = vrot.slane %v9092_v27, %v13360_v39  ;;  %v9128_v44 = vrot.slane %v9113_v62, %v13360_v39  ;;  %v9152_v14 = vrot.slane %v8795_v52, %v13360_v39  ;;  %v9169_v63 = vcombine.low %v8797_v46, %v15941_v45 }
 0x487   :  { %v9075_v16 = vcombine.low %v9060_v33, %v9067_v48  ;;  %v9138_v40 = vrot.slane %v12715_v23, %v13360_v39  ;;  %v9145_v24 = vrot.slane %v9131_v1, %v13360_v39  ;;  %v9170_v56 = vcombine.low %v15955_v18, %v8843_v59 }
 0x488   :  { %v9114_v12 = vcombine.low %v9099_v53, %v9106_v5  ;;  %v9167_v15 = vrot.slane %v9152_v14, %v13360_v39  ;;  %v9191_v48 = vrot.slane %v8845_v17, %v13360_v39  ;;  %v9177_v27 = vrot.slane %v9169_v63, %v13360_v39 }
 0x489   :  { %v9082_v41 = vrot.slane %v9075_v16, %v13360_v39  ;;  %v9153_v22 = vcombine.low %v9138_v40, %v9145_v24  ;;  %v9184_v52 = vrot.slane %v9170_v56, %v13360_v39  ;;  %v9208_v33 = vcombine.low %v15950_v10, %v15958_v58 }
 0x48a   :  { %v9121_v45 = vrot.slane %v9114_v12, %v13360_v39  ;;  %v9206_v18 = vrot.slane %v9191_v48, %v13360_v39  ;;  %v12716_v59 = vcombine.high %v15950_v10, %v15958_v58  ;;  %v9230_v24 = vrot.slane %v15968_v20, %v13360_v39 }
 0x48b   :  { %v9090_v62 = vcombine.low %v9082_v41, %v9089_v35  ;;  %v9160_v46 = vrot.slane %v9153_v22, %v13360_v39  ;;  %v9192_v53 = vcombine.low %v9177_v27, %v9184_v52  ;;  %v9216_v17 = vrot.slane %v9208_v33, %v13360_v39 }
 0x48c   :  { %v9129_v23 = vcombine.low %v9121_v45, %v9128_v44  ;;  %v9223_v1 = vrot.slane %v12716_v59, %v13360_v39  ;;  %v9247_v35 = vcombine.low %v15975_v34, %v8892_v28  ;;  %v16929_v10 = vcombine.high %v15975_v34, %v15975_v34 }
 0x48d   :  { %9453 = vst.msk [vmem:[#allocation2 + $0x11] sm:$0x1f] %vm9452_vm15, %v9090_v62  ;;  %v9168_v16 = vcombine.low %v9160_v46, %v9167_v15  ;;  %v9199_v5 = vrot.slane %v9192_v53, %v13360_v39  ;;  %v9245_v14 = vrot.slane %v9230_v24, %v13360_v39  ;;  %v9269_v44 = vrot.slane %v15984_v57, %v13360_v39 }
 0x48e   :  { %v9248_v58 = vcombine.low %v16929_v10, %v15972_v36  ;;  %v9231_v40 = vcombine.low %v9216_v17, %v9223_v1  ;;  %v9255_v20 = vrot.slane %v9247_v35, %v13360_v39  ;;  %v12717_v63 = vcombine.high %v15972_v36, %v15984_v57  ;;  %9454 = vst.msk [vmem:[#allocation2 + $0x21] sm:$0x1f] %vm9452_vm15, %v9129_v23 }
 0x48f   :  { %v9207_v34 = vcombine.low %v9199_v5, %v9206_v18  ;;  %v9284_v56 = vrot.slane %v9269_v44, %v13360_v39  ;;  %v9287_v41 = vcombine.low %v15981_v37, %v15994_v21  ;;  %v16930_v12 = vcombine.high %v15981_v37, %v15981_v37  ;;  %9455 = vst.msk [vmem:[#allocation2 + $0x31] sm:$0x1f] %vm9452_vm15, %v9168_v16 }
 0x490   :  { %v9262_v28 = vrot.slane %v9248_v58, %v13360_v39  ;;  %v9238_v48 = vrot.slane %v9231_v40, %v13360_v39  ;;  %v9294_v36 = vrot.slane %v12717_v63, %v13360_v39  ;;  %v16931_v57 = vcombine.high %v15994_v21, %v15994_v21 }
 0x491   :  { %v9308_v15 = vrot.slane %v16930_v12, %v13360_v39  ;;  %v9301_v52 = vrot.slane %v9287_v41, %v13360_v39  ;;  %v16932_v37 = vcombine.high %v15991_v61, %v15991_v61  ;;  %v16933_v45 = vcombine.high %v16005_v47, %v16005_v47  ;;  %9456 = vst.msk [vmem:[#allocation2 + $0x41] sm:$0x1f] %vm9452_vm15, %v9207_v34 }
 0x492   :  { %v9270_v22 = vcombine.low %v9255_v20, %v9262_v28  ;;  %v9325_v27 = vcombine.low %v16931_v57, %v15991_v61  ;;  %v9246_v59 = vcombine.low %v9238_v48, %v9245_v14  ;;  %v9364_v53 = vcombine.low %v15999_v51, %v16017_v26 }
 0x493   :  { %v9323_v33 = vrot.slane %v9308_v15, %v13360_v39  ;;  %v9326_v62 = vcombine.low %v16005_v47, %v16932_v37  ;;  %v9347_v18 = vrot.slane %v16933_v45, %v13360_v39  ;;  %v9309_v17 = vcombine.low %v9294_v36, %v9301_v52 }
 0x494   :  { %v9277_v21 = vrot.slane %v9270_v22, %v13360_v39  ;;  %v9333_v46 = vrot.slane %v9325_v27, %v13360_v39  ;;  %v12718_v23 = vcombine.high %v15999_v51, %v16017_v26  ;;  %v12732_v47 = vld.sshfl [vmem:[#allocation2 + $0x14] sm:$0x13 pattern:$0x75316420]  ;;  %v9372_v35 = vrot.slane %v9364_v53, %v13360_v39  ;;  %9457 = vst.msk [vmem:[#allocation2 + $0x51] sm:$0x1f] %vm9452_vm15, %v9246_v59 }
 0x495   :  { %v9340_v61 = vrot.slane %v9326_v62, %v13360_v39  ;;  %v9362_v24 = vrot.slane %v9347_v18, %v13360_v39  ;;  %v9386_v10 = vrot.slane %v16002_v2, %v13360_v39  ;;  %v16934_v58 = vcombine.high %v16002_v2, %v16002_v2  ;;  %v12733_v20 = vld.sshfl [vmem:[#allocation2 + $0x24] sm:$0x13 pattern:$0x75316420] }
 0x496   :  { %v9285_v1 = vcombine.low %v9277_v21, %v9284_v56  ;;  %v9316_v5 = vrot.slane %v9309_v17, %v13360_v39  ;;  %v9379_v44 = vrot.slane %v12718_v23, %v13360_v39  ;;  %v16935_v51 = vrot.slane %v16014_v50, %v13360_v39  ;;  %v12743_v15 = vld.sshfl [vmem:[#allocation2 + $0x22] sm:$0x13 pattern:$0x75316420] }
 0x497   :  { %v9403_v16 = vcombine.low %v16020_v3, %v16934_v58  ;;  %v9348_v14 = vcombine.low %v9333_v46, %v9340_v61  ;;  %v16936_v26 = vcombine.high %v16020_v3, %v16020_v3  ;;  %v9401_v28 = vrot.slane %v9386_v10, %v13360_v39  ;;  %v12744_v57 = vld.sshfl [vmem:[#allocation2 + $0x32] sm:$0x13 pattern:$0x75316420] }
 0x498   :  { %v9425_v63 = vrot.slane %v16038_v31, %v13360_v39  ;;  %9458 = vst.msk [vmem:[#allocation2 + $0xa1] sm:$0x1f] %vm9452_vm15, %v9285_v1  ;;  %v9805_v34 = vcombine.high %v12732_v47, %v12732_v47  ;;  %v9324_v56 = vcombine.low %v9316_v5, %v9323_v33  ;;  %v9387_v12 = vcombine.low %v9372_v35, %v9379_v44  ;;  %v12745_v37 = vld.sshfl [vmem:[#allocation2 + $0x42] sm:$0x13 pattern:$0x75316420] }
 0x499   :  { %v9404_v40 = vcombine.low %v16936_v26, %v16935_v51  ;;  %v9411_v2 = vrot.slane %v9403_v16, %v13360_v39  ;;  %v9355_v41 = vrot.slane %v9348_v14, %v13360_v39  ;;  %v9812_v48 = vrot.slane %v12732_v47, %v13360_v39  ;;  %v16157_v46 = vld.sshfl [vmem:[#allocation2 + $0x44] sm:$0x13 pattern:$0x75316420] }
 0x49a   :  { %v9440_v3 = vrot.slane %v9425_v63, %v13360_v39  ;;  %v9819_v22 = vrot.slane %v9805_v34, %v13360_v39  ;;  %v9828_v36 = vcombine.high %v12733_v20, %v12733_v20  ;;  %v9394_v31 = vrot.slane %v9387_v12, %v13360_v39  ;;  %9459 = vst.msk [vmem:[#allocation2 + $0xb1] sm:$0x1f] %vm9452_vm15, %v9324_v56  ;;  %v16162_v23 = vld.sshfl [vmem:[#allocation2 + $0x40] sm:$0x13 pattern:$0x75316420] }
 0x49b   :  { %v9418_v50 = vrot.slane %v9404_v40, %v13360_v39  ;;  %v9363_v27 = vcombine.low %v9355_v41, %v9362_v24  ;;  %v9835_v33 = vrot.slane %v12733_v20, %v13360_v39  ;;  %v9820_v62 = vcombine.high %v9812_v48, %v9812_v48  ;;  %v16166_v10 = vld.sshfl [vmem:[#allocation2 + $0x34] sm:$0x13 pattern:$0x75316420]  ;;  %12218 = vst.msk [vmem:[#allocation2 + $0x40] sm:$0xff] %vm234_vm2, %v16865_v55 }
 0x49c   :  { %v9842_v45 = vrot.slane %v9828_v36, %v13360_v39  ;;  %v16937_v18 = vcombine.high %v15834_v43, %v15834_v43  ;;  %v10082_v21 = vcombine.high %v12743_v15, %v12743_v15  ;;  %v9402_v53 = vcombine.low %v9394_v31, %v9401_v28  ;;  %v16175_v44 = vld.sshfl [vmem:[#allocation2 + $0x20] sm:$0x13 pattern:$0x75316420] }
 0x49d   :  { %v9426_v52 = vcombine.low %v9411_v2, %v9418_v50  ;;  %9460 = vst.msk [vmem:[#allocation2 + $0xc1] sm:$0x1f] %vm9452_vm15, %v9363_v27  ;;  %v10089_v61 = vrot.slane %v12743_v15, %v13360_v39  ;;  %v10105_v24 = vcombine.high %v12744_v57, %v12744_v57  ;;  %v11053_v47 = vcombine.low %v9819_v22, %v9820_v62  ;;  %v16182_v28 = vld.sshfl [vmem:[#allocation2 + $0x30] sm:$0x13 pattern:$0x75316420] }
 0x49e   :  { %v11052_v59 = vcombine.low %v16937_v18, %v9812_v48  ;;  %v11054_v1 = vcombine.low %v9835_v33, %v9842_v45  ;;  %v10096_v43 = vrot.slane %v10082_v21, %v13360_v39  ;;  %9461 = vst.msk [vmem:[#allocation2 + $0xd1] sm:$0x1f] %vm9452_vm15, %v9402_v53  ;;  %v10112_v5 = vrot.slane %v12744_v57, %v13360_v39 }
 0x49f   :  { %v9433_v17 = vrot.slane %v9426_v52, %v13360_v39  ;;  %v16171_v16 = vcombine.high %v10089_v61, %v10089_v61  ;;  %v10119_v14 = vrot.slane %v10105_v24, %v13360_v39  ;;  %v11075_v51 = vrot.slane %v11053_v47, %v13360_v39  ;;  %12214 = vst.msk [vmem:[#allocation2 + $0x20] sm:$0xff] %vm234_vm2, %v16865_v55  ;;  %v16220_v24 = vld.sshfl [vmem:[#allocation2 + $0x50] sm:$0x13 pattern:$0x75316420] }
 0x4a0   :  { %v11068_v35 = vrot.slane %v11052_v59, %v13360_v39  ;;  %v16179_v26 = vrot.slane %v11054_v1, %v13360_v39  ;;  %v10128_v20 = vcombine.high %v12745_v37, %v12745_v37  ;;  %v10120_v2 = vcombine.high %v10112_v5, %v10112_v5  ;;  %12216 = vst.msk [vmem:[#allocation2 + $0x30] sm:$0xff] %vm234_vm2, %v16865_v55  ;;  %v16222_v47 = vld.sshfl [vmem:[#allocation2 + $0x52] sm:$0x13 pattern:$0x75316420] }
 0x4a1   :  { %v9441_v58 = vcombine.low %v9433_v17, %v9440_v3  ;;  %v16188_v63 = vrot.slane %v12745_v37, %v13360_v39  ;;  %v11295_v34 = vcombine.low %v10089_v61, %v10096_v43  ;;  %v11296_v56 = vcombine.low %v16171_v16, %v10112_v5  ;;  %v12730_v41 = vld.sshfl [vmem:[#allocation2 + $0xb2] sm:$0x13 pattern:$0x75316420] }
 0x4a2   :  { %v11083_v40 = vcombine.low %v15862_v8, %v11068_v35  ;;  %v11084_v8 = vcombine.low %v11075_v51, %v16179_v26  ;;  %v10142_v50 = vrot.slane %v10128_v20, %v13360_v39  ;;  %v16196_v15 = vcombine.high %v9835_v33, %v9835_v33  ;;  %v12736_v22 = vld.sshfl [vmem:[#allocation2 + $0xb4] sm:$0x13 pattern:$0x75316420] }
 0x4a3   :  { %9462 = vst.msk [vmem:[#allocation2 + $0xe1] sm:$0x1f] %vm9452_vm15, %v9441_v58  ;;  %v9747_v3 = vcombine.high %v12730_v41, %v12730_v41  ;;  %v16199_v48 = vrot.slane %v12730_v41, %v13360_v39  ;;  %v11297_v36 = vcombine.low %v10119_v14, %v10120_v2  ;;  %v16202_v57 = vrot.slane %v11295_v34, %v13360_v39  ;;  %v16233_v2 = vld.sshfl [vmem:[#allocation2 + $0x54] sm:$0x13 pattern:$0x75316420] }
 0x4a4   :  { %v11091_v12 = vrot.slane %v11083_v40, %v13360_v39  ;;  %v11098_v27 = vrot.slane %v11084_v8, %v13360_v39  ;;  %v9897_v31 = vcombine.high %v12736_v22, %v12736_v22  ;;  %v16206_v52 = vrot.slane %v12736_v22, %v13360_v39  ;;  %12220 = vst.msk [vmem:[#allocation2 + $0x50] sm:$0xff] %vm234_vm2, %v16865_v55 }
 0x4a5   :  { %v11298_v37 = vcombine.low %v16188_v63, %v10142_v50  ;;  %v9761_v33 = vrot.slane %v9747_v3, %v13360_v39  ;;  %v9762_v62 = vcombine.high %v16199_v48, %v16199_v48  ;;  %v11312_v45 = vrot.slane %v11296_v56, %v13360_v39  ;;  %v12742_v59 = vld.sshfl [vmem:[#allocation2 + $0xd0] sm:$0x13 pattern:$0x75316420] }
 0x4a6   :  { %v11319_v18 = vrot.slane %v11297_v36, %v13360_v39  ;;  %v11099_v21 = vcombine.low %v11091_v12, %v11098_v27  ;;  %v9911_v53 = vrot.slane %v9897_v31, %v13360_v39  ;;  %v9912_v17 = vcombine.high %v16206_v52, %v16206_v52  ;;  %v12748_v43 = vld.sshfl [vmem:[#allocation2 + $0xd2] sm:$0x13 pattern:$0x75316420] }
 0x4a7   :  { %v16218_v61 = vrot.slane %v11298_v37, %v13360_v39  ;;  %v10047_v1 = vcombine.high %v12742_v59, %v12742_v59  ;;  %v16225_v35 = vrot.slane %v12742_v59, %v13360_v39  ;;  %v11027_v58 = vcombine.low %v9761_v33, %v9762_v62  ;;  %v16244_v12 = vld.sshfl [vmem:[#allocation2 + $0xb0] sm:$0x13 pattern:$0x75316420] }
 0x4a8   :  { %v11327_v5 = vcombine.low %v16202_v57, %v11312_v45  ;;  %v10197_v14 = vcombine.high %v12748_v43, %v12748_v43  ;;  %v16229_v51 = vrot.slane %v12748_v43, %v13360_v39  ;;  %11164 = vrot.lane.b32.xlu1 %v11099_v21, %s13037_s12  ;;  %v11149_v40 = vcombine.low %v9911_v53, %v9912_v17  ;;  %v12726_v27 = vld.sshfl [vmem:[#allocation2 + $0x12] sm:$0x13 pattern:$0x75316420] }
 0x4a9   :  { %v11328_v20 = vcombine.low %v11319_v18, %v16218_v61  ;;  %v10061_v34 = vrot.slane %v10047_v1, %v13360_v39  ;;  %v10062_v56 = vcombine.high %v16225_v35, %v16225_v35  ;;  %v16239_v41 = vrot.slane %v11027_v58, %v13360_v39  ;;  %12232 = vst.msk [vmem:[#allocation2 + $0xb0] sm:$0xff] %vm234_vm2, %v16865_v55  ;;  %v16261_v45 = vld.sshfl [vmem:[#allocation2 + $0xc0] sm:$0x13 pattern:$0x75316420] }
 0x4aa   :  { %v11335_v8 = vrot.slane %v11327_v5, %v13360_v39  ;;  %v10211_v50 = vrot.slane %v10197_v14, %v13360_v39  ;;  %v10212_v3 = vcombine.high %v16229_v51, %v16229_v51  ;;  %v16250_v22 = vrot.slane %v11149_v40, %v13360_v39  ;;  %v16263_v18 = vld.sshfl [vmem:[#allocation2 + $0xc4] sm:$0x13 pattern:$0x75316420] }
 0x4ab   :  { %v11342_v36 = vrot.slane %v11328_v20, %v13360_v39  ;;  %v11271_v31 = vcombine.low %v10061_v34, %v10062_v56  ;;  %v10255_v33 = vcombine.high %v16166_v10, %v16166_v10  ;;  %v10262_v62 = vrot.slane %v16166_v10, %v13360_v39  ;;  %v16269_v1 = vld.sshfl [vmem:[#allocation2 + $0xd4] sm:$0x13 pattern:$0x75316420] }
 0x4ac   :  { %v11393_v59 = vcombine.low %v10211_v50, %v10212_v3  ;;  %v10278_v17 = vcombine.high %v16157_v46, %v16157_v46  ;;  %v16277_v5 = vrot.slane %v16157_v46, %v13360_v39  ;;  %v16279_v14 = vld.sshfl [vmem:[#allocation2 + $0xc2] sm:$0x13 pattern:$0x75316420]  ;;  %12236 = vst.msk [vmem:[#allocation2 + $0xd0] sm:$0xff] %vm234_vm2, %v16865_v55  ;;  %v9655_v56 = vcombine.high %v12726_v27, %v12726_v27 }
 0x4ad   :  { %v11343_v53 = vcombine.low %v11335_v8, %v11342_v36  ;;  %v16272_v43 = vrot.slane %v11271_v31, %v13360_v39  ;;  %v10269_v58 = vrot.slane %v10255_v33, %v13360_v39  ;;  %v10270_v10 = vcombine.high %v10262_v62, %v10262_v62  ;;  %12234 = vst.msk [vmem:[#allocation2 + $0xc0] sm:$0xff] %vm234_vm2, %v16865_v55  ;;  %v16291_v46 = vld.sshfl [vmem:[#allocation2 + $0xe0] sm:$0x13 pattern:$0x75316420] }
 0x4ae   :  { %v16284_v40 = vrot.slane %v11393_v59, %v13360_v39  ;;  %v10292_v20 = vrot.slane %v10278_v17, %v13360_v39  ;;  %v11418_v34 = vcombine.low %v16196_v15, %v10262_v62  ;;  %v9662_v3 = vrot.slane %v12726_v27, %v13360_v39  ;;  %v16298_v31 = vld.sshfl [vmem:[#allocation2 + $0xe2] sm:$0x13 pattern:$0x75316420] }
 0x4af   :  { %11408 = vrot.lane.b32.xlu1 %v11343_v53, %s13039_s14  ;;  %v11285_v8 = vrot.slane %v16272_v43, %v13360_v39  ;;  %v11419_v50 = vcombine.low %v10269_v58, %v10270_v10  ;;  %v10382_v36 = vcombine.high %v16162_v23, %v16162_v23  ;;  %v9669_v53 = vrot.slane %v9655_v56, %v13360_v39  ;;  %v16305_v17 = vld.sshfl [vmem:[#allocation2 + $0xe4] sm:$0x13 pattern:$0x75316420] }
 0x4b0   :  { %v11407_v33 = vrot.slane %v16284_v40, %v13360_v39  ;;  %v11420_v62 = vcombine.low %v16277_v5, %v10292_v20  ;;  %v11434_v59 = vrot.slane %v11418_v34, %v13360_v39  ;;  %16938 = vst [vmem:[#allocation4_spill] sm:$0xff] %v16305_v17  ;;  %v9670_v58 = vcombine.high %v9662_v3, %v9662_v3  ;;  %v16316_v20 = vld.sshfl [vmem:[#allocation2] sm:$0x13 pattern:$0x75316420] }
 0x4b1   :  { %11290 = vrot.lane.b32.xlu0 %v11285_v8, %s13038_s13  ;;  %v11441_v27 = vrot.slane %v11419_v50, %v13360_v39  ;;  %v16939_v10 = vcombine.high %v15837_v42, %v15837_v42  ;;  %v10389_v37 = vrot.slane %v16162_v23, %v13360_v39  ;;  %12238 = vst.msk [vmem:[#allocation2 + $0xe0] sm:$0xff] %vm234_vm2, %v16865_v55  ;;  %16940 = vst [vmem:[#allocation6_spill] sm:$0xff] %v16316_v20  ;;  %v16325_v42 = vld.sshfl [vmem:[#allocation2 + $0xa2] sm:$0x13 pattern:$0x75316420] }
 0x4b2   :  { %v16319_v34 = vrot.slane %v11420_v62, %v13360_v39  ;;  %v11449_v56 = vcombine.low %v16179_v26, %v11434_v59  ;;  %v10396_v8 = vrot.slane %v10382_v36, %v13360_v39  ;;  %v10405_v50 = vcombine.high %v16220_v24, %v16220_v24  ;;  %v16329_v23 = vld.sshfl [vmem:[#allocation2 + $0x10] sm:$0x13 pattern:$0x75316420]  ;;  %12210 = vst.msk [vmem:[#allocation2] sm:$0xff] %vm234_vm2, %v16865_v55 }
 0x4b3   :  { %v10930_v21 = vcombine.low %v16939_v10, %v9662_v3  ;;  %v16327_v3 = vld.sshfl [vmem:[#allocation2 + $0xa4] sm:$0x13 pattern:$0x75316420]  ;;  %16941 = vst [vmem:[#allocation9_spill] sm:$0xff] %v16329_v23  ;;  %v10931_v10 = vcombine.low %v9669_v53, %v9670_v58  ;;  %v16334_v20 = vcombine.high %v10389_v37, %v10389_v37  ;;  %v10412_v26 = vrot.slane %v16220_v24, %v13360_v39 }
 0x4b4   :  { %12212 = vst.msk [vmem:[#allocation2 + $0x10] sm:$0xff] %vm234_vm2, %v16865_v55  ;;  %v16340_v36 = vld.sshfl [vmem:[#allocation2 + $0x90] sm:$0x13 pattern:$0x75316420]  ;;  %v11450_v59 = vcombine.low %v11441_v27, %v16319_v34  ;;  %v11457_v23 = vrot.slane %v11449_v56, %v13360_v39  ;;  %v10419_v19 = vrot.slane %v10405_v50, %v13360_v39  ;;  %v11539_v17 = vcombine.low %v10389_v37, %v10396_v8 }
 0x4b5   :  { %v10946_v62 = vrot.slane %v10930_v21, %v13360_v39  ;;  %16942 = vst [vmem:[#allocation12_spill] sm:$0xff] %v16340_v36  ;;  %v12777_v21 = vld [vmem:[%s16813_s5 + $0x48] sm:$0xf]  ;;  %12228 = vst.msk [vmem:[#allocation2 + $0x90] sm:$0xff] %vm234_vm2, %v16865_v55  ;;  %11412 = vrot.lane.b32.xlu0 %v11407_v33, %s13039_s14  ;;  %v10953_v24 = vrot.slane %v10931_v10, %v13360_v39  ;;  %v10420_v58 = vcombine.high %v10412_v26, %v10412_v26 }
 0x4b6   :  { %v16348_v53 = vld.sshfl [vmem:[#allocation2 + $0xa0] sm:$0x13 pattern:$0x75316420]  ;;  %v11540_v56 = vcombine.low %v16334_v20, %v10412_v26  ;;  %v11464_v37 = vrot.slane %v11450_v59, %v13360_v39  ;;  %v11549_v8 = vrot.slane %v11539_v17, %v13360_v39  ;;  %v9932_v50 = vcombine.high %v16175_v44, %v16175_v44  ;;  %12932 = vmatpush3.msk.msra.mxu1 %vm8494_vm6, %v12777_v21 }
 0x4b7   :  { %16943 = vst [vmem:[#allocation13_spill] sm:$0xff] %v16348_v53  ;;  %v10961_v27 = vcombine.low %v15867_v9, %v10946_v62  ;;  %12230 = vst.msk [vmem:[#allocation2 + $0xa0] sm:$0xff] %vm234_vm2, %v16865_v55  ;;  %v9939_v33 = vrot.slane %v16175_v44, %v13360_v39  ;;  %v10962_v9 = vcombine.low %v10953_v24, %v16202_v57  ;;  %12933 = vmatprep.subr.mxu1 %v16865_v55 }
 0x4b8   :  { %v11541_v62 = vcombine.low %v10419_v19, %v10420_v58  ;;  %v11556_v26 = vrot.slane %v11540_v56, %v13360_v39  ;;  %v11465_v59 = vcombine.low %v11457_v23, %v11464_v37  ;;  %v9946_v17 = vrot.slane %v9932_v50, %v13360_v39 }
 0x4b9   :  { %v10969_v10 = vrot.slane %v10961_v27, %v13360_v39  ;;  %v16370_v53 = vcombine.high %v9939_v33, %v9939_v33  ;;  %v9955_v36 = vcombine.high %v16182_v28, %v16182_v28  ;;  %v16944_v44 = vrot.slane %v16239_v41, %v13360_v39 }
 0x4ba   :  { %v10976_v57 = vrot.slane %v10962_v9, %v13360_v39  ;;  %v11563_v19 = vrot.slane %v11541_v62, %v13360_v39  ;;  %v11571_v21 = vcombine.low %v11549_v8, %v11556_v26  ;;  %v9962_v23 = vrot.slane %v16182_v28, %v13360_v39  ;;  %11530 = vrot.lane.b32.xlu1 %v11465_v59, %s13040_s15  ;;  %v12776_v28 = vld [vmem:[%s16813_s5 + $0x40] sm:$0xff] }
 0x4bb   :  { %11046 = vrot.lane.b32.xlu0 %v16944_v44, %s13036_s11  ;;  %v9969_v24 = vrot.slane %v9955_v36, %v13360_v39  ;;  %v11173_v27 = vcombine.low %v9939_v33, %v9946_v17  ;;  %v16386_v58 = vcombine.high %v16188_v63, %v16188_v63  ;;  %v10555_v56 = vcombine.high %v16222_v47, %v16222_v47 }
 0x4bc   :  { %v10977_v37 = vcombine.low %v10969_v10, %v10976_v57  ;;  %v11572_v50 = vcombine.low %v11563_v19, %v15870_v30  ;;  %v11579_v9 = vrot.slane %v11571_v21, %v13360_v39  ;;  %v9970_v62 = vcombine.high %v9962_v23, %v9962_v23  ;;  %12934 = vmatpush3.msra.mxu1 %v12776_v28 }
 0x4bd   :  { %v11174_v36 = vcombine.low %v16370_v53, %v9962_v23  ;;  %v16397_v33 = vrot.slane %v11173_v27, %v13360_v39  ;;  %v10562_v63 = vrot.slane %v16222_v47, %v13360_v39  ;;  %v10569_v26 = vrot.slane %v10555_v56, %v13360_v39  ;;  %12935 = vmatprep.subr.mxu1 %v16865_v55 }
 0x4be   :  { %v16945_v30 = vrot.slane %v16250_v22, %v13360_v39  ;;  %v11586_v10 = vrot.slane %v11572_v50, %v13360_v39  ;;  %v11175_v59 = vcombine.low %v9969_v24, %v9970_v62  ;;  %v9724_v17 = vcombine.high %v16325_v42, %v16325_v42 }
 0x4bf   :  { %v9731_v44 = vrot.slane %v16325_v42, %v13360_v39  ;;  %v11190_v57 = vrot.slane %v11174_v36, %v13360_v39  ;;  %v10570_v47 = vcombine.high %v10562_v63, %v10562_v63  ;;  %v11662_v19 = vcombine.low %v16386_v58, %v10562_v63 }
 0x4c0   :  { %11168 = vrot.lane.b32.xlu0 %v16945_v30, %s13037_s12  ;;  %v10978_v21 = vcombine.low %v16171_v16, %v15815_v25  ;;  %v11587_v23 = vcombine.low %v11579_v9, %v11586_v10  ;;  %v11197_v27 = vrot.slane %v11175_v59, %v13360_v39  ;;  %v9738_v24 = vrot.slane %v9724_v17, %v13360_v39 }
 0x4c1   :  { %v9739_v56 = vcombine.high %v9731_v44, %v9731_v44  ;;  %v11205_v50 = vcombine.low %v16397_v33, %v11190_v57  ;;  %v11663_v62 = vcombine.low %v10569_v26, %v10570_v47  ;;  %v11678_v42 = vrot.slane %v11662_v19, %v13360_v39 }
 0x4c2   :  { %v10988_v28 = vrot.slane %v10978_v21, %v13360_v39  ;;  %11652 = vrot.lane.b32.xlu1 %v11587_v23, %s13041_s16  ;;  %v11206_v25 = vcombine.low %v11197_v27, %v11549_v8  ;;  %v10980_v16 = vcombine.low %v9731_v44, %v9738_v24  ;;  %v16946_v26 = vrot.slane %v15853_v60, %v13360_v39 }
 0x4c3   :  { %v10981_v9 = vcombine.low %v9739_v56, %v16199_v48  ;;  %v11213_v36 = vrot.slane %v11205_v50, %v13360_v39  ;;  %v11685_v63 = vrot.slane %v11663_v62, %v13360_v39  ;;  %v11693_v30 = vcombine.low %v16218_v61, %v11678_v42  ;;  %v12775_v56 = vld [vmem:[%s16813_s5 + $0x38] sm:$0xff] }
 0x4c4   :  { %11042 = vrot.lane.b32.xlu0 %v10977_v37, %s13036_s11  ;;  %v11010_v10 = vcombine.low %v10988_v28, %v16946_v26  ;;  %v11220_v59 = vrot.slane %v11206_v25, %v13360_v39  ;;  %v11002_v37 = vrot.slane %v10980_v16, %v13360_v39  ;;  %v9874_v47 = vcombine.high %v16327_v3, %v16327_v3 }
 0x4c5   :  { %v11009_v17 = vrot.slane %v10981_v9, %v13360_v39  ;;  %v11694_v8 = vcombine.low %v11685_v63, %v15873_v0  ;;  %v11701_v44 = vrot.slane %v11693_v30, %v13360_v39  ;;  %v9881_v60 = vrot.slane %v16327_v3, %v13360_v39  ;;  %12936 = vmatpush3.msra.mxu1 %v12775_v56 }
 0x4c6   :  { %v11018_v57 = vrot.slane %v11010_v10, %v13360_v39  ;;  %v11221_v61 = vcombine.low %v11213_v36, %v11220_v59  ;;  %v11100_v21 = vcombine.low %v16196_v15, %v15821_v4  ;;  %v9888_v27 = vrot.slane %v9874_v47, %v13360_v39  ;;  %12937 = vmatprep.subr.mxu1 %v16865_v55 }
 0x4c7   :  { %v11011_v19 = vcombine.low %v11002_v37, %v11009_v17  ;;  %v11708_v23 = vrot.slane %v11694_v8, %v13360_v39  ;;  %v16446_v0 = vcombine.high %v16277_v5, %v16277_v5  ;;  %v10705_v24 = vcombine.high %v16233_v2, %v16233_v2 }
 0x4c8   :  { %11286 = vrot.lane.b32.xlu0 %v11221_v61, %s13038_s13  ;;  %v9889_v4 = vcombine.high %v9881_v60, %v9881_v60  ;;  %v11110_v15 = vrot.slane %v11100_v21, %v13360_v39  ;;  %v10712_v50 = vrot.slane %v16233_v2, %v13360_v39  ;;  %v11102_v5 = vcombine.low %v9881_v60, %v9888_v27  ;;  %v12774_v2 = vld [vmem:[%s16813_s5 + $0x30] sm:$0xff]  ;;  %v12773_v21 = vld [vmem:[%s16813_s5 + $0x28] sm:$0xff] }
 0x4c9   :  { %v11025_v3 = vrot.slane %v11011_v19, %v13360_v39  ;;  %v11709_v62 = vcombine.low %v11701_v44, %v11708_v23  ;;  %v10719_v42 = vrot.slane %v10705_v24, %v13360_v39  ;;  %v10001_v28 = vcombine.high %v16244_v12, %v16244_v12  ;;  %12938 = vmatpush3.msra.mxu1 %v12774_v2 }
 0x4ca   :  { %v11103_v16 = vcombine.low %v9889_v4, %v16206_v52  ;;  %v16947_v9 = vrot.slane %v15856_v13, %v13360_v39  ;;  %v10720_v63 = vcombine.high %v10712_v50, %v10712_v50  ;;  %v11124_v30 = vrot.slane %v11102_v5, %v13360_v39  ;;  %12939 = vmatprep.subr.mxu1 %v16865_v55 }
 0x4cb   :  { %v11026_v25 = vcombine.low %v11018_v57, %v11025_v3  ;;  %11774 = vrot.lane.b32.xlu1 %v11709_v62, %s13042_s17  ;;  %v11784_v26 = vcombine.low %v16446_v0, %v10712_v50  ;;  %v16474_v10 = vrot.slane %v16244_v12, %v13360_v39  ;;  %v10015_v13 = vrot.slane %v10001_v28, %v13360_v39 }
 0x4cc   :  { %v11132_v36 = vcombine.low %v11110_v15, %v16947_v9  ;;  %v11131_v59 = vrot.slane %v11103_v16, %v13360_v39  ;;  %v11785_v17 = vcombine.low %v10719_v42, %v10720_v63  ;;  %v10024_v8 = vcombine.high %v16261_v45, %v16261_v45  ;;  %12940 = vmatpush3.msra.mxu1 %v12773_v21 }
 0x4cd   :  { %11044 = vrot.lane.b32.xlu0 %v11026_v25, %s13036_s11  ;;  %v11800_v44 = vrot.slane %v11784_v26, %v13360_v39  ;;  %v10016_v57 = vcombine.high %v16474_v10, %v16474_v10  ;;  %v10031_v12 = vrot.slane %v16261_v45, %v13360_v39  ;;  %v11222_v47 = vcombine.low %v16334_v20, %v16474_v10 }
 0x4ce   :  { %v11140_v37 = vrot.slane %v11132_v36, %v13360_v39  ;;  %v11133_v61 = vcombine.low %v11124_v30, %v11131_v59  ;;  %v11807_v19 = vrot.slane %v11785_v17, %v13360_v39  ;;  %v10038_v60 = vrot.slane %v10024_v8, %v13360_v39  ;;  %12950 = vmatprep.subr.mxu1 %v16865_v55 }
 0x4cf   :  { %11656 = vrot.lane.b32.xlu1 %v15878_v32, %s13041_s16  ;;  %v11815_v45 = vcombine.low %v16319_v34, %v11800_v44  ;;  %v10039_v23 = vcombine.high %v10031_v12, %v10031_v12  ;;  %v11223_v27 = vcombine.low %v10015_v13, %v10016_v57  ;;  %v11232_v20 = vrot.slane %v11222_v47, %v13360_v39 }
 0x4d0   :  { %v11147_v24 = vrot.slane %v11133_v61, %v13360_v39  ;;  %v11816_v56 = vcombine.low %v11807_v19, %v15886_v49  ;;  %v11224_v3 = vcombine.low %v10031_v12, %v10038_v60  ;;  %v10324_v4 = vcombine.high %v16263_v18, %v16263_v18 }
 0x4d1   :  { %v11823_v15 = vrot.slane %v11815_v45, %v13360_v39  ;;  %v11225_v50 = vcombine.low %v10039_v23, %v16225_v35  ;;  %v16506_v32 = vrot.slane %v11223_v27, %v13360_v39  ;;  %v10331_v34 = vrot.slane %v16263_v18, %v13360_v39 }
 0x4d2   :  { %v11148_v62 = vcombine.low %v11140_v37, %v11147_v24  ;;  %v11830_v49 = vrot.slane %v11816_v56, %v13360_v39  ;;  %v11246_v5 = vrot.slane %v11224_v3, %v13360_v39  ;;  %v10338_v42 = vrot.slane %v10324_v4, %v13360_v39 }
 0x4d3   :  { %v11253_v28 = vrot.slane %v11225_v50, %v13360_v39  ;;  %v11254_v25 = vcombine.low %v11232_v20, %v16506_v32  ;;  %v10339_v16 = vcombine.high %v10331_v34, %v10331_v34  ;;  %v16518_v9 = vrot.slane %v16269_v1, %v13360_v39 }
 0x4d4   :  { %11166 = vrot.lane.b32.xlu0 %v11148_v62, %s13037_s12  ;;  %v11831_v18 = vcombine.low %v11823_v15, %v11830_v49  ;;  %v11466_v36 = vcombine.low %v16446_v0, %v16206_v52  ;;  %v11468_v63 = vcombine.low %v10331_v34, %v10338_v42  ;;  %v10174_v13 = vcombine.high %v16279_v14, %v16279_v14 }
 0x4d5   :  { %v11255_v2 = vcombine.low %v11246_v5, %v11253_v28  ;;  %v11262_v30 = vrot.slane %v11254_v25, %v13360_v39  ;;  %v11469_v26 = vcombine.low %v10339_v16, %v16518_v9  ;;  %v10181_v17 = vrot.slane %v16279_v14, %v13360_v39 }
 0x4d6   :  { %11896 = vrot.lane.b32.xlu1 %v11831_v18, %s13043_s18  ;;  %v11476_v59 = vrot.slane %v11466_v36, %v13360_v39  ;;  %v11490_v37 = vrot.slane %v11468_v63, %v13360_v39  ;;  %v11344_v52 = vcombine.low %v16386_v58, %v16199_v48  ;;  %v10188_v44 = vrot.slane %v10174_v13, %v13360_v39 }
 0x4d7   :  { %v11269_v0 = vrot.slane %v11255_v2, %v13360_v39  ;;  %v11497_v8 = vrot.slane %v11469_v26, %v13360_v39  ;;  %v10474_v57 = vcombine.high %v16291_v46, %v16291_v46  ;;  %v10189_v47 = vcombine.high %v10181_v17, %v10181_v17 }
 0x4d8   :  { %v11498_v12 = vcombine.low %v11476_v59, %v16250_v22  ;;  %v11354_v61 = vrot.slane %v11344_v52, %v13360_v39  ;;  %v10481_v14 = vrot.slane %v16291_v46, %v13360_v39  ;;  %v11346_v48 = vcombine.low %v10181_v17, %v10188_v44  ;;  %v16950_v17 = vld [vmem:[#allocation4_spill] sm:$0xff] }
 0x4d9   :  { %v11270_v19 = vcombine.low %v11262_v30, %v11269_v0  ;;  %v11499_v60 = vcombine.low %v11490_v37, %v11497_v8  ;;  %v10488_v58 = vrot.slane %v10474_v57, %v13360_v39  ;;  %v11347_v45 = vcombine.low %v10189_v47, %v16229_v51 }
 0x4da   :  { %v11506_v21 = vrot.slane %v11498_v12, %v13360_v39  ;;  %v11376_v23 = vcombine.low %v11354_v61, %v16239_v41  ;;  %v10489_v27 = vcombine.high %v10481_v14, %v10481_v14  ;;  %v11368_v20 = vrot.slane %v11346_v48, %v13360_v39 }
 0x4db   :  { %11288 = vrot.lane.b32.xlu0 %v11270_v19, %s13038_s13  ;;  %v11513_v22 = vrot.slane %v11499_v60, %v13360_v39  ;;  %v16948_v46 = vcombine.high %v15840_v29, %v15840_v29  ;;  %v11590_v56 = vcombine.low %v10481_v14, %v10488_v58  ;;  %v11375_v3 = vrot.slane %v11347_v45, %v13360_v39  ;;  %v16952_v45 = vld [vmem:[#allocation6_spill] sm:$0xff] }
 0x4dc   :  { %v11384_v4 = vrot.slane %v11376_v23, %v13360_v39  ;;  %v11591_v15 = vcombine.low %v10489_v27, %v15812_v54  ;;  %v10347_v41 = vcombine.high %v16269_v1, %v16269_v1  ;;  %v10362_v49 = vcombine.high %v16518_v9, %v16518_v9 }
 0x4dd   :  { %v11588_v24 = vcombine.low %v16948_v46, %v16225_v35  ;;  %v11514_v50 = vcombine.low %v11506_v21, %v11513_v22  ;;  %v11612_v62 = vrot.slane %v11590_v56, %v13360_v39  ;;  %v11377_v29 = vcombine.low %v11368_v20, %v11375_v3  ;;  %v16953_v3 = vld [vmem:[#allocation9_spill] sm:$0xff] }
 0x4de   :  { %v11619_v35 = vrot.slane %v11591_v15, %v13360_v39  ;;  %v10361_v5 = vrot.slane %v10347_v41, %v13360_v39  ;;  %v10624_v42 = vcombine.high %v16298_v31, %v16298_v31  ;;  %v10631_v1 = vrot.slane %v16298_v31, %v13360_v39 }
 0x4df   :  { %v11598_v34 = vrot.slane %v11588_v24, %v13360_v39  ;;  %11532 = vrot.lane.b32.xlu1 %v11514_v50, %s13040_s15  ;;  %v16949_v28 = vcombine.high %v15844_v6, %v15844_v6  ;;  %v11766_v16 = vrot.slane %v15915_v7, %v13360_v39  ;;  %v11391_v18 = vrot.slane %v11377_v29, %v13360_v39 }
 0x4e0   :  { %v11621_v36 = vcombine.low %v11612_v62, %v11619_v35  ;;  %v11515_v63 = vcombine.low %v10361_v5, %v10362_v49  ;;  %v10638_v2 = vrot.slane %v10624_v42, %v13360_v39  ;;  %v10743_v37 = vcombine.high %v15850_v11, %v15850_v11  ;;  %v16951_v11 = vld [vmem:[#allocation10_spill] sm:$0xff] }
 0x4e1   :  { %v11620_v54 = vcombine.low %v11598_v34, %v16272_v43  ;;  %v11710_v25 = vcombine.low %v16949_v28, %v16229_v51  ;;  %v10639_v43 = vcombine.high %v10631_v1, %v10631_v1  ;;  %v11392_v31 = vcombine.low %v11384_v4, %v11391_v18 }
 0x4e2   :  { %v11635_v13 = vrot.slane %v11621_v36, %v13360_v39  ;;  %v11522_v6 = vrot.slane %v11515_v63, %v13360_v39  ;;  %v11712_v51 = vcombine.low %v10631_v1, %v10638_v2  ;;  %v10774_v52 = vcombine.high %v16950_v17, %v16950_v17 }
 0x4e3   :  { %v11628_v30 = vrot.slane %v11620_v54, %v13360_v39  ;;  %v11720_v26 = vrot.slane %v11710_v25, %v13360_v39  ;;  %v11713_v59 = vcombine.low %v10639_v43, %v15893_v38  ;;  %11410 = vrot.lane.b32.xlu0 %v11392_v31, %s13039_s14  ;;  %v11773_v44 = vrot.slane %v11766_v16, %v13360_v39  ;;  %v16954_v54 = vld [vmem:[#allocation12_spill] sm:$0xff] }
 0x4e4   :  { %v11734_v8 = vrot.slane %v11712_v51, %v13360_v39  ;;  %v10781_v57 = vrot.slane %v16950_v17, %v13360_v39  ;;  %v11529_v38 = vrot.slane %v11522_v6, %v13360_v39  ;;  %v10788_v12 = vrot.slane %v10774_v52, %v13360_v39 }
 0x4e5   :  { %v11742_v7 = vcombine.low %v11720_v26, %v16284_v40  ;;  %v11636_v0 = vcombine.low %v11628_v30, %v11635_v13  ;;  %v11741_v40 = vrot.slane %v11713_v59, %v13360_v39  ;;  %v10804_v47 = vrot.slane %v16951_v11, %v13360_v39  ;;  %v16955_v30 = vld [vmem:[#allocation13_spill] sm:$0xff] }
 0x4e6   :  { %v10789_v14 = vcombine.high %v10781_v57, %v10781_v57  ;;  %v11832_v19 = vcombine.low %v10743_v37, %v16518_v9  ;;  %v10797_v60 = vcombine.high %v16951_v11, %v16951_v11  ;;  %v11834_v58 = vcombine.low %v10781_v57, %v10788_v12 }
 0x4e7   :  { %11654 = vrot.lane.b32.xlu1 %v11636_v0, %s13041_s16  ;;  %v11750_v61 = vrot.slane %v11742_v7, %v13360_v39  ;;  %v11743_v48 = vcombine.low %v11734_v8, %v11741_v40  ;;  %v10812_v21 = vcombine.high %v10804_v47, %v10804_v47  ;;  %v9482_v23 = vcombine.high %v16952_v45, %v16952_v45 }
 0x4e8   :  { %11534 = vrot.lane.b32.xlu0 %v11529_v38, %s13040_s15  ;;  %v11835_v27 = vcombine.low %v10789_v14, %v10804_v47  ;;  %v11842_v22 = vrot.slane %v11832_v19, %v13360_v39  ;;  %v10811_v20 = vrot.slane %v10797_v60, %v13360_v39  ;;  %v9489_v46 = vrot.slane %v16952_v45, %v13360_v39 }
 0x4e9   :  { %v11757_v9 = vrot.slane %v11743_v48, %v13360_v39  ;;  %v11856_v24 = vrot.slane %v11834_v58, %v13360_v39  ;;  %v9496_v56 = vrot.slane %v9482_v23, %v13360_v39  ;;  %v9505_v4 = vcombine.high %v16953_v3, %v16953_v3 }
 0x4ea   :  { %v11863_v15 = vrot.slane %v11835_v27, %v13360_v39  ;;  %v11864_v41 = vcombine.low %v11842_v22, %v11522_v6  ;;  %v11881_v50 = vcombine.low %v10811_v20, %v10812_v21  ;;  %v9497_v34 = vcombine.high %v9489_v46, %v9489_v46 }
 0x4eb   :  { %v11758_v62 = vcombine.low %v11750_v61, %v11757_v9  ;;  %v9512_v49 = vrot.slane %v16953_v3, %v13360_v39  ;;  %v9519_v29 = vrot.slane %v9505_v4, %v13360_v39  ;;  %v10813_v35 = vcombine.low %v9489_v46, %v9496_v56 }
 0x4ec   :  { %11778 = vrot.lane.b32.xlu0 %v11773_v44, %s13042_s17  ;;  %v11865_v5 = vcombine.low %v11856_v24, %v11863_v15  ;;  %v11872_v42 = vrot.slane %v11864_v41, %v13360_v39  ;;  %v9551_v1 = vcombine.high %v16954_v54, %v16954_v54  ;;  %v9558_v18 = vrot.slane %v16954_v54, %v13360_v39 }
 0x4ed   :  { %11776 = vrot.lane.b32.xlu1 %v11758_v62, %s13042_s17  ;;  %v9520_v28 = vcombine.high %v9512_v49, %v9512_v49  ;;  %v10814_v25 = vcombine.low %v9497_v34, %v9512_v49  ;;  %v10823_v16 = vrot.slane %v10813_v35, %v13360_v39  ;;  %v11888_v63 = vrot.slane %v11881_v50, %v13360_v39 }
 0x4ee   :  { %v11879_v36 = vrot.slane %v11865_v5, %v13360_v39  ;;  %v9565_v2 = vrot.slane %v9551_v1, %v13360_v39  ;;  %v9574_v43 = vcombine.high %v16955_v30, %v16955_v30  ;;  %v9566_v13 = vcombine.high %v9558_v18, %v9558_v18 }
 0x4ef   :  { %v10815_v26 = vcombine.low %v9519_v29, %v9520_v28  ;;  %v10830_v31 = vrot.slane %v10814_v25, %v13360_v39  ;;  %v9581_v6 = vrot.slane %v16955_v30, %v13360_v39  ;;  %v10862_v7 = vcombine.low %v16370_v53, %v9558_v18 }
 0x4f0   :  { %v11880_v51 = vcombine.low %v11872_v42, %v11879_v36  ;;  %v9588_v59 = vrot.slane %v9574_v43, %v13360_v39  ;;  %v10863_v0 = vcombine.low %v9565_v2, %v9566_v13  ;;  %v11895_v8 = vrot.slane %v11888_v63, %v13360_v39 }
 0x4f1   :  { %v10837_v37 = vrot.slane %v10815_v26, %v13360_v39  ;;  %v10845_v17 = vcombine.low %v10823_v16, %v10830_v31  ;;  %v9589_v52 = vcombine.high %v9581_v6, %v9581_v6  ;;  %v10872_v57 = vrot.slane %v10862_v7, %v13360_v39 }
 0x4f2   :  { %11898 = vrot.lane.b32.xlu1 %v11880_v51, %s13043_s18  ;;  %v10864_v44 = vcombine.low %v9581_v6, %v9588_v59  ;;  %v10879_v12 = vrot.slane %v10863_v0, %v13360_v39  ;;  %v10925_v16 = vrot.slane %v16506_v32, %v13360_v39 }
 0x4f3   :  { %v10846_v38 = vcombine.low %v10837_v37, %v16397_v33  ;;  %v10865_v40 = vcombine.low %v9589_v52, %v16474_v10  ;;  %v10853_v11 = vrot.slane %v10845_v17, %v13360_v39 }
 0x4f4   :  { %v10886_v53 = vrot.slane %v10864_v44, %v13360_v39  ;;  %v10894_v14 = vcombine.low %v10872_v57, %v10879_v12 }
 0x4f5   :  { %v10860_v47 = vrot.slane %v10846_v38, %v13360_v39  ;;  %v10893_v61 = vrot.slane %v10865_v40, %v13360_v39  ;;  %v12399_v38 = vld [vmem:[#allocation2 + $0x2] sm:$0x1]  ;;  %v12400_v40 = vld [vmem:[#allocation2 + $0x92] sm:$0x1] }
 0x4f6   :  { %11900 = vrot.lane.b32.xlu1 %v11895_v8, %s13043_s18  ;;  %v10902_v48 = vrot.slane %v10894_v14, %v13360_v39  ;;  %v12423_v12 = vrot.slane %v12400_v40, 7  ;;  %v12404_v14 = vld [vmem:[#allocation2 + $0xb0] sm:$0x1] }
 0x4f7   :  { %v10861_v19 = vcombine.low %v10853_v11, %v10860_v47  ;;  %v10895_v60 = vcombine.low %v10886_v53, %v10893_v61  ;;  %v12401_v53 = vld [vmem:[#allocation2 + $0x4] sm:$0x1]  ;;  %v12402_v11 = vld [vmem:[#allocation2 + $0x94] sm:$0x1]  ;;  %v12403_v61 = vld [vmem:[#allocation2 + $0x20] sm:$0x1] }
 0x4f8   :  { %v12430_v47 = vrot.slane %v12402_v11, 7 }
 0x4f9   :  { %v10909_v33 = vrot.slane %v10895_v60, %v13360_v39  ;;  %v12437_v60 = vrot.slane %v12404_v14, 7  ;;  %v12783_v14 = vld [vmem:[%s16811_s3 + $0x2] ss:$0 sm:$0xff] }
 0x4fb   :  { %v10910_v10 = vcombine.low %v10902_v48, %v10909_v33  ;;  %v12409_v48 = vld [vmem:[#allocation2 + $0x40] sm:$0x1]  ;;  %v12410_v33 = vld [vmem:[#allocation2 + $0xd0] sm:$0x1] }
 0x51a   :  { %v11165_v21 = vpop.permute.xlu1 %11164 }
 0x521   :  { %v11409_v23 = vpop.permute.xlu1 %11408 }
 0x523   :  { %v11291_v58 = vpop.permute.xlu0 %11290 }
 0x527   :  { %v11413_v45 = vpop.permute.xlu0 %11412 }
 0x52c   :  { %v11531_v20 = vpop.permute.xlu1 %11530 }
 0x52d   :  { %v11047_v27 = vpop.permute.xlu0 %11046 }
 0x52e   :  { %v11907_v18 = vsel %vm234_vm2, %v10925_v16, %v11047_v27 }
 0x532   :  { %v11169_v22 = vpop.permute.xlu0 %11168 }
 0x533   :  { %v11910_v63 = vsel %vm8406_vm7, %v11907_v18, %v11169_v22  ;;  %v12407_v22 = vld [vmem:[#allocation2 + $0x24] sm:$0x1] }
 0x534   :  { %v11653_v9 = vpop.permute.xlu1 %11652  ;;  %v11913_v13 = vsel %vm8414_vm8, %v11910_v63, %v11291_v58  ;;  %v12458_v58 = vrot.slane %v12410_v33, 7  ;;  %v12784_v33 = vld [vmem:[%s16812_s4 + $0x2] ss:$0 sm:$0xff] }
 0x535   :  { %v11916_v51 = vsel %vm8422_vm10, %v11913_v13, %v11413_v45  ;;  %v12438_v45 = vsel %vm12418_vm1, %v12437_v60, %v12403_v61 }
 0x536   :  { %v11043_v46 = vpop.permute.xlu0 %11042  ;;  %v12459_v27 = vsel %vm12418_vm1, %v12458_v58, %v12409_v48 }
 0x537   :  { %v11905_v24 = vsel %vm234_vm2, %v10861_v19, %v11043_v46  ;;  %v12424_v19 = vsel %vm12418_vm1, %v12423_v12, %v12399_v38 }
 0x538   :  { %v11908_v3 = vsel %vm8406_vm7, %v11905_v24, %v11165_v21  ;;  %12425 = vrot.lane.b32.xlu0 %v12424_v19, %s13036_s11  ;;  %v12408_v21 = vld [vmem:[#allocation2 + $0xb4] sm:$0x1]  ;;  %v12412_v24 = vld [vmem:[#allocation2 + $0xd2] sm:$0x1] }
 0x53a   :  { %v11287_v56 = vpop.permute.xlu0 %11286 }
 0x53b   :  { %v11911_v4 = vsel %vm8414_vm8, %v11908_v3, %v11287_v56  ;;  %v12465_v56 = vrot.slane %v12412_v24, 7 }
 0x53c   :  { %v11914_v41 = vsel %vm8422_vm10, %v11911_v4, %v11409_v23  ;;  %v12451_v23 = vrot.slane %v12408_v21, 7  ;;  %12439 = vrot.lane.b32.xlu0 %v12438_v45, %s13038_s13 }
 0x53d   :  { %v11775_v15 = vpop.permute.xlu1 %11774  ;;  %v11917_v50 = vsel %vm8430_vm9, %v11914_v41, %v11531_v20  ;;  %v12789_v41 = vld [vmem:[%s16813_s5 + $0x68] sm:$0xff] }
 0x53e   :  { %v11920_v62 = vsel %vm8438_vm11, %v11917_v50, %v11653_v9  ;;  %v12452_v20 = vsel %vm12418_vm1, %v12451_v23, %v12407_v22  ;;  %v12411_v9 = vld [vmem:[#allocation2 + $0x42] sm:$0x1] }
 0x53f   :  { %v11045_v49 = vpop.permute.xlu0 %11044  ;;  %v11923_v29 = vsel %vm8446_vm12, %v11920_v62, %v11775_v15  ;;  %v12466_v4 = vsel %vm12418_vm1, %v12465_v56, %v12411_v9  ;;  %v12790_v15 = vld [vmem:[%s16813_s5 + $0x70] sm:$0xf]  ;;  %v12788_v50 = vld [vmem:[%s16813_s5 + $0x60] sm:$0xff] }
 0x540   :  { %v11906_v36 = vsel %vm234_vm2, %v10910_v10, %v11045_v49  ;;  %v12431_v10 = vsel %vm12418_vm1, %v12430_v47, %v12401_v53  ;;  %12453 = vrot.lane.b32.xlu0 %v12452_v20, %s13040_s15 }
 0x541   :  { %v11657_v34 = vpop.permute.xlu1 %11656  ;;  %12432 = vrot.lane.b32.xlu1 %v12431_v10, %s13037_s12 }
 0x544   :  { %12467 = vrot.lane.b32.xlu0 %v12466_v4, %s13042_s17 }
 0x545   :  { %12460 = vrot.lane.b32.xlu1 %v12459_v27, %s13041_s16 }
 0x546   :  { %v11167_v42 = vpop.permute.xlu0 %11166 }
 0x547   :  { %v11909_v2 = vsel %vm8406_vm7, %v11906_v36, %v11167_v42 }
 0x548   :  { %v11897_v35 = vpop.permute.xlu1 %11896 }
 0x549   :  { %v11926_v5 = vsel %vm8454_vm13, %v11923_v29, %v11897_v35 }
 0x54a   :  { %12942 = vmatmul.mubr.msk.f32.vlgmr.msra.gmra.mxu1 %vm8472_vm14, %v11926_v5 }
 0x54b   :  { %12944 = vmatprep.mubr.msk.f32.mxu1 %vm13034_vm0, %v16865_v55  ;;  %12951 = vmatpush3.msk.msra.mxu1 %vm8494_vm6, %v12790_v15 }
 0x54c   :  { %12952 = vmatprep.subr.mxu1 %v16865_v55 }
 0x54d   :  { %v11289_v54 = vpop.permute.xlu0 %11288  ;;  %12953 = vmatpush3.msra.mxu1 %v12789_v41 }
 0x54e   :  { %v11912_v30 = vsel %vm8414_vm8, %v11909_v2, %v11289_v54  ;;  %12954 = vmatprep.subr.mxu1 %v16865_v55 }
 0x54f   :  { %12955 = vmatpush3.msra.mxu1 %v12788_v50 }
 0x550   :  { %12956 = vmatprep.subr.mxu1 %v16865_v55 }
 0x551   :  { %v11533_v1 = vpop.permute.xlu1 %11532 }
 0x555   :  { %v11411_v28 = vpop.permute.xlu0 %11410 }
 0x556   :  { %v11915_v43 = vsel %vm8422_vm10, %v11912_v30, %v11411_v28 }
 0x557   :  { %v11918_v6 = vsel %vm8430_vm9, %v11915_v43, %v11533_v1 }
 0x559   :  { %v11655_v25 = vpop.permute.xlu1 %11654 }
 0x55a   :  { %v11535_v26 = vpop.permute.xlu0 %11534  ;;  %v11921_v32 = vsel %vm8438_vm11, %v11918_v6, %v11655_v25 }
 0x55b   :  { %v11919_v59 = vsel %vm8430_vm9, %v11916_v51, %v11535_v26 }
 0x55c   :  { %v11922_v0 = vsel %vm8438_vm11, %v11919_v59, %v11657_v34  ;;  %v12778_v34 = vld [vmem:[%s16814_s6 + $0x1] ss:$0 sm:$0xff] }
 0x55e   :  { %v11779_v17 = vpop.permute.xlu0 %11778 }
 0x55f   :  { %v11777_v31 = vpop.permute.xlu1 %11776  ;;  %v11925_v8 = vsel %vm8446_vm12, %v11922_v0, %v11779_v17 }
 0x560   :  { %v11924_v7 = vsel %vm8446_vm12, %v11921_v32, %v11777_v31 }
 0x564   :  { %v11899_v37 = vpop.permute.xlu1 %11898 }
 0x565   :  { %v11927_v52 = vsel %vm8454_vm13, %v11924_v7, %v11899_v37 }
 0x566   :  { %12945 = vmatmul.mubr.msk.f32.gmra.mxu1 %vm8472_vm14, %v11927_v52 }
 0x567   :  { %12947 = vmatprep.mubr.msk.f32.mxu1 %vm13034_vm0, %v16865_v55 }
 0x568   :  { %v11901_v44 = vpop.permute.xlu1 %11900 }
 0x569   :  { %v11928_v57 = vsel %vm8454_vm13, %v11925_v8, %v11901_v44 }
 0x56a   :  { %12948 = vmatmul.mubr.msk.f32.gmra.mxu1 %vm8472_vm14, %v11928_v57 }
 0x56b   :  { %12960 = vmatprep.mubr.msk.f32.mxu1 %vm13034_vm0, %v16865_v55  ;;  %vm12390_vm0 = vcmask 26624  }
 0x60a   :  { %v12018_v46 = vpop.f32.mrf.mxu1 }
 0x60b   :  { %v12019_v49 = vadd.f32 %v12778_v34, %v12018_v46 }
 0x60c   :  { %v12943_v3 = vpop.f32.mrf.mxu1 }
 0x60d   :  { %v12034_v54 = vsel %vm234_vm2, %v12019_v49, 0.0 }
 0x626   :  { %v12023_v62 = vpop.f32.mrf.mxu1 }
 0x627   :  { %v12024_v29 = vadd.f32 %v12778_v34, %v12023_v62 }
 0x628   :  { %v12946_v35 = vpop.f32.mrf.mxu1 }
 0x629   :  { %v12035_v5 = vsel %vm234_vm2, %v12024_v29, 0.0 }
 0x62a   :  { %v12028_v42 = vpop.f32.mrf.mxu1  ;;  %v12036_v28 = vadd.f32 %v12035_v5, %v12034_v54 }
 0x62b   :  { %v12029_v1 = vadd.f32 %v12778_v34, %v12028_v42 }
 0x62c   :  { %v12949_v25 = vpop.f32.mrf.mxu1 }
 0x62d   :  { %v12037_v16 = vsel %vm258_vm3, %v12029_v1, 0.0 }
 0x62e   :  { %v12038_v18 = vadd.f32 %v12037_v16, %v12036_v28 }
 0x630   :  { %v12039_v36 = vrot.slane %v12038_v18, 4 }
 0x632   :  { %v12040_v63 = vadd.f32 %v12039_v36, %v12038_v18 }
 0x634   :  { %v12041_v2 = vrot.slane %v12040_v63, 2 }
 0x636   :  { %v12042_v30 = vadd.f32 %v12041_v2, %v12040_v63 }
 0x638   :  { %v12043_v43 = vrot.slane %v12042_v30, 1 }
 0x63a   :  { %v12044_v26 = vadd.f32 %v12043_v43, %v12042_v30 }
 0x63c   :  { %v12046_v31 = vmul.f32 0.055555556, %v12044_v26 }
 0x63e   :  { %v12047_v13 = vsub.f32 %v12019_v49, %v12046_v31  ;;  %v12048_v6 = vsub.f32 %v12024_v29, %v12046_v31  ;;  %v12049_v32 = vsub.f32 %v12029_v1, %v12046_v31 }
 0x640   :  { %v12050_v51 = vmul.f32 %v12047_v13, %v12047_v13  ;;  %v12051_v59 = vmul.f32 %v12048_v6, %v12048_v6  ;;  %v12052_v7 = vmul.f32 %v12049_v32, %v12049_v32 }
 0x642   :  { %v12053_v37 = vsel %vm234_vm2, %v12050_v51, 0.0  ;;  %v12054_v17 = vsel %vm234_vm2, %v12051_v59, 0.0  ;;  %v12056_v0 = vsel %vm258_vm3, %v12052_v7, 0.0 }
 0x643   :  { %v12055_v52 = vadd.f32 %v12054_v17, %v12053_v37 }
 0x645   :  { %v12057_v8 = vadd.f32 %v12056_v0, %v12055_v52 }
 0x647   :  { %v12058_v44 = vrot.slane %v12057_v8, 4 }
 0x649   :  { %v12059_v57 = vadd.f32 %v12058_v44, %v12057_v8 }
 0x64b   :  { %v12060_v38 = vrot.slane %v12059_v57, 2 }
 0x64d   :  { %v12061_v40 = vadd.f32 %v12060_v38, %v12059_v57 }
 0x64f   :  { %v12062_v12 = vrot.slane %v12061_v40, 1 }
 0x651   :  { %v12063_v53 = vadd.f32 %v12062_v12, %v12061_v40 }
 0x653   :  { %v12064_v11 = vmul.f32 0.055555556, %v12063_v53 }
 0x655   :  { %v12065_v47 = vadd.f32 1e-05, %v12064_v11 }
 0x657   :  { %13029 = vrsqrt.f32 %v12065_v47 }
 0x664   :  { %v13030_v61 = vpop.eup %13029 }
 0x665   :  { %v12067_v19 = vmul.f32 %v13030_v61, %v12047_v13  ;;  %v12068_v60 = vmul.f32 %v13030_v61, %v12048_v6  ;;  %v12069_v48 = vmul.f32 %v13030_v61, %v12049_v32 }
 0x667   :  { %v12074_v10 = vmul.f32 %v12783_v14, %v12067_v19  ;;  %v12075_v58 = vmul.f32 %v12783_v14, %v12068_v60  ;;  %v12076_v21 = vmul.f32 %v12783_v14, %v12069_v48 }
 0x669   :  { %v12081_v45 = vadd.f32 %v12784_v33, %v12074_v10  ;;  %v12082_v23 = vadd.f32 %v12784_v33, %v12075_v58  ;;  %v12083_v27 = vadd.f32 %v12784_v33, %v12076_v21 }
 0x66b   :  { %v12084_v22 = vmax.f32 %v12081_v45, 0.0  ;;  %v12085_v20 = vmax.f32 %v12082_v23, 0.0  ;;  %v12086_v46 = vmax.f32 %v12083_v27, 0.0  ;;  %v12787_v27 = vld [vmem:[%s16813_s5 + $0x58] sm:$0xff] }
 0x66c   :  { %12957 = vmatpush3.msra.mxu1 %v12787_v27 }
 0x66d   :  { %v12090_v9 = vcombine.high %v12084_v22, %v12084_v22  ;;  %v12097_v24 = vrot.slane %v12084_v22, %v13360_v39  ;;  %v12139_v56 = vcombine.high %v12085_v20, %v12085_v20  ;;  %v12146_v3 = vrot.slane %v12085_v20, %v13360_v39  ;;  %12958 = vmatprep.subr.mxu1 %v16865_v55  ;;  %v12786_v22 = vld [vmem:[%s16813_s5 + $0x50] sm:$0xff] }
 0x66e   :  { %v12194_v4 = vrot.slane %v12086_v46, %v13360_v39  ;;  %12959 = vmatpush3.msra.mxu1 %v12786_v22  ;;  %v12414_v20 = vld [vmem:[#allocation2 + $0xd4] sm:$0x1]  ;;  %v12398_v55 = vld [vmem:[#allocation2 + $0x90] sm:$0x1] }
 0x66f   :  { %v12104_v15 = vrot.slane %v12090_v9, %v13360_v39  ;;  %v12105_v41 = vcombine.high %v12097_v24, %v12097_v24  ;;  %v12113_v50 = vrot.slane %v12097_v24, %v13360_v39  ;;  %v12153_v34 = vrot.slane %v12139_v56, %v13360_v39  ;;  %v12413_v56 = vld [vmem:[#allocation2 + $0x44] sm:$0x1] }
 0x670   :  { %v12154_v62 = vcombine.high %v12146_v3, %v12146_v3  ;;  %v12162_v49 = vrot.slane %v12146_v3, %v13360_v39  ;;  %v12195_v29 = vcombine.high %v12194_v4, %v12194_v4  ;;  %v12202_v35 = vrot.slane %v12194_v4, %v13360_v39 }
 0x671   :  { %v12106_v5 = vcombine.high %v12104_v15, %v12104_v15  ;;  %v12120_v42 = vrot.slane %v12104_v15, %v13360_v39  ;;  %v12127_v54 = vrot.slane %v12105_v41, %v13360_v39  ;;  %v12135_v1 = vcombine.high %v12113_v50, %v12113_v50  ;;  %v12426_v15 = vpop.permute.xlu0 %12425 }
 0x672   :  { %v12155_v28 = vcombine.high %v12153_v34, %v12153_v34  ;;  %v12169_v25 = vrot.slane %v12153_v34, %v13360_v39  ;;  %v12176_v16 = vrot.slane %v12154_v62, %v13360_v39  ;;  %v12184_v18 = vcombine.high %v12162_v49, %v12162_v49  ;;  %v12433_v34 = vpop.permute.xlu1 %12432 }
 0x673   :  { %v12134_v36 = vrot.slane %v12106_v5, %v13360_v39  ;;  %v12137_v63 = vcombine.high %v12127_v54, %v12127_v54  ;;  %v12209_v2 = vrot.slane %v12195_v29, %v13360_v39  ;;  %v12246_v30 = vcombine.low %v12113_v50, %v12127_v54  ;;  %v12397_v50 = vld [vmem:[#allocation2] sm:$0x1] }
 0x674   :  { %v12183_v43 = vrot.slane %v12155_v28, %v13360_v39  ;;  %v12185_v26 = vcombine.high %v12169_v25, %v12169_v25  ;;  %v12186_v31 = vcombine.high %v12176_v16, %v12176_v16  ;;  %v12260_v13 = vrot.slane %v12135_v1, %v13360_v39 }
 0x675   :  { %v12253_v6 = vrot.slane %v12246_v30, %v13360_v39  ;;  %v12269_v32 = vcombine.low %v12137_v63, %v12120_v42  ;;  %v12283_v51 = vrot.slane %v12134_v36, %v13360_v39  ;;  %v12785_v59 = vcombine.high %v12120_v42, %v12134_v36 }
 0x676   :  { %v12187_v7 = vcombine.high %v12183_v43, %v12183_v43  ;;  %v12306_v37 = vrot.slane %v12162_v49, %v13360_v39  ;;  %v12315_v17 = vcombine.low %v12176_v16, %v12184_v18  ;;  %v12329_v52 = vrot.slane %v12186_v31, %v13360_v39  ;;  %v12440_v49 = vpop.permute.xlu0 %12439 }
 0x677   :  { %v12261_v0 = vcombine.low %v12253_v6, %v12260_v13  ;;  %v12276_v8 = vrot.slane %v12269_v32, %v13360_v39  ;;  %v12299_v44 = vrot.slane %v12785_v59, %v13360_v39  ;;  %v12338_v57 = vcombine.low %v12169_v25, %v12183_v43  ;;  %v12791_v43 = vld [vmem:[%s16814_s6 + $0x2] ss:$0 sm:$0xff] }
 0x678   :  { %v12322_v38 = vrot.slane %v12315_v17, %v13360_v39  ;;  %v12352_v40 = vrot.slane %v12185_v26, %v13360_v39  ;;  %v12361_v12 = vcombine.low %v12187_v7, %v12202_v35  ;;  %v12375_v60 = vrot.slane %v12209_v2, %v13360_v39  ;;  %v12461_v35 = vpop.permute.xlu1 %12460 }
 0x679   :  { %v12268_v53 = vrot.slane %v12261_v0, %v13360_v39  ;;  %v12284_v11 = vcombine.low %v12276_v8, %v12283_v51  ;;  %v12307_v47 = vcombine.low %v12299_v44, %v12306_v37  ;;  %v12345_v61 = vrot.slane %v12338_v57, %v13360_v39 }
 0x67a   :  { %v12330_v14 = vcombine.low %v12322_v38, %v12329_v52  ;;  %v12368_v19 = vrot.slane %v12361_v12, %v13360_v39  ;;  %v12472_v9 = vrot.slane %v12414_v20, 7  ;;  %v12417_v41 = vrot.slane %v12398_v55, 7  ;;  %v12454_v5 = vpop.permute.xlu0 %12453 }
 0x67b   :  { %v12291_v48 = vrot.slane %v12284_v11, %v13360_v39  ;;  %v12314_v33 = vrot.slane %v12307_v47, %v13360_v39  ;;  %v12353_v10 = vcombine.low %v12345_v61, %v12352_v40  ;;  %12391 = vst.msk [vmem:[#allocation2 + $0x11] sm:$0x7] %vm12390_vm0, %v12268_v53  ;;  %v14_v30 = vstv %s16815_s8 }
 0x67c   :  { %v12337_v58 = vrot.slane %v12330_v14, %v13360_v39  ;;  %v12376_v21 = vcombine.low %v12368_v19, %v12375_v60  ;;  %v12473_v4 = vsel %vm12418_vm1, %v12472_v9, %v12413_v56  ;;  %v12419_v62 = vsel %vm12418_vm1, %v12417_v41, %v12397_v50  ;;  %15 = vst [vmem:[#allocation3] sm:$0x1] %v14_v30  ;;  %v12794_v19 = vld [vmem:[%s16811_s3 + $0x3] ss:$0 sm:$0xff] }
 0x67d   :  { %v12360_v45 = vrot.slane %v12353_v10, %v13360_v39  ;;  %12393 = vst.msk [vmem:[#allocation2 + $0x31] sm:$0x7] %vm12390_vm0, %v12314_v33  ;;  %12392 = vst.msk [vmem:[#allocation2 + $0x21] sm:$0x7] %vm12390_vm0, %v12291_v48  ;;  %v12477_v29 = vsel %vm234_vm2, %v12419_v62, %v12426_v15  ;;  %v12795_v48 = vld [vmem:[%s16812_s4 + $0x3] ss:$0 sm:$0xff] }
 0x67e   :  { %v12383_v23 = vrot.slane %v12376_v21, %v13360_v39  ;;  %12394 = vst.msk [vmem:[#allocation2 + $0xa1] sm:$0x7] %vm12390_vm0, %v12337_v58  ;;  %v12478_v42 = vsel %vm8406_vm7, %v12477_v29, %v12433_v34  ;;  %v12468_v25 = vpop.permute.xlu0 %12467  ;;  %v12796_v58 = vld [vmem:[%s16816_s7] ss:$0 sm:$0xff]  ;;  %vm12626_vm2 = vcmask 1024  }
 0x67f   :  { %12395 = vst.msk [vmem:[#allocation2 + $0xb1] sm:$0x7] %vm12390_vm0, %v12360_v45  ;;  %v12479_v54 = vsel %vm8414_vm8, %v12478_v42, %v12440_v49 }
 0x680   :  { %12396 = vst.msk [vmem:[#allocation2 + $0xc1] sm:$0x7] %vm12390_vm0, %v12383_v23 }
 0x683   :  { %v12797_v27 = vld [vmem:[#allocation3] ss:$0 sm:$0xff] }
 0x684   :  { %v12405_v24 = vld [vmem:[#allocation2 + $0x22] sm:$0x1] }
 0x686   :  { %v12406_v39 = vld [vmem:[#allocation2 + $0xb2] sm:$0x1] }
 0x687   :  { %v12444_v46 = vrot.slane %v12406_v39, 7 }
 0x689   :  { %v12445_v3 = vsel %vm12418_vm1, %v12444_v46, %v12405_v24 }
 0x68a   :  { %12446 = vrot.lane.b32.xlu1 %v12445_v3, %s13039_s14 }
 0x68e   :  { %12474 = vrot.lane.b32.xlu1 %v12473_v4, %s13043_s18 }
 0x6fc   :  { %v12447_v1 = vpop.permute.xlu1 %12446 }
 0x6fd   :  { %v12480_v28 = vsel %vm8422_vm10, %v12479_v54, %v12447_v1 }
 0x6fe   :  { %v12481_v16 = vsel %vm8430_vm9, %v12480_v28, %v12454_v5 }
 0x6ff   :  { %v12482_v18 = vsel %vm8438_vm11, %v12481_v16, %v12461_v35 }
 0x700   :  { %v12483_v36 = vsel %vm8446_vm12, %v12482_v18, %v12468_v25  ;;  %v12475_v63 = vpop.permute.xlu1 %12474 }
 0x701   :  { %v12484_v2 = vsel %vm8454_vm13, %v12483_v36, %v12475_v63 }
 0x702   :  { %12961 = vmatmul.mubr.msk.f32.vlgmr.msra.gmra.mxu1 %vm8472_vm14, %v12484_v2 }
 0x7c2   :  { %v12568_v26 = vpop.f32.mrf.mxu1 }
 0x7c3   :  { %v12569_v31 = vadd.f32 %v12791_v43, %v12568_v26 }
 0x7c4   :  { %v12962_v13 = vpop.f32.mrf.mxu1 }
 0x7c5   :  { %v12574_v6 = vsel %vm258_vm3, %v12569_v31, 0.0 }
 0x7c6   :  { %v12575_v32 = vrot.slane %v12574_v6, 4 }
 0x7c8   :  { %v12576_v51 = vadd.f32 %v12575_v32, %v12574_v6 }
 0x7ca   :  { %v12577_v59 = vrot.slane %v12576_v51, 2 }
 0x7cc   :  { %v12578_v7 = vadd.f32 %v12577_v59, %v12576_v51 }
 0x7ce   :  { %v12579_v37 = vrot.slane %v12578_v7, 1 }
 0x7d0   :  { %v12580_v17 = vadd.f32 %v12579_v37, %v12578_v7 }
 0x7d2   :  { %v12582_v52 = vmul.f32 0.5, %v12580_v17 }
 0x7d4   :  { %v12583_v0 = vsub.f32 %v12569_v31, %v12582_v52 }
 0x7d6   :  { %v12584_v8 = vmul.f32 %v12583_v0, %v12583_v0 }
 0x7d8   :  { %v12585_v44 = vsel %vm258_vm3, %v12584_v8, 0.0 }
 0x7d9   :  { %v12586_v57 = vrot.slane %v12585_v44, 4 }
 0x7db   :  { %v12587_v38 = vadd.f32 %v12586_v57, %v12585_v44 }
 0x7dd   :  { %v12588_v40 = vrot.slane %v12587_v38, 2 }
 0x7df   :  { %v12589_v12 = vadd.f32 %v12588_v40, %v12587_v38 }
 0x7e1   :  { %v12590_v53 = vrot.slane %v12589_v12, 1 }
 0x7e3   :  { %v12591_v11 = vadd.f32 %v12590_v53, %v12589_v12 }
 0x7e5   :  { %v12592_v47 = vmul.f32 0.5, %v12591_v11 }
 0x7e7   :  { %v12593_v61 = vadd.f32 1e-05, %v12592_v47 }
 0x7e9   :  { %13031 = vrsqrt.f32 %v12593_v61 }
 0x7f6   :  { %v13032_v14 = vpop.eup %13031 }
 0x7f7   :  { %v12595_v60 = vmul.f32 %v13032_v14, %v12583_v0 }
 0x7f9   :  { %v12600_v33 = vmul.f32 %v12794_v19, %v12595_v60 }
 0x7fb   :  { %v12605_v10 = vadd.f32 %v12795_v48, %v12600_v33 }
 0x7fd   :  { %v12606_v21 = vmax.f32 %v12605_v10, 0.0 }
 0x7ff   :  { %v12614_v45 = vmul.f32 %v12796_v58, %v12606_v21 }
 0x801   :  { %v12615_v23 = vsel %vm258_vm3, %v12614_v45, 0.0 }
 0x802   :  { %12616 = vadd.xlane.f32.xlu0 %v12615_v23 }
 0x88b   :  { %v12617_v22 = vpop.xlane.xlu0 %12616 }
 0x88c   :  { %v12625_v20 = vadd.f32 %v12797_v27, %v12617_v22 }
 0x88e   :  { %12627 = vst.msk [vmem:[%s16817_s9] sm:$0x3] %vm12626_vm2, %v12625_v20 }

</bundles_post_ra>
